<compile_context>
chip_gen: v6e
topology: v6e:2x2x1
jax: 0.10.0
libtpu: 0.0.40
codegen_flags: <defaults>
</compile_context>

<pallas_src>
from functools import partial

import jax
import jax.numpy as jnp
from jax.experimental import pallas as pl
from jax.experimental.pallas import tpu as pltpu

PAD, SOS, UNK, EOS = 0, 1, 2, 3
WORD_DROPOUT = 0.5


def _round_up(n, m):
    return ((n + m - 1) // m) * m


# ----------------------------- Pallas kernels ------------------------------

def _rnn_dir_kernel(x_ref, h0_ref, wih_ref, whh_ref, b_ref, len_ref,
                    *refs, reverse, with_outputs):
    """Single-direction vanilla (tanh) RNN, masked by per-row lengths.

    x_ref   : (S, B, E) bf16 time-major inputs (B, H already sublane/lane padded)
    h0_ref  : (B, H)    f32 initial hidden
    wih_ref : (E, H)    bf16 W_ih^T        whh_ref : (H, H) bf16 W_hh^T
    b_ref   : (1, H)    f32 (b_ih + b_hh)
    len_ref : (B, 1)    int32 per-row valid length
    outputs : [out_ref (S,B,H) f32 if with_outputs], hT_ref (B,H) f32
    scratch : h_sc (B,H) f32, xw_sc (S,B,H) f32
    reverse : iterate t = S-1..0 (packed backward direction) instead of 0..S-1
    """
    if with_outputs:
        out_ref, hT_ref, h_sc, xw_sc = refs
    else:
        out_ref = None
        hT_ref, h_sc, xw_sc = refs

    S, B, E = x_ref.shape
    H = h0_ref.shape[1]

    # Hoisted input projection: one MXU-shaped (S*B, E) @ (E, H) matmul with
    # the bias folded in, so the serial recurrence only does h @ Whh + xw[t].
    xw = jnp.dot(x_ref[...].reshape(S * B, E), wih_ref[...],
                 preferred_element_type=jnp.float32)
    xw_sc[...] = (xw + b_ref[...]).reshape(S, B, H)

    h_sc[...] = h0_ref[...]
    lens = len_ref[...]                                   # (B, 1) int32

    def step(s, carry):
        t = (S - 1 - s) if reverse else s
        h_prev = h_sc[...]
        h_new = jnp.tanh(
            xw_sc[t]
            + jnp.dot(h_prev.astype(jnp.bfloat16), whh_ref[...],
                      preferred_element_type=jnp.float32))
        valid = lens > t                                  # (B, 1) bool
        h_sc[...] = jnp.where(valid, h_new, h_prev)
        if out_ref is not None:
            out_ref[t] = jnp.where(valid, h_new, 0.0)     # pad_packed zeros
        return carry

    # Unrolled time loop (S is a small static constant) for LLO visibility.
    jax.lax.fori_loop(0, S, step, 0, unroll=(S <= 32))
    hT_ref[...] = h_sc[...]


def _latent_kernel(h_ref, wml_ref, bml_ref, eps_ref, wl_ref, bl_ref,
                   mean_ref, logv_ref, z_ref, hdec_ref, *, L):
    """Fused [hidden2mean | hidden2logv] + reparameterize + latent2hidden."""
    h = h_ref[...]
    ml = jnp.dot(h, wml_ref[...], preferred_element_type=jnp.float32) + bml_ref[...]
    mean = ml[:, :L]
    logv = ml[:, L:]
    std = jnp.exp(0.5 * logv)
    z = eps_ref[...] * std + mean
    hdec = jnp.dot(z, wl_ref[...], preferred_element_type=jnp.float32) + bl_ref[...]
    mean_ref[...] = mean
    logv_ref[...] = logv
    z_ref[...] = z
    hdec_ref[...] = hdec


def _proj_logsoftmax_kernel(x_ref, w_ref, b_ref, o_ref):
    """outputs2vocab linear (bf16 MXU operands) + log_softmax over vocab."""
    logits = jnp.dot(x_ref[...], w_ref[...],
                     preferred_element_type=jnp.float32) + b_ref[...]
    m = jnp.max(logits, axis=-1, keepdims=True)
    lse = jnp.log(jnp.sum(jnp.exp(logits - m), axis=-1, keepdims=True)) + m
    o_ref[...] = logits - lse


# ------------------------------ thin wrappers -------------------------------

def rnn_direction(x_tm, h0, wih, whh, b, lens_col, *, reverse, with_outputs):
    S, B, _ = x_tm.shape          # B, H already padded to (8, 128) multiples
    H = h0.shape[1]
    kern = partial(_rnn_dir_kernel, reverse=reverse, with_outputs=with_outputs)
    if with_outputs:
        out_shape = (jax.ShapeDtypeStruct((S, B, H), jnp.float32),
                     jax.ShapeDtypeStruct((B, H), jnp.float32))
    else:
        out_shape = jax.ShapeDtypeStruct((B, H), jnp.float32)
    res = pl.pallas_call(
        kern,
        out_shape=out_shape,
        scratch_shapes=[pltpu.VMEM((B, H), jnp.float32),        # h_sc
                        pltpu.VMEM((S, B, H), jnp.float32)],    # xw_sc (hoisted xW+b)
    )(x_tm, h0, wih, whh, b, lens_col)
    if with_outputs:
        return res[0], res[1]
    return None, res


def bi_rnn(params, pfx, emb_tm, lengths, h0_f, h0_b, *, need_outputs):
    """Packed bidirectional RNN.  emb_tm: (S, B, E) f32 time-major.

    Pads B -> multiple of 8 and H -> multiple of 128, runs forward and
    reversed-loop backward kernels with bf16 weights, slices back to logical
    shapes.  Returns (out_f, out_b, hT_f, hT_b); outputs are time-major
    (S, B, H) or None when need_outputs=False.
    """
    S, B, E = emb_tm.shape
    H = h0_f.shape[1]
    Bp, Hp = _round_up(B, 8), _round_up(H, 128)

    x = jnp.pad(emb_tm, ((0, 0), (0, Bp - B), (0, 0))).astype(jnp.bfloat16)
    lens_col = jnp.pad(lengths.astype(jnp.int32), (0, Bp - B))[:, None]

    def pad_cols(w):          # (*, H) -> (*, Hp)
        return jnp.pad(w, ((0, 0), (0, Hp - H)))

    def pad_hh(w):            # (H, H) -> (Hp, Hp)
        return jnp.pad(w, ((0, Hp - H), (0, Hp - H)))

    def pad_h0(h):            # (B, H) -> (Bp, Hp)
        return jnp.pad(h, ((0, Bp - B), (0, Hp - H)))

    def run(d, h0, reverse):
        wih = pad_cols(params[f"{pfx}_{d}_wih"]).astype(jnp.bfloat16)
        whh = pad_hh(params[f"{pfx}_{d}_whh"]).astype(jnp.bfloat16)
        bias = pad_cols(params[f"{pfx}_{d}_b"])
        return rnn_direction(x, pad_h0(h0), wih, whh, bias, lens_col,
                             reverse=reverse, with_outputs=need_outputs)

    out_f, hT_f = run("f", h0_f, reverse=False)
    out_b, hT_b = run("b", h0_b, reverse=True)

    hT_f, hT_b = hT_f[:B, :H], hT_b[:B, :H]
    if need_outputs:
        out_f, out_b = out_f[:, :B, :H], out_b[:, :B, :H]
    return out_f, out_b, hT_f, hT_b


def proj_logsoftmax(flat, w, b, *, row_tile=256):
    """Row-tiled outputs2vocab + log_softmax; w/b stay VMEM-resident per tile."""
    R, F = flat.shape
    V = w.shape[1]
    rt = min(row_tile, _round_up(R, 8))
    Rp = _round_up(R, rt)
    if Rp != R:
        flat = jnp.pad(flat, ((0, Rp - R), (0, 0)))
    out = pl.pallas_call(
        _proj_logsoftmax_kernel,
        out_shape=jax.ShapeDtypeStruct((Rp, V), jnp.float32),
        grid_spec=pltpu.PrefetchScalarGridSpec(
            num_scalar_prefetch=0,
            grid=(Rp // rt,),
            in_specs=[pl.BlockSpec((rt, F), lambda i: (i, 0)),
                      pl.BlockSpec((F, V), lambda i: (0, 0)),
                      pl.BlockSpec((1, V), lambda i: (0, 0))],
            out_specs=pl.BlockSpec((rt, V), lambda i: (i, 0))),
        compiler_params=pltpu.CompilerParams(
            dimension_semantics=("parallel",),
            vmem_limit_bytes=32 * 1024 * 1024),
    )(flat, w, b)
    return out[:R]


# ------------------------------- forward pass -------------------------------

def sentence_vae_forward(params, tokens, lengths, drop_key, z_key):
    B, S = tokens.shape
    V, E = params["embedding"].shape
    H = params["enc_f_whh"].shape[0]
    L = params["w_mean"].shape[1]

    # torch.sort(lenght, descending=True); inputSequence = inputSequence[indices]
    order = jnp.argsort(-lengths)
    sorted_len = lengths[order].astype(jnp.int32)
    tokens_s = tokens[order]

    # gather embeddings directly into time-major (S, B, E) layout
    emb_tm = params["embedding"][tokens_s.T]
    h0_zero = jnp.zeros((B, H), jnp.float32)

    # ----- encoder (packed bidirectional RNN; only h_n is used) -----
    _, _, henc_f, henc_b = bi_rnn(params, "enc", emb_tm, sorted_len,
                                  h0_zero, h0_zero, need_outputs=False)
    # replicate torch `hidden.view(batchSize, H * hiddenFactor)` on (2, B, H)
    hidden_flat = jnp.reshape(jnp.stack([henc_f, henc_b], axis=0), (B, 2 * H))

    # ----- latent path (fused [mean | logv] projection) -----
    eps = jax.random.normal(z_key, (B, L), dtype=jnp.float32)      # torch.randn
    wml = jnp.concatenate([params["w_mean"], params["w_logv"]], axis=1)  # (2H, 2L)
    bml = jnp.concatenate([params["b_mean"], params["b_logv"]], axis=1)  # (1, 2L)
    mean, logv, z, hdec = pl.pallas_call(
        partial(_latent_kernel, L=L),
        out_shape=(jax.ShapeDtypeStruct((B, L), jnp.float32),
                   jax.ShapeDtypeStruct((B, L), jnp.float32),
                   jax.ShapeDtypeStruct((B, L), jnp.float32),
                   jax.ShapeDtypeStruct((B, 2 * H), jnp.float32)),
    )(hidden_flat, wml, bml, eps, params["w_l2h"], params["b_l2h"])

    h0_dec = jnp.reshape(hdec, (2, B, H))       # `.view(hiddenFactor, batch, H)`

    # ----- word dropout on decoder input tokens -----
    prob = jax.random.uniform(drop_key, (B, S), dtype=jnp.float32)
    is_special = ((tokens_s - SOS) * (tokens_s - PAD)) == 0
    prob = jnp.where(is_special, 1.0, prob)
    dec_tokens = jnp.where(prob < WORD_DROPOUT, UNK, tokens_s)
    dec_emb_tm = params["embedding"][dec_tokens.T]                 # (S, B, E)
    # TODO(synk): nn.Dropout(p=embeddingsSize) in the source is invalid (p=50);
    # treated as identity (eval-mode dropout).

    # ----- decoder (packed bidirectional RNN with initial hidden h0_dec) -----
    out_f, out_b, _, _ = bi_rnn(params, "dec", dec_emb_tm, sorted_len,
                                h0_dec[0], h0_dec[1], need_outputs=True)
    dec_out = jnp.concatenate([out_f, out_b], axis=-1)             # (S, B, 2H)
    # NOTE: pad_packed_sequence pads to max(lengths); demo uses max(lengths) == S.

    # ----- outputs2vocab + log_softmax (row-tiled, bf16 weights) -----
    flat = dec_out.reshape(S * B, 2 * H).astype(jnp.bfloat16)
    logp_flat = proj_logsoftmax(flat, params["w_out"].astype(jnp.bfloat16),
                                params["b_out"])
    # unsort batch (_, reversedIndex = torch.sort(indices)) folded into the
    # single final batch-major relayout of the log-probs.
    rev_order = jnp.argsort(order)
    logp = jnp.transpose(logp_flat.reshape(S, B, V), (1, 0, 2))[rev_order]

    return logp, mean, logv, z


# ------------------------------ parameter init ------------------------------

def init_params(key, V, E, H, L):
    ks = jax.random.split(key, 21)

    def w(k, shape, scale=0.1):
        return (scale * jax.random.normal(k, shape)).astype(jnp.float32)

    return dict(
        embedding=w(ks[0], (V, E)),
        # encoder (bidirectional vanilla RNN, 1 layer)
        enc_f_wih=w(ks[1], (E, H)), enc_f_whh=w(ks[2], (H, H)), enc_f_b=w(ks[3], (1, H)),
        enc_b_wih=w(ks[4], (E, H)), enc_b_whh=w(ks[5], (H, H)), enc_b_b=w(ks[6], (1, H)),
        # decoder (bidirectional vanilla RNN, 1 layer)
        dec_f_wih=w(ks[7], (E, H)), dec_f_whh=w(ks[8], (H, H)), dec_f_b=w(ks[9], (1, H)),
        dec_b_wih=w(ks[10], (E, H)), dec_b_whh=w(ks[11], (H, H)), dec_b_b=w(ks[12], (1, H)),
        # hidden2mean / hidden2logv / latent2hidden / outputs2vocab
        w_mean=w(ks[13], (2 * H, L)), b_mean=w(ks[14], (1, L)),
        w_logv=w(ks[15], (2 * H, L)), b_logv=w(ks[16], (1, L)),
        w_l2h=w(ks[17], (L, 2 * H)), b_l2h=w(ks[18], (1, 2 * H)),
        w_out=w(ks[19], (2 * H, V)), b_out=w(ks[20], (1, V)),
    )


# ----------------------------------- main ------------------------------------

if __name__ == "__main__":
    V, E, H, L = 32, 16, 32, 8      # vocab, embedding, hidden, latent
    B, S = 2, 8                     # batch, max sequence length

    key = jax.random.PRNGKey(0)
    pk, tk, dk, zk = jax.random.split(key, 4)

    params = init_params(pk, V, E, H, L)

    tokens = jax.random.randint(tk, (B, S), 4, V, dtype=jnp.int32)
    tokens = tokens.at[:, 0].set(SOS)              # SOS at the start of every row
    lengths = jnp.array([6, 8], dtype=jnp.int32)   # max(lengths) == S
    tokens = tokens.at[0, 6:].set(PAD)             # pad the short sequence

    fwd = jax.jit(sentence_vae_forward)
    logp, mean, logv, z = fwd(params, tokens, lengths, dk, zk)
    jax.block_until_ready((logp, mean, logv, z))

    assert logp.shape == (B, S, V)
    assert mean.shape == (B, L) and logv.shape == (B, L) and z.shape == (B, L)
    assert bool(jnp.all(jnp.isfinite(logp)))
    print("KERNEL_OK")
</pallas_src>

<mosaic_0001>
module attributes {stable_mosaic.version = 11 : i64} {
  func.func @_rnn_dir_kernel(%arg0: memref<8x8x16xbf16, #tpu.memory_space<vmem>>, %arg1: memref<8x128xf32, #tpu.memory_space<vmem>>, %arg2: memref<16x128xbf16, #tpu.memory_space<vmem>>, %arg3: memref<128x128xbf16, #tpu.memory_space<vmem>>, %arg4: memref<1x128xf32, #tpu.memory_space<vmem>>, %arg5: memref<8x1xi32, #tpu.memory_space<vmem>>, %arg6: memref<8x128xf32, #tpu.memory_space<vmem>>, %arg7: memref<8x128xf32, #tpu.memory_space<vmem>>, %arg8: memref<8x8x128xf32, #tpu.memory_space<vmem>>) attributes {dimension_semantics = [], scalar_prefetch = 0 : i64, scratch_operands = 2 : i64, tpu.core_type = #tpu.core_type<tc>} {
    %c0 = arith.constant 0 : index
    %c0_0 = arith.constant 0 : index
    %c0_1 = arith.constant 0 : index
    %0 = vector.load %arg0[%c0, %c0_0, %c0_1] : memref<8x8x16xbf16, #tpu.memory_space<vmem>>, vector<8x8x16xbf16>
    %1 = vector.shape_cast %0 : vector<8x8x16xbf16> to vector<64x16xbf16>
    %c0_2 = arith.constant 0 : index
    %c0_3 = arith.constant 0 : index
    %2 = vector.load %arg2[%c0_2, %c0_3] : memref<16x128xbf16, #tpu.memory_space<vmem>>, vector<16x128xbf16>
    %cst = arith.constant dense<0.000000e+00> : vector<64x128xf32>
    %3 = tpu.matmul %1, %2, %cst {dimension_numbers = #tpu.dot_dimension_numbers<[1], [0], [0], [1], [0, 0, 1, 1], [], []>} : vector<64x16xbf16>, vector<16x128xbf16>, vector<64x128xf32> -> vector<64x128xf32>
    %c0_4 = arith.constant 0 : index
    %c0_5 = arith.constant 0 : index
    %4 = vector.load %arg4[%c0_4, %c0_5] : memref<1x128xf32, #tpu.memory_space<vmem>>, vector<1x128xf32>
    %5 = vector.broadcast %4 : vector<1x128xf32> to vector<64x128xf32>
    %6 = arith.addf %3, %5 : vector<64x128xf32>
    %7 = vector.shape_cast %6 : vector<64x128xf32> to vector<8x8x128xf32>
    %c0_6 = arith.constant 0 : index
    %c0_7 = arith.constant 0 : index
    %c0_8 = arith.constant 0 : index
    %8 = vector.load %arg8[%c0_6, %c0_7, %c0_8] : memref<8x8x128xf32, #tpu.memory_space<vmem>>, vector<8x8x128xf32>
    tpu.vector_store %arg8[%c0_6, %c0_7, %c0_8], %7 {strides = array<i32>} : memref<8x8x128xf32, #tpu.memory_space<vmem>>, vector<8x8x128xf32>,
    %c0_9 = arith.constant 0 : index
    %c0_10 = arith.constant 0 : index
    %9 = vector.load %arg1[%c0_9, %c0_10] : memref<8x128xf32, #tpu.memory_space<vmem>>, vector<8x128xf32>
    %c0_11 = arith.constant 0 : index
    %c0_12 = arith.constant 0 : index
    %10 = vector.load %arg7[%c0_11, %c0_12] : memref<8x128xf32, #tpu.memory_space<vmem>>, vector<8x128xf32>
    tpu.vector_store %arg7[%c0_11, %c0_12], %9 {strides = array<i32>} : memref<8x128xf32, #tpu.memory_space<vmem>>, vector<8x128xf32>,
    %c0_13 = arith.constant 0 : index
    %c0_14 = arith.constant 0 : index
    %11 = vector.load %arg5[%c0_13, %c0_14] : memref<8x1xi32, #tpu.memory_space<vmem>>, vector<8x1xi32>
    %c0_i32 = arith.constant 0 : i32
    %c7_i32 = arith.constant 7 : i32
    %12 = arith.subi %c7_i32, %c0_i32 : i32
    %c0_15 = arith.constant 0 : index
    %c0_16 = arith.constant 0 : index
    %13 = vector.load %arg7[%c0_15, %c0_16] : memref<8x128xf32, #tpu.memory_space<vmem>>, vector<8x128xf32>
    %14 = arith.index_cast %12 : i32 to index
    %c0_17 = arith.constant 0 : index
    %c0_18 = arith.constant 0 : index
    %15 = vector.load %arg8[%14, %c0_17, %c0_18] : memref<8x8x128xf32, #tpu.memory_space<vmem>>, vector<1x8x128xf32>
    %16 = vector.shape_cast %15 : vector<1x8x128xf32> to vector<8x128xf32>
    %17 = arith.truncf %13 : vector<8x128xf32> to vector<8x128xbf16>
    %c0_19 = arith.constant 0 : index
    %c0_20 = arith.constant 0 : index
    %18 = vector.load %arg3[%c0_19, %c0_20] : memref<128x128xbf16, #tpu.memory_space<vmem>>, vector<128x128xbf16>
    %cst_21 = arith.constant dense<0.000000e+00> : vector<8x128xf32>
    %19 = tpu.matmul %17, %18, %cst_21 {dimension_numbers = #tpu.dot_dimension_numbers<[1], [0], [0], [1], [0, 0, 1, 1], [], []>} : vector<8x128xbf16>, vector<128x128xbf16>, vector<8x128xf32> -> vector<8x128xf32>
    %20 = arith.addf %16, %19 : vector<8x128xf32>
    %21 = math.tanh %20 : vector<8x128xf32>
    %22 = vector.broadcast %12 : i32 to vector<8x1xi32>
    %23 = arith.cmpi sgt, %11, %22 : vector<8x1xi32>
    %24 = vector.shape_cast %23 : vector<8x1xi1> to vector<8x1xi1>
    %25 = vector.broadcast %24 : vector<8x1xi1> to vector<8x128xi1>
    %26 = arith.select %25, %21, %13 : vector<8x128xi1>, vector<8x128xf32>
    %c0_22 = arith.constant 0 : index
    %c0_23 = arith.constant 0 : index
    %27 = vector.load %arg7[%c0_22, %c0_23] : memref<8x128xf32, #tpu.memory_space<vmem>>, vector<8x128xf32>
    tpu.vector_store %arg7[%c0_22, %c0_23], %26 {strides = array<i32>} : memref<8x128xf32, #tpu.memory_space<vmem>>, vector<8x128xf32>,
    %c1_i32 = arith.constant 1 : i32
    %c7_i32_24 = arith.constant 7 : i32
    %28 = arith.subi %c7_i32_24, %c1_i32 : i32
    %c0_25 = arith.constant 0 : index
    %c0_26 = arith.constant 0 : index
    %29 = vector.load %arg7[%c0_25, %c0_26] : memref<8x128xf32, #tpu.memory_space<vmem>>, vector<8x128xf32>
    %30 = arith.index_cast %28 : i32 to index
    %c0_27 = arith.constant 0 : index
    %c0_28 = arith.constant 0 : index
    %31 = vector.load %arg8[%30, %c0_27, %c0_28] : memref<8x8x128xf32, #tpu.memory_space<vmem>>, vector<1x8x128xf32>
    %32 = vector.shape_cast %31 : vector<1x8x128xf32> to vector<8x128xf32>
    %33 = arith.truncf %29 : vector<8x128xf32> to vector<8x128xbf16>
    %c0_29 = arith.constant 0 : index
    %c0_30 = arith.constant 0 : index
    %34 = vector.load %arg3[%c0_29, %c0_30] : memref<128x128xbf16, #tpu.memory_space<vmem>>, vector<128x128xbf16>
    %cst_31 = arith.constant dense<0.000000e+00> : vector<8x128xf32>
    %35 = tpu.matmul %33, %34, %cst_31 {dimension_numbers = #tpu.dot_dimension_numbers<[1], [0], [0], [1], [0, 0, 1, 1], [], []>} : vector<8x128xbf16>, vector<128x128xbf16>, vector<8x128xf32> -> vector<8x128xf32>
    %36 = arith.addf %32, %35 : vector<8x128xf32>
    %37 = math.tanh %36 : vector<8x128xf32>
    %38 = vector.broadcast %28 : i32 to vector<8x1xi32>
    %39 = arith.cmpi sgt, %11, %38 : vector<8x1xi32>
    %40 = vector.shape_cast %39 : vector<8x1xi1> to vector<8x1xi1>
    %41 = vector.broadcast %40 : vector<8x1xi1> to vector<8x128xi1>
    %42 = arith.select %41, %37, %29 : vector<8x128xi1>, vector<8x128xf32>
    %c0_32 = arith.constant 0 : index
    %c0_33 = arith.constant 0 : index
    %43 = vector.load %arg7[%c0_32, %c0_33] : memref<8x128xf32, #tpu.memory_space<vmem>>, vector<8x128xf32>
    tpu.vector_store %arg7[%c0_32, %c0_33], %42 {strides = array<i32>} : memref<8x128xf32, #tpu.memory_space<vmem>>, vector<8x128xf32>,
    %c2_i32 = arith.constant 2 : i32
    %c7_i32_34 = arith.constant 7 : i32
    %44 = arith.subi %c7_i32_34, %c2_i32 : i32
    %c0_35 = arith.constant 0 : index
    %c0_36 = arith.constant 0 : index
    %45 = vector.load %arg7[%c0_35, %c0_36] : memref<8x128xf32, #tpu.memory_space<vmem>>, vector<8x128xf32>
    %46 = arith.index_cast %44 : i32 to index
    %c0_37 = arith.constant 0 : index
    %c0_38 = arith.constant 0 : index
    %47 = vector.load %arg8[%46, %c0_37, %c0_38] : memref<8x8x128xf32, #tpu.memory_space<vmem>>, vector<1x8x128xf32>
    %48 = vector.shape_cast %47 : vector<1x8x128xf32> to vector<8x128xf32>
    %49 = arith.truncf %45 : vector<8x128xf32> to vector<8x128xbf16>
    %c0_39 = arith.constant 0 : index
    %c0_40 = arith.constant 0 : index
    %50 = vector.load %arg3[%c0_39, %c0_40] : memref<128x128xbf16, #tpu.memory_space<vmem>>, vector<128x128xbf16>
    %cst_41 = arith.constant dense<0.000000e+00> : vector<8x128xf32>
    %51 = tpu.matmul %49, %50, %cst_41 {dimension_numbers = #tpu.dot_dimension_numbers<[1], [0], [0], [1], [0, 0, 1, 1], [], []>} : vector<8x128xbf16>, vector<128x128xbf16>, vector<8x128xf32> -> vector<8x128xf32>
    %52 = arith.addf %48, %51 : vector<8x128xf32>
    %53 = math.tanh %52 : vector<8x128xf32>
    %54 = vector.broadcast %44 : i32 to vector<8x1xi32>
    %55 = arith.cmpi sgt, %11, %54 : vector<8x1xi32>
    %56 = vector.shape_cast %55 : vector<8x1xi1> to vector<8x1xi1>
    %57 = vector.broadcast %56 : vector<8x1xi1> to vector<8x128xi1>
    %58 = arith.select %57, %53, %45 : vector<8x128xi1>, vector<8x128xf32>
    %c0_42 = arith.constant 0 : index
    %c0_43 = arith.constant 0 : index
    %59 = vector.load %arg7[%c0_42, %c0_43] : memref<8x128xf32, #tpu.memory_space<vmem>>, vector<8x128xf32>
    tpu.vector_store %arg7[%c0_42, %c0_43], %58 {strides = array<i32>} : memref<8x128xf32, #tpu.memory_space<vmem>>, vector<8x128xf32>,
    %c3_i32 = arith.constant 3 : i32
    %c7_i32_44 = arith.constant 7 : i32
    %60 = arith.subi %c7_i32_44, %c3_i32 : i32
    %c0_45 = arith.constant 0 : index
    %c0_46 = arith.constant 0 : index
    %61 = vector.load %arg7[%c0_45, %c0_46] : memref<8x128xf32, #tpu.memory_space<vmem>>, vector<8x128xf32>
    %62 = arith.index_cast %60 : i32 to index
    %c0_47 = arith.constant 0 : index
    %c0_48 = arith.constant 0 : index
    %63 = vector.load %arg8[%62, %c0_47, %c0_48] : memref<8x8x128xf32, #tpu.memory_space<vmem>>, vector<1x8x128xf32>
    %64 = vector.shape_cast %63 : vector<1x8x128xf32> to vector<8x128xf32>
    %65 = arith.truncf %61 : vector<8x128xf32> to vector<8x128xbf16>
    %c0_49 = arith.constant 0 : index
    %c0_50 = arith.constant 0 : index
    %66 = vector.load %arg3[%c0_49, %c0_50] : memref<128x128xbf16, #tpu.memory_space<vmem>>, vector<128x128xbf16>
    %cst_51 = arith.constant dense<0.000000e+00> : vector<8x128xf32>
    %67 = tpu.matmul %65, %66, %cst_51 {dimension_numbers = #tpu.dot_dimension_numbers<[1], [0], [0], [1], [0, 0, 1, 1], [], []>} : vector<8x128xbf16>, vector<128x128xbf16>, vector<8x128xf32> -> vector<8x128xf32>
    %68 = arith.addf %64, %67 : vector<8x128xf32>
    %69 = math.tanh %68 : vector<8x128xf32>
    %70 = vector.broadcast %60 : i32 to vector<8x1xi32>
    %71 = arith.cmpi sgt, %11, %70 : vector<8x1xi32>
    %72 = vector.shape_cast %71 : vector<8x1xi1> to vector<8x1xi1>
    %73 = vector.broadcast %72 : vector<8x1xi1> to vector<8x128xi1>
    %74 = arith.select %73, %69, %61 : vector<8x128xi1>, vector<8x128xf32>
    %c0_52 = arith.constant 0 : index
    %c0_53 = arith.constant 0 : index
    %75 = vector.load %arg7[%c0_52, %c0_53] : memref<8x128xf32, #tpu.memory_space<vmem>>, vector<8x128xf32>
    tpu.vector_store %arg7[%c0_52, %c0_53], %74 {strides = array<i32>} : memref<8x128xf32, #tpu.memory_space<vmem>>, vector<8x128xf32>,
    %c4_i32 = arith.constant 4 : i32
    %c7_i32_54 = arith.constant 7 : i32
    %76 = arith.subi %c7_i32_54, %c4_i32 : i32
    %c0_55 = arith.constant 0 : index
    %c0_56 = arith.constant 0 : index
    %77 = vector.load %arg7[%c0_55, %c0_56] : memref<8x128xf32, #tpu.memory_space<vmem>>, vector<8x128xf32>
    %78 = arith.index_cast %76 : i32 to index
    %c0_57 = arith.constant 0 : index
    %c0_58 = arith.constant 0 : index
    %79 = vector.load %arg8[%78, %c0_57, %c0_58] : memref<8x8x128xf32, #tpu.memory_space<vmem>>, vector<1x8x128xf32>
    %80 = vector.shape_cast %79 : vector<1x8x128xf32> to vector<8x128xf32>
    %81 = arith.truncf %77 : vector<8x128xf32> to vector<8x128xbf16>
    %c0_59 = arith.constant 0 : index
    %c0_60 = arith.constant 0 : index
    %82 = vector.load %arg3[%c0_59, %c0_60] : memref<128x128xbf16, #tpu.memory_space<vmem>>, vector<128x128xbf16>
    %cst_61 = arith.constant dense<0.000000e+00> : vector<8x128xf32>
    %83 = tpu.matmul %81, %82, %cst_61 {dimension_numbers = #tpu.dot_dimension_numbers<[1], [0], [0], [1], [0, 0, 1, 1], [], []>} : vector<8x128xbf16>, vector<128x128xbf16>, vector<8x128xf32> -> vector<8x128xf32>
    %84 = arith.addf %80, %83 : vector<8x128xf32>
    %85 = math.tanh %84 : vector<8x128xf32>
    %86 = vector.broadcast %76 : i32 to vector<8x1xi32>
    %87 = arith.cmpi sgt, %11, %86 : vector<8x1xi32>
    %88 = vector.shape_cast %87 : vector<8x1xi1> to vector<8x1xi1>
    %89 = vector.broadcast %88 : vector<8x1xi1> to vector<8x128xi1>
    %90 = arith.select %89, %85, %77 : vector<8x128xi1>, vector<8x128xf32>
    %c0_62 = arith.constant 0 : index
    %c0_63 = arith.constant 0 : index
    %91 = vector.load %arg7[%c0_62, %c0_63] : memref<8x128xf32, #tpu.memory_space<vmem>>, vector<8x128xf32>
    tpu.vector_store %arg7[%c0_62, %c0_63], %90 {strides = array<i32>} : memref<8x128xf32, #tpu.memory_space<vmem>>, vector<8x128xf32>,
    %c5_i32 = arith.constant 5 : i32
    %c7_i32_64 = arith.constant 7 : i32
    %92 = arith.subi %c7_i32_64, %c5_i32 : i32
    %c0_65 = arith.constant 0 : index
    %c0_66 = arith.constant 0 : index
    %93 = vector.load %arg7[%c0_65, %c0_66] : memref<8x128xf32, #tpu.memory_space<vmem>>, vector<8x128xf32>
    %94 = arith.index_cast %92 : i32 to index
    %c0_67 = arith.constant 0 : index
    %c0_68 = arith.constant 0 : index
    %95 = vector.load %arg8[%94, %c0_67, %c0_68] : memref<8x8x128xf32, #tpu.memory_space<vmem>>, vector<1x8x128xf32>
    %96 = vector.shape_cast %95 : vector<1x8x128xf32> to vector<8x128xf32>
    %97 = arith.truncf %93 : vector<8x128xf32> to vector<8x128xbf16>
    %c0_69 = arith.constant 0 : index
    %c0_70 = arith.constant 0 : index
    %98 = vector.load %arg3[%c0_69, %c0_70] : memref<128x128xbf16, #tpu.memory_space<vmem>>, vector<128x128xbf16>
    %cst_71 = arith.constant dense<0.000000e+00> : vector<8x128xf32>
    %99 = tpu.matmul %97, %98, %cst_71 {dimension_numbers = #tpu.dot_dimension_numbers<[1], [0], [0], [1], [0, 0, 1, 1], [], []>} : vector<8x128xbf16>, vector<128x128xbf16>, vector<8x128xf32> -> vector<8x128xf32>
    %100 = arith.addf %96, %99 : vector<8x128xf32>
    %101 = math.tanh %100 : vector<8x128xf32>
    %102 = vector.broadcast %92 : i32 to vector<8x1xi32>
    %103 = arith.cmpi sgt, %11, %102 : vector<8x1xi32>
    %104 = vector.shape_cast %103 : vector<8x1xi1> to vector<8x1xi1>
    %105 = vector.broadcast %104 : vector<8x1xi1> to vector<8x128xi1>
    %106 = arith.select %105, %101, %93 : vector<8x128xi1>, vector<8x128xf32>
    %c0_72 = arith.constant 0 : index
    %c0_73 = arith.constant 0 : index
    %107 = vector.load %arg7[%c0_72, %c0_73] : memref<8x128xf32, #tpu.memory_space<vmem>>, vector<8x128xf32>
    tpu.vector_store %arg7[%c0_72, %c0_73], %106 {strides = array<i32>} : memref<8x128xf32, #tpu.memory_space<vmem>>, vector<8x128xf32>,
    %c6_i32 = arith.constant 6 : i32
    %c7_i32_74 = arith.constant 7 : i32
    %108 = arith.subi %c7_i32_74, %c6_i32 : i32
    %c0_75 = arith.constant 0 : index
    %c0_76 = arith.constant 0 : index
    %109 = vector.load %arg7[%c0_75, %c0_76] : memref<8x128xf32, #tpu.memory_space<vmem>>, vector<8x128xf32>
    %110 = arith.index_cast %108 : i32 to index
    %c0_77 = arith.constant 0 : index
    %c0_78 = arith.constant 0 : index
    %111 = vector.load %arg8[%110, %c0_77, %c0_78] : memref<8x8x128xf32, #tpu.memory_space<vmem>>, vector<1x8x128xf32>
    %112 = vector.shape_cast %111 : vector<1x8x128xf32> to vector<8x128xf32>
    %113 = arith.truncf %109 : vector<8x128xf32> to vector<8x128xbf16>
    %c0_79 = arith.constant 0 : index
    %c0_80 = arith.constant 0 : index
    %114 = vector.load %arg3[%c0_79, %c0_80] : memref<128x128xbf16, #tpu.memory_space<vmem>>, vector<128x128xbf16>
    %cst_81 = arith.constant dense<0.000000e+00> : vector<8x128xf32>
    %115 = tpu.matmul %113, %114, %cst_81 {dimension_numbers = #tpu.dot_dimension_numbers<[1], [0], [0], [1], [0, 0, 1, 1], [], []>} : vector<8x128xbf16>, vector<128x128xbf16>, vector<8x128xf32> -> vector<8x128xf32>
    %116 = arith.addf %112, %115 : vector<8x128xf32>
    %117 = math.tanh %116 : vector<8x128xf32>
    %118 = vector.broadcast %108 : i32 to vector<8x1xi32>
    %119 = arith.cmpi sgt, %11, %118 : vector<8x1xi32>
    %120 = vector.shape_cast %119 : vector<8x1xi1> to vector<8x1xi1>
    %121 = vector.broadcast %120 : vector<8x1xi1> to vector<8x128xi1>
    %122 = arith.select %121, %117, %109 : vector<8x128xi1>, vector<8x128xf32>
    %c0_82 = arith.constant 0 : index
    %c0_83 = arith.constant 0 : index
    %123 = vector.load %arg7[%c0_82, %c0_83] : memref<8x128xf32, #tpu.memory_space<vmem>>, vector<8x128xf32>
    tpu.vector_store %arg7[%c0_82, %c0_83], %122 {strides = array<i32>} : memref<8x128xf32, #tpu.memory_space<vmem>>, vector<8x128xf32>,
    %c7_i32_84 = arith.constant 7 : i32
    %c7_i32_85 = arith.constant 7 : i32
    %124 = arith.subi %c7_i32_85, %c7_i32_84 : i32
    %c0_86 = arith.constant 0 : index
    %c0_87 = arith.constant 0 : index
    %125 = vector.load %arg7[%c0_86, %c0_87] : memref<8x128xf32, #tpu.memory_space<vmem>>, vector<8x128xf32>
    %126 = arith.index_cast %124 : i32 to index
    %c0_88 = arith.constant 0 : index
    %c0_89 = arith.constant 0 : index
    %127 = vector.load %arg8[%126, %c0_88, %c0_89] : memref<8x8x128xf32, #tpu.memory_space<vmem>>, vector<1x8x128xf32>
    %128 = vector.shape_cast %127 : vector<1x8x128xf32> to vector<8x128xf32>
    %129 = arith.truncf %125 : vector<8x128xf32> to vector<8x128xbf16>
    %c0_90 = arith.constant 0 : index
    %c0_91 = arith.constant 0 : index
    %130 = vector.load %arg3[%c0_90, %c0_91] : memref<128x128xbf16, #tpu.memory_space<vmem>>, vector<128x128xbf16>
    %cst_92 = arith.constant dense<0.000000e+00> : vector<8x128xf32>
    %131 = tpu.matmul %129, %130, %cst_92 {dimension_numbers = #tpu.dot_dimension_numbers<[1], [0], [0], [1], [0, 0, 1, 1], [], []>} : vector<8x128xbf16>, vector<128x128xbf16>, vector<8x128xf32> -> vector<8x128xf32>
    %132 = arith.addf %128, %131 : vector<8x128xf32>
    %133 = math.tanh %132 : vector<8x128xf32>
    %134 = vector.broadcast %124 : i32 to vector<8x1xi32>
    %135 = arith.cmpi sgt, %11, %134 : vector<8x1xi32>
    %136 = vector.shape_cast %135 : vector<8x1xi1> to vector<8x1xi1>
    %137 = vector.broadcast %136 : vector<8x1xi1> to vector<8x128xi1>
    %138 = arith.select %137, %133, %125 : vector<8x128xi1>, vector<8x128xf32>
    %c0_93 = arith.constant 0 : index
    %c0_94 = arith.constant 0 : index
    %139 = vector.load %arg7[%c0_93, %c0_94] : memref<8x128xf32, #tpu.memory_space<vmem>>, vector<8x128xf32>
    tpu.vector_store %arg7[%c0_93, %c0_94], %138 {strides = array<i32>} : memref<8x128xf32, #tpu.memory_space<vmem>>, vector<8x128xf32>,
    %c8_i32 = arith.constant 8 : i32
    %c0_95 = arith.constant 0 : index
    %c0_96 = arith.constant 0 : index
    %140 = vector.load %arg7[%c0_95, %c0_96] : memref<8x128xf32, #tpu.memory_space<vmem>>, vector<8x128xf32>
    %c0_97 = arith.constant 0 : index
    %c0_98 = arith.constant 0 : index
    %141 = vector.load %arg6[%c0_97, %c0_98] : memref<8x128xf32, #tpu.memory_space<vmem>>, vector<8x128xf32>
    tpu.vector_store %arg6[%c0_97, %c0_98], %140 {strides = array<i32>} : memref<8x128xf32, #tpu.memory_space<vmem>>, vector<8x128xf32>,
    return
  }
}

module attributes {stable_mosaic.version = 11 : i64} {
  func.func @_rnn_dir_kernel(%arg0: memref<8x8x16xbf16, #tpu.memory_space<vmem>>, %arg1: memref<8x128xf32, #tpu.memory_space<vmem>>, %arg2: memref<16x128xbf16, #tpu.memory_space<vmem>>, %arg3: memref<128x128xbf16, #tpu.memory_space<vmem>>, %arg4: memref<1x128xf32, #tpu.memory_space<vmem>>, %arg5: memref<8x1xi32, #tpu.memory_space<vmem>>, %arg6: memref<8x128xf32, #tpu.memory_space<vmem>>, %arg7: memref<8x128xf32, #tpu.memory_space<vmem>>, %arg8: memref<8x8x128xf32, #tpu.memory_space<vmem>>) attributes {dimension_semantics = [], scalar_prefetch = 0 : i64, scratch_operands = 2 : i64, tpu.core_type = #tpu.core_type<tc>} {
    %c0 = arith.constant 0 : index
    %c0_0 = arith.constant 0 : index
    %c0_1 = arith.constant 0 : index
    %0 = vector.load %arg0[%c0, %c0_0, %c0_1] : memref<8x8x16xbf16, #tpu.memory_space<vmem>>, vector<8x8x16xbf16>
    %1 = vector.shape_cast %0 : vector<8x8x16xbf16> to vector<64x16xbf16>
    %c0_2 = arith.constant 0 : index
    %c0_3 = arith.constant 0 : index
    %2 = vector.load %arg2[%c0_2, %c0_3] : memref<16x128xbf16, #tpu.memory_space<vmem>>, vector<16x128xbf16>
    %cst = arith.constant dense<0.000000e+00> : vector<64x128xf32>
    %3 = tpu.matmul %1, %2, %cst {dimension_numbers = #tpu.dot_dimension_numbers<[1], [0], [0], [1], [0, 0, 1, 1], [], []>} : vector<64x16xbf16>, vector<16x128xbf16>, vector<64x128xf32> -> vector<64x128xf32>
    %c0_4 = arith.constant 0 : index
    %c0_5 = arith.constant 0 : index
    %4 = vector.load %arg4[%c0_4, %c0_5] : memref<1x128xf32, #tpu.memory_space<vmem>>, vector<1x128xf32>
    %5 = vector.broadcast %4 : vector<1x128xf32> to vector<64x128xf32>
    %6 = arith.addf %3, %5 : vector<64x128xf32>
    %7 = vector.shape_cast %6 : vector<64x128xf32> to vector<8x8x128xf32>
    %c0_6 = arith.constant 0 : index
    %c0_7 = arith.constant 0 : index
    %c0_8 = arith.constant 0 : index
    %8 = vector.load %arg8[%c0_6, %c0_7, %c0_8] : memref<8x8x128xf32, #tpu.memory_space<vmem>>, vector<8x8x128xf32>
    tpu.vector_store %arg8[%c0_6, %c0_7, %c0_8], %7 {strides = array<i32>} : memref<8x8x128xf32, #tpu.memory_space<vmem>>, vector<8x8x128xf32>,
    %c0_9 = arith.constant 0 : index
    %c0_10 = arith.constant 0 : index
    %9 = vector.load %arg1[%c0_9, %c0_10] : memref<8x128xf32, #tpu.memory_space<vmem>>, vector<8x128xf32>
    %c0_11 = arith.constant 0 : index
    %c0_12 = arith.constant 0 : index
    %10 = vector.load %arg7[%c0_11, %c0_12] : memref<8x128xf32, #tpu.memory_space<vmem>>, vector<8x128xf32>
    tpu.vector_store %arg7[%c0_11, %c0_12], %9 {strides = array<i32>} : memref<8x128xf32, #tpu.memory_space<vmem>>, vector<8x128xf32>,
    %c0_13 = arith.constant 0 : index
    %c0_14 = arith.constant 0 : index
    %11 = vector.load %arg5[%c0_13, %c0_14] : memref<8x1xi32, #tpu.memory_space<vmem>>, vector<8x1xi32>
    %c0_i32 = arith.constant 0 : i32
    %c0_15 = arith.constant 0 : index
    %c0_16 = arith.constant 0 : index
    %12 = vector.load %arg7[%c0_15, %c0_16] : memref<8x128xf32, #tpu.memory_space<vmem>>, vector<8x128xf32>
    %13 = arith.index_cast %c0_i32 : i32 to index
    %c0_17 = arith.constant 0 : index
    %c0_18 = arith.constant 0 : index
    %14 = vector.load %arg8[%13, %c0_17, %c0_18] : memref<8x8x128xf32, #tpu.memory_space<vmem>>, vector<1x8x128xf32>
    %15 = vector.shape_cast %14 : vector<1x8x128xf32> to vector<8x128xf32>
    %16 = arith.truncf %12 : vector<8x128xf32> to vector<8x128xbf16>
    %c0_19 = arith.constant 0 : index
    %c0_20 = arith.constant 0 : index
    %17 = vector.load %arg3[%c0_19, %c0_20] : memref<128x128xbf16, #tpu.memory_space<vmem>>, vector<128x128xbf16>
    %cst_21 = arith.constant dense<0.000000e+00> : vector<8x128xf32>
    %18 = tpu.matmul %16, %17, %cst_21 {dimension_numbers = #tpu.dot_dimension_numbers<[1], [0], [0], [1], [0, 0, 1, 1], [], []>} : vector<8x128xbf16>, vector<128x128xbf16>, vector<8x128xf32> -> vector<8x128xf32>
    %19 = arith.addf %15, %18 : vector<8x128xf32>
    %20 = math.tanh %19 : vector<8x128xf32>
    %21 = vector.broadcast %c0_i32 : i32 to vector<8x1xi32>
    %22 = arith.cmpi sgt, %11, %21 : vector<8x1xi32>
    %23 = vector.shape_cast %22 : vector<8x1xi1> to vector<8x1xi1>
    %24 = vector.broadcast %23 : vector<8x1xi1> to vector<8x128xi1>
    %25 = arith.select %24, %20, %12 : vector<8x128xi1>, vector<8x128xf32>
    %c0_22 = arith.constant 0 : index
    %c0_23 = arith.constant 0 : index
    %26 = vector.load %arg7[%c0_22, %c0_23] : memref<8x128xf32, #tpu.memory_space<vmem>>, vector<8x128xf32>
    tpu.vector_store %arg7[%c0_22, %c0_23], %25 {strides = array<i32>} : memref<8x128xf32, #tpu.memory_space<vmem>>, vector<8x128xf32>,
    %c1_i32 = arith.constant 1 : i32
    %c0_24 = arith.constant 0 : index
    %c0_25 = arith.constant 0 : index
    %27 = vector.load %arg7[%c0_24, %c0_25] : memref<8x128xf32, #tpu.memory_space<vmem>>, vector<8x128xf32>
    %28 = arith.index_cast %c1_i32 : i32 to index
    %c0_26 = arith.constant 0 : index
    %c0_27 = arith.constant 0 : index
    %29 = vector.load %arg8[%28, %c0_26, %c0_27] : memref<8x8x128xf32, #tpu.memory_space<vmem>>, vector<1x8x128xf32>
    %30 = vector.shape_cast %29 : vector<1x8x128xf32> to vector<8x128xf32>
    %31 = arith.truncf %27 : vector<8x128xf32> to vector<8x128xbf16>
    %c0_28 = arith.constant 0 : index
    %c0_29 = arith.constant 0 : index
    %32 = vector.load %arg3[%c0_28, %c0_29] : memref<128x128xbf16, #tpu.memory_space<vmem>>, vector<128x128xbf16>
    %cst_30 = arith.constant dense<0.000000e+00> : vector<8x128xf32>
    %33 = tpu.matmul %31, %32, %cst_30 {dimension_numbers = #tpu.dot_dimension_numbers<[1], [0], [0], [1], [0, 0, 1, 1], [], []>} : vector<8x128xbf16>, vector<128x128xbf16>, vector<8x128xf32> -> vector<8x128xf32>
    %34 = arith.addf %30, %33 : vector<8x128xf32>
    %35 = math.tanh %34 : vector<8x128xf32>
    %36 = vector.broadcast %c1_i32 : i32 to vector<8x1xi32>
    %37 = arith.cmpi sgt, %11, %36 : vector<8x1xi32>
    %38 = vector.shape_cast %37 : vector<8x1xi1> to vector<8x1xi1>
    %39 = vector.broadcast %38 : vector<8x1xi1> to vector<8x128xi1>
    %40 = arith.select %39, %35, %27 : vector<8x128xi1>, vector<8x128xf32>
    %c0_31 = arith.constant 0 : index
    %c0_32 = arith.constant 0 : index
    %41 = vector.load %arg7[%c0_31, %c0_32] : memref<8x128xf32, #tpu.memory_space<vmem>>, vector<8x128xf32>
    tpu.vector_store %arg7[%c0_31, %c0_32], %40 {strides = array<i32>} : memref<8x128xf32, #tpu.memory_space<vmem>>, vector<8x128xf32>,
    %c2_i32 = arith.constant 2 : i32
    %c0_33 = arith.constant 0 : index
    %c0_34 = arith.constant 0 : index
    %42 = vector.load %arg7[%c0_33, %c0_34] : memref<8x128xf32, #tpu.memory_space<vmem>>, vector<8x128xf32>
    %43 = arith.index_cast %c2_i32 : i32 to index
    %c0_35 = arith.constant 0 : index
    %c0_36 = arith.constant 0 : index
    %44 = vector.load %arg8[%43, %c0_35, %c0_36] : memref<8x8x128xf32, #tpu.memory_space<vmem>>, vector<1x8x128xf32>
    %45 = vector.shape_cast %44 : vector<1x8x128xf32> to vector<8x128xf32>
    %46 = arith.truncf %42 : vector<8x128xf32> to vector<8x128xbf16>
    %c0_37 = arith.constant 0 : index
    %c0_38 = arith.constant 0 : index
    %47 = vector.load %arg3[%c0_37, %c0_38] : memref<128x128xbf16, #tpu.memory_space<vmem>>, vector<128x128xbf16>
    %cst_39 = arith.constant dense<0.000000e+00> : vector<8x128xf32>
    %48 = tpu.matmul %46, %47, %cst_39 {dimension_numbers = #tpu.dot_dimension_numbers<[1], [0], [0], [1], [0, 0, 1, 1], [], []>} : vector<8x128xbf16>, vector<128x128xbf16>, vector<8x128xf32> -> vector<8x128xf32>
    %49 = arith.addf %45, %48 : vector<8x128xf32>
    %50 = math.tanh %49 : vector<8x128xf32>
    %51 = vector.broadcast %c2_i32 : i32 to vector<8x1xi32>
    %52 = arith.cmpi sgt, %11, %51 : vector<8x1xi32>
    %53 = vector.shape_cast %52 : vector<8x1xi1> to vector<8x1xi1>
    %54 = vector.broadcast %53 : vector<8x1xi1> to vector<8x128xi1>
    %55 = arith.select %54, %50, %42 : vector<8x128xi1>, vector<8x128xf32>
    %c0_40 = arith.constant 0 : index
    %c0_41 = arith.constant 0 : index
    %56 = vector.load %arg7[%c0_40, %c0_41] : memref<8x128xf32, #tpu.memory_space<vmem>>, vector<8x128xf32>
    tpu.vector_store %arg7[%c0_40, %c0_41], %55 {strides = array<i32>} : memref<8x128xf32, #tpu.memory_space<vmem>>, vector<8x128xf32>,
    %c3_i32 = arith.constant 3 : i32
    %c0_42 = arith.constant 0 : index
    %c0_43 = arith.constant 0 : index
    %57 = vector.load %arg7[%c0_42, %c0_43] : memref<8x128xf32, #tpu.memory_space<vmem>>, vector<8x128xf32>
    %58 = arith.index_cast %c3_i32 : i32 to index
    %c0_44 = arith.constant 0 : index
    %c0_45 = arith.constant 0 : index
    %59 = vector.load %arg8[%58, %c0_44, %c0_45] : memref<8x8x128xf32, #tpu.memory_space<vmem>>, vector<1x8x128xf32>
    %60 = vector.shape_cast %59 : vector<1x8x128xf32> to vector<8x128xf32>
    %61 = arith.truncf %57 : vector<8x128xf32> to vector<8x128xbf16>
    %c0_46 = arith.constant 0 : index
    %c0_47 = arith.constant 0 : index
    %62 = vector.load %arg3[%c0_46, %c0_47] : memref<128x128xbf16, #tpu.memory_space<vmem>>, vector<128x128xbf16>
    %cst_48 = arith.constant dense<0.000000e+00> : vector<8x128xf32>
    %63 = tpu.matmul %61, %62, %cst_48 {dimension_numbers = #tpu.dot_dimension_numbers<[1], [0], [0], [1], [0, 0, 1, 1], [], []>} : vector<8x128xbf16>, vector<128x128xbf16>, vector<8x128xf32> -> vector<8x128xf32>
    %64 = arith.addf %60, %63 : vector<8x128xf32>
    %65 = math.tanh %64 : vector<8x128xf32>
    %66 = vector.broadcast %c3_i32 : i32 to vector<8x1xi32>
    %67 = arith.cmpi sgt, %11, %66 : vector<8x1xi32>
    %68 = vector.shape_cast %67 : vector<8x1xi1> to vector<8x1xi1>
    %69 = vector.broadcast %68 : vector<8x1xi1> to vector<8x128xi1>
    %70 = arith.select %69, %65, %57 : vector<8x128xi1>, vector<8x128xf32>
    %c0_49 = arith.constant 0 : index
    %c0_50 = arith.constant 0 : index
    %71 = vector.load %arg7[%c0_49, %c0_50] : memref<8x128xf32, #tpu.memory_space<vmem>>, vector<8x128xf32>
    tpu.vector_store %arg7[%c0_49, %c0_50], %70 {strides = array<i32>} : memref<8x128xf32, #tpu.memory_space<vmem>>, vector<8x128xf32>,
    %c4_i32 = arith.constant 4 : i32
    %c0_51 = arith.constant 0 : index
    %c0_52 = arith.constant 0 : index
    %72 = vector.load %arg7[%c0_51, %c0_52] : memref<8x128xf32, #tpu.memory_space<vmem>>, vector<8x128xf32>
    %73 = arith.index_cast %c4_i32 : i32 to index
    %c0_53 = arith.constant 0 : index
    %c0_54 = arith.constant 0 : index
    %74 = vector.load %arg8[%73, %c0_53, %c0_54] : memref<8x8x128xf32, #tpu.memory_space<vmem>>, vector<1x8x128xf32>
    %75 = vector.shape_cast %74 : vector<1x8x128xf32> to vector<8x128xf32>
    %76 = arith.truncf %72 : vector<8x128xf32> to vector<8x128xbf16>
    %c0_55 = arith.constant 0 : index
    %c0_56 = arith.constant 0 : index
    %77 = vector.load %arg3[%c0_55, %c0_56] : memref<128x128xbf16, #tpu.memory_space<vmem>>, vector<128x128xbf16>
    %cst_57 = arith.constant dense<0.000000e+00> : vector<8x128xf32>
    %78 = tpu.matmul %76, %77, %cst_57 {dimension_numbers = #tpu.dot_dimension_numbers<[1], [0], [0], [1], [0, 0, 1, 1], [], []>} : vector<8x128xbf16>, vector<128x128xbf16>, vector<8x128xf32> -> vector<8x128xf32>
    %79 = arith.addf %75, %78 : vector<8x128xf32>
    %80 = math.tanh %79 : vector<8x128xf32>
    %81 = vector.broadcast %c4_i32 : i32 to vector<8x1xi32>
    %82 = arith.cmpi sgt, %11, %81 : vector<8x1xi32>
    %83 = vector.shape_cast %82 : vector<8x1xi1> to vector<8x1xi1>
    %84 = vector.broadcast %83 : vector<8x1xi1> to vector<8x128xi1>
    %85 = arith.select %84, %80, %72 : vector<8x128xi1>, vector<8x128xf32>
    %c0_58 = arith.constant 0 : index
    %c0_59 = arith.constant 0 : index
    %86 = vector.load %arg7[%c0_58, %c0_59] : memref<8x128xf32, #tpu.memory_space<vmem>>, vector<8x128xf32>
    tpu.vector_store %arg7[%c0_58, %c0_59], %85 {strides = array<i32>} : memref<8x128xf32, #tpu.memory_space<vmem>>, vector<8x128xf32>,
    %c5_i32 = arith.constant 5 : i32
    %c0_60 = arith.constant 0 : index
    %c0_61 = arith.constant 0 : index
    %87 = vector.load %arg7[%c0_60, %c0_61] : memref<8x128xf32, #tpu.memory_space<vmem>>, vector<8x128xf32>
    %88 = arith.index_cast %c5_i32 : i32 to index
    %c0_62 = arith.constant 0 : index
    %c0_63 = arith.constant 0 : index
    %89 = vector.load %arg8[%88, %c0_62, %c0_63] : memref<8x8x128xf32, #tpu.memory_space<vmem>>, vector<1x8x128xf32>
    %90 = vector.shape_cast %89 : vector<1x8x128xf32> to vector<8x128xf32>
    %91 = arith.truncf %87 : vector<8x128xf32> to vector<8x128xbf16>
    %c0_64 = arith.constant 0 : index
    %c0_65 = arith.constant 0 : index
    %92 = vector.load %arg3[%c0_64, %c0_65] : memref<128x128xbf16, #tpu.memory_space<vmem>>, vector<128x128xbf16>
    %cst_66 = arith.constant dense<0.000000e+00> : vector<8x128xf32>
    %93 = tpu.matmul %91, %92, %cst_66 {dimension_numbers = #tpu.dot_dimension_numbers<[1], [0], [0], [1], [0, 0, 1, 1], [], []>} : vector<8x128xbf16>, vector<128x128xbf16>, vector<8x128xf32> -> vector<8x128xf32>
    %94 = arith.addf %90, %93 : vector<8x128xf32>
    %95 = math.tanh %94 : vector<8x128xf32>
    %96 = vector.broadcast %c5_i32 : i32 to vector<8x1xi32>
    %97 = arith.cmpi sgt, %11, %96 : vector<8x1xi32>
    %98 = vector.shape_cast %97 : vector<8x1xi1> to vector<8x1xi1>
    %99 = vector.broadcast %98 : vector<8x1xi1> to vector<8x128xi1>
    %100 = arith.select %99, %95, %87 : vector<8x128xi1>, vector<8x128xf32>
    %c0_67 = arith.constant 0 : index
    %c0_68 = arith.constant 0 : index
    %101 = vector.load %arg7[%c0_67, %c0_68] : memref<8x128xf32, #tpu.memory_space<vmem>>, vector<8x128xf32>
    tpu.vector_store %arg7[%c0_67, %c0_68], %100 {strides = array<i32>} : memref<8x128xf32, #tpu.memory_space<vmem>>, vector<8x128xf32>,
    %c6_i32 = arith.constant 6 : i32
    %c0_69 = arith.constant 0 : index
    %c0_70 = arith.constant 0 : index
    %102 = vector.load %arg7[%c0_69, %c0_70] : memref<8x128xf32, #tpu.memory_space<vmem>>, vector<8x128xf32>
    %103 = arith.index_cast %c6_i32 : i32 to index
    %c0_71 = arith.constant 0 : index
    %c0_72 = arith.constant 0 : index
    %104 = vector.load %arg8[%103, %c0_71, %c0_72] : memref<8x8x128xf32, #tpu.memory_space<vmem>>, vector<1x8x128xf32>
    %105 = vector.shape_cast %104 : vector<1x8x128xf32> to vector<8x128xf32>
    %106 = arith.truncf %102 : vector<8x128xf32> to vector<8x128xbf16>
    %c0_73 = arith.constant 0 : index
    %c0_74 = arith.constant 0 : index
    %107 = vector.load %arg3[%c0_73, %c0_74] : memref<128x128xbf16, #tpu.memory_space<vmem>>, vector<128x128xbf16>
    %cst_75 = arith.constant dense<0.000000e+00> : vector<8x128xf32>
    %108 = tpu.matmul %106, %107, %cst_75 {dimension_numbers = #tpu.dot_dimension_numbers<[1], [0], [0], [1], [0, 0, 1, 1], [], []>} : vector<8x128xbf16>, vector<128x128xbf16>, vector<8x128xf32> -> vector<8x128xf32>
    %109 = arith.addf %105, %108 : vector<8x128xf32>
    %110 = math.tanh %109 : vector<8x128xf32>
    %111 = vector.broadcast %c6_i32 : i32 to vector<8x1xi32>
    %112 = arith.cmpi sgt, %11, %111 : vector<8x1xi32>
    %113 = vector.shape_cast %112 : vector<8x1xi1> to vector<8x1xi1>
    %114 = vector.broadcast %113 : vector<8x1xi1> to vector<8x128xi1>
    %115 = arith.select %114, %110, %102 : vector<8x128xi1>, vector<8x128xf32>
    %c0_76 = arith.constant 0 : index
    %c0_77 = arith.constant 0 : index
    %116 = vector.load %arg7[%c0_76, %c0_77] : memref<8x128xf32, #tpu.memory_space<vmem>>, vector<8x128xf32>
    tpu.vector_store %arg7[%c0_76, %c0_77], %115 {strides = array<i32>} : memref<8x128xf32, #tpu.memory_space<vmem>>, vector<8x128xf32>,
    %c7_i32 = arith.constant 7 : i32
    %c0_78 = arith.constant 0 : index
    %c0_79 = arith.constant 0 : index
    %117 = vector.load %arg7[%c0_78, %c0_79] : memref<8x128xf32, #tpu.memory_space<vmem>>, vector<8x128xf32>
    %118 = arith.index_cast %c7_i32 : i32 to index
    %c0_80 = arith.constant 0 : index
    %c0_81 = arith.constant 0 : index
    %119 = vector.load %arg8[%118, %c0_80, %c0_81] : memref<8x8x128xf32, #tpu.memory_space<vmem>>, vector<1x8x128xf32>
    %120 = vector.shape_cast %119 : vector<1x8x128xf32> to vector<8x128xf32>
    %121 = arith.truncf %117 : vector<8x128xf32> to vector<8x128xbf16>
    %c0_82 = arith.constant 0 : index
    %c0_83 = arith.constant 0 : index
    %122 = vector.load %arg3[%c0_82, %c0_83] : memref<128x128xbf16, #tpu.memory_space<vmem>>, vector<128x128xbf16>
    %cst_84 = arith.constant dense<0.000000e+00> : vector<8x128xf32>
    %123 = tpu.matmul %121, %122, %cst_84 {dimension_numbers = #tpu.dot_dimension_numbers<[1], [0], [0], [1], [0, 0, 1, 1], [], []>} : vector<8x128xbf16>, vector<128x128xbf16>, vector<8x128xf32> -> vector<8x128xf32>
    %124 = arith.addf %120, %123 : vector<8x128xf32>
    %125 = math.tanh %124 : vector<8x128xf32>
    %126 = vector.broadcast %c7_i32 : i32 to vector<8x1xi32>
    %127 = arith.cmpi sgt, %11, %126 : vector<8x1xi32>
    %128 = vector.shape_cast %127 : vector<8x1xi1> to vector<8x1xi1>
    %129 = vector.broadcast %128 : vector<8x1xi1> to vector<8x128xi1>
    %130 = arith.select %129, %125, %117 : vector<8x128xi1>, vector<8x128xf32>
    %c0_85 = arith.constant 0 : index
    %c0_86 = arith.constant 0 : index
    %131 = vector.load %arg7[%c0_85, %c0_86] : memref<8x128xf32, #tpu.memory_space<vmem>>, vector<8x128xf32>
    tpu.vector_store %arg7[%c0_85, %c0_86], %130 {strides = array<i32>} : memref<8x128xf32, #tpu.memory_space<vmem>>, vector<8x128xf32>,
    %c8_i32 = arith.constant 8 : i32
    %c0_87 = arith.constant 0 : index
    %c0_88 = arith.constant 0 : index
    %132 = vector.load %arg7[%c0_87, %c0_88] : memref<8x128xf32, #tpu.memory_space<vmem>>, vector<8x128xf32>
    %c0_89 = arith.constant 0 : index
    %c0_90 = arith.constant 0 : index
    %133 = vector.load %arg6[%c0_89, %c0_90] : memref<8x128xf32, #tpu.memory_space<vmem>>, vector<8x128xf32>
    tpu.vector_store %arg6[%c0_89, %c0_90], %132 {strides = array<i32>} : memref<8x128xf32, #tpu.memory_space<vmem>>, vector<8x128xf32>,
    return
  }
}

module attributes {stable_mosaic.version = 11 : i64} {
  func.func @_latent_kernel(%arg0: memref<2x64xf32, #tpu.memory_space<vmem>>, %arg1: memref<64x16xf32, #tpu.memory_space<vmem>>, %arg2: memref<1x16xf32, #tpu.memory_space<vmem>>, %arg3: memref<2x8xf32, #tpu.memory_space<vmem>>, %arg4: memref<8x64xf32, #tpu.memory_space<vmem>>, %arg5: memref<1x64xf32, #tpu.memory_space<vmem>>, %arg6: memref<2x8xf32, #tpu.memory_space<vmem>>, %arg7: memref<2x8xf32, #tpu.memory_space<vmem>>, %arg8: memref<2x8xf32, #tpu.memory_space<vmem>>, %arg9: memref<2x64xf32, #tpu.memory_space<vmem>>) attributes {dimension_semantics = [], scalar_prefetch = 0 : i64, scratch_operands = 0 : i64, tpu.core_type = #tpu.core_type<tc>} {
    %c0 = arith.constant 0 : index
    %c0_0 = arith.constant 0 : index
    %0 = vector.load %arg0[%c0, %c0_0] : memref<2x64xf32, #tpu.memory_space<vmem>>, vector<2x64xf32>
    %c0_1 = arith.constant 0 : index
    %c0_2 = arith.constant 0 : index
    %1 = vector.load %arg1[%c0_1, %c0_2] : memref<64x16xf32, #tpu.memory_space<vmem>>, vector<64x16xf32>
    %cst = arith.constant dense<0.000000e+00> : vector<2x16xf32>
    %2 = tpu.matmul %0, %1, %cst {dimension_numbers = #tpu.dot_dimension_numbers<[1], [0], [0], [1], [0, 0, 1, 1], [], []>} : vector<2x64xf32>, vector<64x16xf32>, vector<2x16xf32> -> vector<2x16xf32>
    %c0_3 = arith.constant 0 : index
    %c0_4 = arith.constant 0 : index
    %3 = vector.load %arg2[%c0_3, %c0_4] : memref<1x16xf32, #tpu.memory_space<vmem>>, vector<1x16xf32>
    %4 = vector.broadcast %3 : vector<1x16xf32> to vector<2x16xf32>
    %5 = arith.addf %2, %4 : vector<2x16xf32>
    %6 = vector.extract_strided_slice %5 {offsets = [0, 0], sizes = [2, 8], strides = [1, 1]} : vector<2x16xf32> to vector<2x8xf32>
    %7 = vector.extract_strided_slice %5 {offsets = [0, 8], sizes = [2, 8], strides = [1, 1]} : vector<2x16xf32> to vector<2x8xf32>
    %cst_5 = arith.constant 5.000000e-01 : f32
    %8 = vector.broadcast %cst_5 : f32 to vector<2x8xf32>
    %9 = arith.mulf %8, %7 : vector<2x8xf32>
    %10 = math.exp %9 : vector<2x8xf32>
    %c0_6 = arith.constant 0 : index
    %c0_7 = arith.constant 0 : index
    %11 = vector.load %arg3[%c0_6, %c0_7] : memref<2x8xf32, #tpu.memory_space<vmem>>, vector<2x8xf32>
    %12 = arith.mulf %11, %10 : vector<2x8xf32>
    %13 = arith.addf %12, %6 : vector<2x8xf32>
    %c0_8 = arith.constant 0 : index
    %c0_9 = arith.constant 0 : index
    %14 = vector.load %arg4[%c0_8, %c0_9] : memref<8x64xf32, #tpu.memory_space<vmem>>, vector<8x64xf32>
    %cst_10 = arith.constant dense<0.000000e+00> : vector<2x64xf32>
    %15 = tpu.matmul %13, %14, %cst_10 {dimension_numbers = #tpu.dot_dimension_numbers<[1], [0], [0], [1], [0, 0, 1, 1], [], []>} : vector<2x8xf32>, vector<8x64xf32>, vector<2x64xf32> -> vector<2x64xf32>
    %c0_11 = arith.constant 0 : index
    %c0_12 = arith.constant 0 : index
    %16 = vector.load %arg5[%c0_11, %c0_12] : memref<1x64xf32, #tpu.memory_space<vmem>>, vector<1x64xf32>
    %17 = vector.broadcast %16 : vector<1x64xf32> to vector<2x64xf32>
    %18 = arith.addf %15, %17 : vector<2x64xf32>
    %c0_13 = arith.constant 0 : index
    %c0_14 = arith.constant 0 : index
    %19 = vector.load %arg6[%c0_13, %c0_14] : memref<2x8xf32, #tpu.memory_space<vmem>>, vector<2x8xf32>
    tpu.vector_store %arg6[%c0_13, %c0_14], %6 {strides = array<i32>} : memref<2x8xf32, #tpu.memory_space<vmem>>, vector<2x8xf32>,
    %c0_15 = arith.constant 0 : index
    %c0_16 = arith.constant 0 : index
    %20 = vector.load %arg7[%c0_15, %c0_16] : memref<2x8xf32, #tpu.memory_space<vmem>>, vector<2x8xf32>
    tpu.vector_store %arg7[%c0_15, %c0_16], %7 {strides = array<i32>} : memref<2x8xf32, #tpu.memory_space<vmem>>, vector<2x8xf32>,
    %c0_17 = arith.constant 0 : index
    %c0_18 = arith.constant 0 : index
    %21 = vector.load %arg8[%c0_17, %c0_18] : memref<2x8xf32, #tpu.memory_space<vmem>>, vector<2x8xf32>
    tpu.vector_store %arg8[%c0_17, %c0_18], %13 {strides = array<i32>} : memref<2x8xf32, #tpu.memory_space<vmem>>, vector<2x8xf32>,
    %c0_19 = arith.constant 0 : index
    %c0_20 = arith.constant 0 : index
    %22 = vector.load %arg9[%c0_19, %c0_20] : memref<2x64xf32, #tpu.memory_space<vmem>>, vector<2x64xf32>
    tpu.vector_store %arg9[%c0_19, %c0_20], %18 {strides = array<i32>} : memref<2x64xf32, #tpu.memory_space<vmem>>, vector<2x64xf32>,
    return
  }
}

module attributes {stable_mosaic.version = 11 : i64} {
  func.func @_rnn_dir_kernel(%arg0: memref<8x8x16xbf16, #tpu.memory_space<vmem>>, %arg1: memref<8x128xf32, #tpu.memory_space<vmem>>, %arg2: memref<16x128xbf16, #tpu.memory_space<vmem>>, %arg3: memref<128x128xbf16, #tpu.memory_space<vmem>>, %arg4: memref<1x128xf32, #tpu.memory_space<vmem>>, %arg5: memref<8x1xi32, #tpu.memory_space<vmem>>, %arg6: memref<8x8x128xf32, #tpu.memory_space<vmem>>, %arg7: memref<8x128xf32, #tpu.memory_space<vmem>>, %arg8: memref<8x128xf32, #tpu.memory_space<vmem>>, %arg9: memref<8x8x128xf32, #tpu.memory_space<vmem>>) attributes {dimension_semantics = [], scalar_prefetch = 0 : i64, scratch_operands = 2 : i64, tpu.core_type = #tpu.core_type<tc>} {
    %c0 = arith.constant 0 : index
    %c0_0 = arith.constant 0 : index
    %c0_1 = arith.constant 0 : index
    %0 = vector.load %arg0[%c0, %c0_0, %c0_1] : memref<8x8x16xbf16, #tpu.memory_space<vmem>>, vector<8x8x16xbf16>
    %1 = vector.shape_cast %0 : vector<8x8x16xbf16> to vector<64x16xbf16>
    %c0_2 = arith.constant 0 : index
    %c0_3 = arith.constant 0 : index
    %2 = vector.load %arg2[%c0_2, %c0_3] : memref<16x128xbf16, #tpu.memory_space<vmem>>, vector<16x128xbf16>
    %cst = arith.constant dense<0.000000e+00> : vector<64x128xf32>
    %3 = tpu.matmul %1, %2, %cst {dimension_numbers = #tpu.dot_dimension_numbers<[1], [0], [0], [1], [0, 0, 1, 1], [], []>} : vector<64x16xbf16>, vector<16x128xbf16>, vector<64x128xf32> -> vector<64x128xf32>
    %c0_4 = arith.constant 0 : index
    %c0_5 = arith.constant 0 : index
    %4 = vector.load %arg4[%c0_4, %c0_5] : memref<1x128xf32, #tpu.memory_space<vmem>>, vector<1x128xf32>
    %5 = vector.broadcast %4 : vector<1x128xf32> to vector<64x128xf32>
    %6 = arith.addf %3, %5 : vector<64x128xf32>
    %7 = vector.shape_cast %6 : vector<64x128xf32> to vector<8x8x128xf32>
    %c0_6 = arith.constant 0 : index
    %c0_7 = arith.constant 0 : index
    %c0_8 = arith.constant 0 : index
    %8 = vector.load %arg9[%c0_6, %c0_7, %c0_8] : memref<8x8x128xf32, #tpu.memory_space<vmem>>, vector<8x8x128xf32>
    tpu.vector_store %arg9[%c0_6, %c0_7, %c0_8], %7 {strides = array<i32>} : memref<8x8x128xf32, #tpu.memory_space<vmem>>, vector<8x8x128xf32>,
    %c0_9 = arith.constant 0 : index
    %c0_10 = arith.constant 0 : index
    %9 = vector.load %arg1[%c0_9, %c0_10] : memref<8x128xf32, #tpu.memory_space<vmem>>, vector<8x128xf32>
    %c0_11 = arith.constant 0 : index
    %c0_12 = arith.constant 0 : index
    %10 = vector.load %arg8[%c0_11, %c0_12] : memref<8x128xf32, #tpu.memory_space<vmem>>, vector<8x128xf32>
    tpu.vector_store %arg8[%c0_11, %c0_12], %9 {strides = array<i32>} : memref<8x128xf32, #tpu.memory_space<vmem>>, vector<8x128xf32>,
    %c0_13 = arith.constant 0 : index
    %c0_14 = arith.constant 0 : index
    %11 = vector.load %arg5[%c0_13, %c0_14] : memref<8x1xi32, #tpu.memory_space<vmem>>, vector<8x1xi32>
    %c0_i32 = arith.constant 0 : i32
    %c0_15 = arith.constant 0 : index
    %c0_16 = arith.constant 0 : index
    %12 = vector.load %arg8[%c0_15, %c0_16] : memref<8x128xf32, #tpu.memory_space<vmem>>, vector<8x128xf32>
    %13 = arith.index_cast %c0_i32 : i32 to index
    %c0_17 = arith.constant 0 : index
    %c0_18 = arith.constant 0 : index
    %14 = vector.load %arg9[%13, %c0_17, %c0_18] : memref<8x8x128xf32, #tpu.memory_space<vmem>>, vector<1x8x128xf32>
    %15 = vector.shape_cast %14 : vector<1x8x128xf32> to vector<8x128xf32>
    %16 = arith.truncf %12 : vector<8x128xf32> to vector<8x128xbf16>
    %c0_19 = arith.constant 0 : index
    %c0_20 = arith.constant 0 : index
    %17 = vector.load %arg3[%c0_19, %c0_20] : memref<128x128xbf16, #tpu.memory_space<vmem>>, vector<128x128xbf16>
    %cst_21 = arith.constant dense<0.000000e+00> : vector<8x128xf32>
    %18 = tpu.matmul %16, %17, %cst_21 {dimension_numbers = #tpu.dot_dimension_numbers<[1], [0], [0], [1], [0, 0, 1, 1], [], []>} : vector<8x128xbf16>, vector<128x128xbf16>, vector<8x128xf32> -> vector<8x128xf32>
    %19 = arith.addf %15, %18 : vector<8x128xf32>
    %20 = math.tanh %19 : vector<8x128xf32>
    %21 = vector.broadcast %c0_i32 : i32 to vector<8x1xi32>
    %22 = arith.cmpi sgt, %11, %21 : vector<8x1xi32>
    %23 = vector.shape_cast %22 : vector<8x1xi1> to vector<8x1xi1>
    %24 = vector.broadcast %23 : vector<8x1xi1> to vector<8x128xi1>
    %25 = arith.select %24, %20, %12 : vector<8x128xi1>, vector<8x128xf32>
    %c0_22 = arith.constant 0 : index
    %c0_23 = arith.constant 0 : index
    %26 = vector.load %arg8[%c0_22, %c0_23] : memref<8x128xf32, #tpu.memory_space<vmem>>, vector<8x128xf32>
    tpu.vector_store %arg8[%c0_22, %c0_23], %25 {strides = array<i32>} : memref<8x128xf32, #tpu.memory_space<vmem>>, vector<8x128xf32>,
    %cst_24 = arith.constant 0.000000e+00 : f32
    %27 = vector.shape_cast %22 : vector<8x1xi1> to vector<8x1xi1>
    %28 = vector.broadcast %27 : vector<8x1xi1> to vector<8x128xi1>
    %29 = vector.broadcast %cst_24 : f32 to vector<8x128xf32>
    %30 = arith.select %28, %20, %29 : vector<8x128xi1>, vector<8x128xf32>
    %31 = arith.index_cast %c0_i32 : i32 to index
    %c0_25 = arith.constant 0 : index
    %c0_26 = arith.constant 0 : index
    %32 = vector.load %arg6[%31, %c0_25, %c0_26] : memref<8x8x128xf32, #tpu.memory_space<vmem>>, vector<1x8x128xf32>
    %33 = vector.shape_cast %32 : vector<1x8x128xf32> to vector<8x128xf32>
    %34 = vector.shape_cast %30 : vector<8x128xf32> to vector<1x8x128xf32>
    tpu.vector_store %arg6[%31, %c0_25, %c0_26], %34 {strides = array<i32>} : memref<8x8x128xf32, #tpu.memory_space<vmem>>, vector<1x8x128xf32>,
    %c1_i32 = arith.constant 1 : i32
    %c0_27 = arith.constant 0 : index
    %c0_28 = arith.constant 0 : index
    %35 = vector.load %arg8[%c0_27, %c0_28] : memref<8x128xf32, #tpu.memory_space<vmem>>, vector<8x128xf32>
    %36 = arith.index_cast %c1_i32 : i32 to index
    %c0_29 = arith.constant 0 : index
    %c0_30 = arith.constant 0 : index
    %37 = vector.load %arg9[%36, %c0_29, %c0_30] : memref<8x8x128xf32, #tpu.memory_space<vmem>>, vector<1x8x128xf32>
    %38 = vector.shape_cast %37 : vector<1x8x128xf32> to vector<8x128xf32>
    %39 = arith.truncf %35 : vector<8x128xf32> to vector<8x128xbf16>
    %c0_31 = arith.constant 0 : index
    %c0_32 = arith.constant 0 : index
    %40 = vector.load %arg3[%c0_31, %c0_32] : memref<128x128xbf16, #tpu.memory_space<vmem>>, vector<128x128xbf16>
    %cst_33 = arith.constant dense<0.000000e+00> : vector<8x128xf32>
    %41 = tpu.matmul %39, %40, %cst_33 {dimension_numbers = #tpu.dot_dimension_numbers<[1], [0], [0], [1], [0, 0, 1, 1], [], []>} : vector<8x128xbf16>, vector<128x128xbf16>, vector<8x128xf32> -> vector<8x128xf32>
    %42 = arith.addf %38, %41 : vector<8x128xf32>
    %43 = math.tanh %42 : vector<8x128xf32>
    %44 = vector.broadcast %c1_i32 : i32 to vector<8x1xi32>
    %45 = arith.cmpi sgt, %11, %44 : vector<8x1xi32>
    %46 = vector.shape_cast %45 : vector<8x1xi1> to vector<8x1xi1>
    %47 = vector.broadcast %46 : vector<8x1xi1> to vector<8x128xi1>
    %48 = arith.select %47, %43, %35 : vector<8x128xi1>, vector<8x128xf32>
    %c0_34 = arith.constant 0 : index
    %c0_35 = arith.constant 0 : index
    %49 = vector.load %arg8[%c0_34, %c0_35] : memref<8x128xf32, #tpu.memory_space<vmem>>, vector<8x128xf32>
    tpu.vector_store %arg8[%c0_34, %c0_35], %48 {strides = array<i32>} : memref<8x128xf32, #tpu.memory_space<vmem>>, vector<8x128xf32>,
    %cst_36 = arith.constant 0.000000e+00 : f32
    %50 = vector.shape_cast %45 : vector<8x1xi1> to vector<8x1xi1>
    %51 = vector.broadcast %50 : vector<8x1xi1> to vector<8x128xi1>
    %52 = vector.broadcast %cst_36 : f32 to vector<8x128xf32>
    %53 = arith.select %51, %43, %52 : vector<8x128xi1>, vector<8x128xf32>
    %54 = arith.index_cast %c1_i32 : i32 to index
    %c0_37 = arith.constant 0 : index
    %c0_38 = arith.constant 0 : index
    %55 = vector.load %arg6[%54, %c0_37, %c0_38] : memref<8x8x128xf32, #tpu.memory_space<vmem>>, vector<1x8x128xf32>
    %56 = vector.shape_cast %55 : vector<1x8x128xf32> to vector<8x128xf32>
    %57 = vector.shape_cast %53 : vector<8x128xf32> to vector<1x8x128xf32>
    tpu.vector_store %arg6[%54, %c0_37, %c0_38], %57 {strides = array<i32>} : memref<8x8x128xf32, #tpu.memory_space<vmem>>, vector<1x8x128xf32>,
    %c2_i32 = arith.constant 2 : i32
    %c0_39 = arith.constant 0 : index
    %c0_40 = arith.constant 0 : index
    %58 = vector.load %arg8[%c0_39, %c0_40] : memref<8x128xf32, #tpu.memory_space<vmem>>, vector<8x128xf32>
    %59 = arith.index_cast %c2_i32 : i32 to index
    %c0_41 = arith.constant 0 : index
    %c0_42 = arith.constant 0 : index
    %60 = vector.load %arg9[%59, %c0_41, %c0_42] : memref<8x8x128xf32, #tpu.memory_space<vmem>>, vector<1x8x128xf32>
    %61 = vector.shape_cast %60 : vector<1x8x128xf32> to vector<8x128xf32>
    %62 = arith.truncf %58 : vector<8x128xf32> to vector<8x128xbf16>
    %c0_43 = arith.constant 0 : index
    %c0_44 = arith.constant 0 : index
    %63 = vector.load %arg3[%c0_43, %c0_44] : memref<128x128xbf16, #tpu.memory_space<vmem>>, vector<128x128xbf16>
    %cst_45 = arith.constant dense<0.000000e+00> : vector<8x128xf32>
    %64 = tpu.matmul %62, %63, %cst_45 {dimension_numbers = #tpu.dot_dimension_numbers<[1], [0], [0], [1], [0, 0, 1, 1], [], []>} : vector<8x128xbf16>, vector<128x128xbf16>, vector<8x128xf32> -> vector<8x128xf32>
    %65 = arith.addf %61, %64 : vector<8x128xf32>
    %66 = math.tanh %65 : vector<8x128xf32>
    %67 = vector.broadcast %c2_i32 : i32 to vector<8x1xi32>
    %68 = arith.cmpi sgt, %11, %67 : vector<8x1xi32>
    %69 = vector.shape_cast %68 : vector<8x1xi1> to vector<8x1xi1>
    %70 = vector.broadcast %69 : vector<8x1xi1> to vector<8x128xi1>
    %71 = arith.select %70, %66, %58 : vector<8x128xi1>, vector<8x128xf32>
    %c0_46 = arith.constant 0 : index
    %c0_47 = arith.constant 0 : index
    %72 = vector.load %arg8[%c0_46, %c0_47] : memref<8x128xf32, #tpu.memory_space<vmem>>, vector<8x128xf32>
    tpu.vector_store %arg8[%c0_46, %c0_47], %71 {strides = array<i32>} : memref<8x128xf32, #tpu.memory_space<vmem>>, vector<8x128xf32>,
    %cst_48 = arith.constant 0.000000e+00 : f32
    %73 = vector.shape_cast %68 : vector<8x1xi1> to vector<8x1xi1>
    %74 = vector.broadcast %73 : vector<8x1xi1> to vector<8x128xi1>
    %75 = vector.broadcast %cst_48 : f32 to vector<8x128xf32>
    %76 = arith.select %74, %66, %75 : vector<8x128xi1>, vector<8x128xf32>
    %77 = arith.index_cast %c2_i32 : i32 to index
    %c0_49 = arith.constant 0 : index
    %c0_50 = arith.constant 0 : index
    %78 = vector.load %arg6[%77, %c0_49, %c0_50] : memref<8x8x128xf32, #tpu.memory_space<vmem>>, vector<1x8x128xf32>
    %79 = vector.shape_cast %78 : vector<1x8x128xf32> to vector<8x128xf32>
    %80 = vector.shape_cast %76 : vector<8x128xf32> to vector<1x8x128xf32>
    tpu.vector_store %arg6[%77, %c0_49, %c0_50], %80 {strides = array<i32>} : memref<8x8x128xf32, #tpu.memory_space<vmem>>, vector<1x8x128xf32>,
    %c3_i32 = arith.constant 3 : i32
    %c0_51 = arith.constant 0 : index
    %c0_52 = arith.constant 0 : index
    %81 = vector.load %arg8[%c0_51, %c0_52] : memref<8x128xf32, #tpu.memory_space<vmem>>, vector<8x128xf32>
    %82 = arith.index_cast %c3_i32 : i32 to index
    %c0_53 = arith.constant 0 : index
    %c0_54 = arith.constant 0 : index
    %83 = vector.load %arg9[%82, %c0_53, %c0_54] : memref<8x8x128xf32, #tpu.memory_space<vmem>>, vector<1x8x128xf32>
    %84 = vector.shape_cast %83 : vector<1x8x128xf32> to vector<8x128xf32>
    %85 = arith.truncf %81 : vector<8x128xf32> to vector<8x128xbf16>
    %c0_55 = arith.constant 0 : index
    %c0_56 = arith.constant 0 : index
    %86 = vector.load %arg3[%c0_55, %c0_56] : memref<128x128xbf16, #tpu.memory_space<vmem>>, vector<128x128xbf16>
    %cst_57 = arith.constant dense<0.000000e+00> : vector<8x128xf32>
    %87 = tpu.matmul %85, %86, %cst_57 {dimension_numbers = #tpu.dot_dimension_numbers<[1], [0], [0], [1], [0, 0, 1, 1], [], []>} : vector<8x128xbf16>, vector<128x128xbf16>, vector<8x128xf32> -> vector<8x128xf32>
    %88 = arith.addf %84, %87 : vector<8x128xf32>
    %89 = math.tanh %88 : vector<8x128xf32>
    %90 = vector.broadcast %c3_i32 : i32 to vector<8x1xi32>
    %91 = arith.cmpi sgt, %11, %90 : vector<8x1xi32>
    %92 = vector.shape_cast %91 : vector<8x1xi1> to vector<8x1xi1>
    %93 = vector.broadcast %92 : vector<8x1xi1> to vector<8x128xi1>
    %94 = arith.select %93, %89, %81 : vector<8x128xi1>, vector<8x128xf32>
    %c0_58 = arith.constant 0 : index
    %c0_59 = arith.constant 0 : index
    %95 = vector.load %arg8[%c0_58, %c0_59] : memref<8x128xf32, #tpu.memory_space<vmem>>, vector<8x128xf32>
    tpu.vector_store %arg8[%c0_58, %c0_59], %94 {strides = array<i32>} : memref<8x128xf32, #tpu.memory_space<vmem>>, vector<8x128xf32>,
    %cst_60 = arith.constant 0.000000e+00 : f32
    %96 = vector.shape_cast %91 : vector<8x1xi1> to vector<8x1xi1>
    %97 = vector.broadcast %96 : vector<8x1xi1> to vector<8x128xi1>
    %98 = vector.broadcast %cst_60 : f32 to vector<8x128xf32>
    %99 = arith.select %97, %89, %98 : vector<8x128xi1>, vector<8x128xf32>
    %100 = arith.index_cast %c3_i32 : i32 to index
    %c0_61 = arith.constant 0 : index
    %c0_62 = arith.constant 0 : index
    %101 = vector.load %arg6[%100, %c0_61, %c0_62] : memref<8x8x128xf32, #tpu.memory_space<vmem>>, vector<1x8x128xf32>
    %102 = vector.shape_cast %101 : vector<1x8x128xf32> to vector<8x128xf32>
    %103 = vector.shape_cast %99 : vector<8x128xf32> to vector<1x8x128xf32>
    tpu.vector_store %arg6[%100, %c0_61, %c0_62], %103 {strides = array<i32>} : memref<8x8x128xf32, #tpu.memory_space<vmem>>, vector<1x8x128xf32>,
    %c4_i32 = arith.constant 4 : i32
    %c0_63 = arith.constant 0 : index
    %c0_64 = arith.constant 0 : index
    %104 = vector.load %arg8[%c0_63, %c0_64] : memref<8x128xf32, #tpu.memory_space<vmem>>, vector<8x128xf32>
    %105 = arith.index_cast %c4_i32 : i32 to index
    %c0_65 = arith.constant 0 : index
    %c0_66 = arith.constant 0 : index
    %106 = vector.load %arg9[%105, %c0_65, %c0_66] : memref<8x8x128xf32, #tpu.memory_space<vmem>>, vector<1x8x128xf32>
    %107 = vector.shape_cast %106 : vector<1x8x128xf32> to vector<8x128xf32>
    %108 = arith.truncf %104 : vector<8x128xf32> to vector<8x128xbf16>
    %c0_67 = arith.constant 0 : index
    %c0_68 = arith.constant 0 : index
    %109 = vector.load %arg3[%c0_67, %c0_68] : memref<128x128xbf16, #tpu.memory_space<vmem>>, vector<128x128xbf16>
    %cst_69 = arith.constant dense<0.000000e+00> : vector<8x128xf32>
    %110 = tpu.matmul %108, %109, %cst_69 {dimension_numbers = #tpu.dot_dimension_numbers<[1], [0], [0], [1], [0, 0, 1, 1], [], []>} : vector<8x128xbf16>, vector<128x128xbf16>, vector<8x128xf32> -> vector<8x128xf32>
    %111 = arith.addf %107, %110 : vector<8x128xf32>
    %112 = math.tanh %111 : vector<8x128xf32>
    %113 = vector.broadcast %c4_i32 : i32 to vector<8x1xi32>
    %114 = arith.cmpi sgt, %11, %113 : vector<8x1xi32>
    %115 = vector.shape_cast %114 : vector<8x1xi1> to vector<8x1xi1>
    %116 = vector.broadcast %115 : vector<8x1xi1> to vector<8x128xi1>
    %117 = arith.select %116, %112, %104 : vector<8x128xi1>, vector<8x128xf32>
    %c0_70 = arith.constant 0 : index
    %c0_71 = arith.constant 0 : index
    %118 = vector.load %arg8[%c0_70, %c0_71] : memref<8x128xf32, #tpu.memory_space<vmem>>, vector<8x128xf32>
    tpu.vector_store %arg8[%c0_70, %c0_71], %117 {strides = array<i32>} : memref<8x128xf32, #tpu.memory_space<vmem>>, vector<8x128xf32>,
    %cst_72 = arith.constant 0.000000e+00 : f32
    %119 = vector.shape_cast %114 : vector<8x1xi1> to vector<8x1xi1>
    %120 = vector.broadcast %119 : vector<8x1xi1> to vector<8x128xi1>
    %121 = vector.broadcast %cst_72 : f32 to vector<8x128xf32>
    %122 = arith.select %120, %112, %121 : vector<8x128xi1>, vector<8x128xf32>
    %123 = arith.index_cast %c4_i32 : i32 to index
    %c0_73 = arith.constant 0 : index
    %c0_74 = arith.constant 0 : index
    %124 = vector.load %arg6[%123, %c0_73, %c0_74] : memref<8x8x128xf32, #tpu.memory_space<vmem>>, vector<1x8x128xf32>
    %125 = vector.shape_cast %124 : vector<1x8x128xf32> to vector<8x128xf32>
    %126 = vector.shape_cast %122 : vector<8x128xf32> to vector<1x8x128xf32>
    tpu.vector_store %arg6[%123, %c0_73, %c0_74], %126 {strides = array<i32>} : memref<8x8x128xf32, #tpu.memory_space<vmem>>, vector<1x8x128xf32>,
    %c5_i32 = arith.constant 5 : i32
    %c0_75 = arith.constant 0 : index
    %c0_76 = arith.constant 0 : index
    %127 = vector.load %arg8[%c0_75, %c0_76] : memref<8x128xf32, #tpu.memory_space<vmem>>, vector<8x128xf32>
    %128 = arith.index_cast %c5_i32 : i32 to index
    %c0_77 = arith.constant 0 : index
    %c0_78 = arith.constant 0 : index
    %129 = vector.load %arg9[%128, %c0_77, %c0_78] : memref<8x8x128xf32, #tpu.memory_space<vmem>>, vector<1x8x128xf32>
    %130 = vector.shape_cast %129 : vector<1x8x128xf32> to vector<8x128xf32>
    %131 = arith.truncf %127 : vector<8x128xf32> to vector<8x128xbf16>
    %c0_79 = arith.constant 0 : index
    %c0_80 = arith.constant 0 : index
    %132 = vector.load %arg3[%c0_79, %c0_80] : memref<128x128xbf16, #tpu.memory_space<vmem>>, vector<128x128xbf16>
    %cst_81 = arith.constant dense<0.000000e+00> : vector<8x128xf32>
    %133 = tpu.matmul %131, %132, %cst_81 {dimension_numbers = #tpu.dot_dimension_numbers<[1], [0], [0], [1], [0, 0, 1, 1], [], []>} : vector<8x128xbf16>, vector<128x128xbf16>, vector<8x128xf32> -> vector<8x128xf32>
    %134 = arith.addf %130, %133 : vector<8x128xf32>
    %135 = math.tanh %134 : vector<8x128xf32>
    %136 = vector.broadcast %c5_i32 : i32 to vector<8x1xi32>
    %137 = arith.cmpi sgt, %11, %136 : vector<8x1xi32>
    %138 = vector.shape_cast %137 : vector<8x1xi1> to vector<8x1xi1>
    %139 = vector.broadcast %138 : vector<8x1xi1> to vector<8x128xi1>
    %140 = arith.select %139, %135, %127 : vector<8x128xi1>, vector<8x128xf32>
    %c0_82 = arith.constant 0 : index
    %c0_83 = arith.constant 0 : index
    %141 = vector.load %arg8[%c0_82, %c0_83] : memref<8x128xf32, #tpu.memory_space<vmem>>, vector<8x128xf32>
    tpu.vector_store %arg8[%c0_82, %c0_83], %140 {strides = array<i32>} : memref<8x128xf32, #tpu.memory_space<vmem>>, vector<8x128xf32>,
    %cst_84 = arith.constant 0.000000e+00 : f32
    %142 = vector.shape_cast %137 : vector<8x1xi1> to vector<8x1xi1>
    %143 = vector.broadcast %142 : vector<8x1xi1> to vector<8x128xi1>
    %144 = vector.broadcast %cst_84 : f32 to vector<8x128xf32>
    %145 = arith.select %143, %135, %144 : vector<8x128xi1>, vector<8x128xf32>
    %146 = arith.index_cast %c5_i32 : i32 to index
    %c0_85 = arith.constant 0 : index
    %c0_86 = arith.constant 0 : index
    %147 = vector.load %arg6[%146, %c0_85, %c0_86] : memref<8x8x128xf32, #tpu.memory_space<vmem>>, vector<1x8x128xf32>
    %148 = vector.shape_cast %147 : vector<1x8x128xf32> to vector<8x128xf32>
    %149 = vector.shape_cast %145 : vector<8x128xf32> to vector<1x8x128xf32>
    tpu.vector_store %arg6[%146, %c0_85, %c0_86], %149 {strides = array<i32>} : memref<8x8x128xf32, #tpu.memory_space<vmem>>, vector<1x8x128xf32>,
    %c6_i32 = arith.constant 6 : i32
    %c0_87 = arith.constant 0 : index
    %c0_88 = arith.constant 0 : index
    %150 = vector.load %arg8[%c0_87, %c0_88] : memref<8x128xf32, #tpu.memory_space<vmem>>, vector<8x128xf32>
    %151 = arith.index_cast %c6_i32 : i32 to index
    %c0_89 = arith.constant 0 : index
    %c0_90 = arith.constant 0 : index
    %152 = vector.load %arg9[%151, %c0_89, %c0_90] : memref<8x8x128xf32, #tpu.memory_space<vmem>>, vector<1x8x128xf32>
    %153 = vector.shape_cast %152 : vector<1x8x128xf32> to vector<8x128xf32>
    %154 = arith.truncf %150 : vector<8x128xf32> to vector<8x128xbf16>
    %c0_91 = arith.constant 0 : index
    %c0_92 = arith.constant 0 : index
    %155 = vector.load %arg3[%c0_91, %c0_92] : memref<128x128xbf16, #tpu.memory_space<vmem>>, vector<128x128xbf16>
    %cst_93 = arith.constant dense<0.000000e+00> : vector<8x128xf32>
    %156 = tpu.matmul %154, %155, %cst_93 {dimension_numbers = #tpu.dot_dimension_numbers<[1], [0], [0], [1], [0, 0, 1, 1], [], []>} : vector<8x128xbf16>, vector<128x128xbf16>, vector<8x128xf32> -> vector<8x128xf32>
    %157 = arith.addf %153, %156 : vector<8x128xf32>
    %158 = math.tanh %157 : vector<8x128xf32>
    %159 = vector.broadcast %c6_i32 : i32 to vector<8x1xi32>
    %160 = arith.cmpi sgt, %11, %159 : vector<8x1xi32>
    %161 = vector.shape_cast %160 : vector<8x1xi1> to vector<8x1xi1>
    %162 = vector.broadcast %161 : vector<8x1xi1> to vector<8x128xi1>
    %163 = arith.select %162, %158, %150 : vector<8x128xi1>, vector<8x128xf32>
    %c0_94 = arith.constant 0 : index
    %c0_95 = arith.constant 0 : index
    %164 = vector.load %arg8[%c0_94, %c0_95] : memref<8x128xf32, #tpu.memory_space<vmem>>, vector<8x128xf32>
    tpu.vector_store %arg8[%c0_94, %c0_95], %163 {strides = array<i32>} : memref<8x128xf32, #tpu.memory_space<vmem>>, vector<8x128xf32>,
    %cst_96 = arith.constant 0.000000e+00 : f32
    %165 = vector.shape_cast %160 : vector<8x1xi1> to vector<8x1xi1>
    %166 = vector.broadcast %165 : vector<8x1xi1> to vector<8x128xi1>
    %167 = vector.broadcast %cst_96 : f32 to vector<8x128xf32>
    %168 = arith.select %166, %158, %167 : vector<8x128xi1>, vector<8x128xf32>
    %169 = arith.index_cast %c6_i32 : i32 to index
    %c0_97 = arith.constant 0 : index
    %c0_98 = arith.constant 0 : index
    %170 = vector.load %arg6[%169, %c0_97, %c0_98] : memref<8x8x128xf32, #tpu.memory_space<vmem>>, vector<1x8x128xf32>
    %171 = vector.shape_cast %170 : vector<1x8x128xf32> to vector<8x128xf32>
    %172 = vector.shape_cast %168 : vector<8x128xf32> to vector<1x8x128xf32>
    tpu.vector_store %arg6[%169, %c0_97, %c0_98], %172 {strides = array<i32>} : memref<8x8x128xf32, #tpu.memory_space<vmem>>, vector<1x8x128xf32>,
    %c7_i32 = arith.constant 7 : i32
    %c0_99 = arith.constant 0 : index
    %c0_100 = arith.constant 0 : index
    %173 = vector.load %arg8[%c0_99, %c0_100] : memref<8x128xf32, #tpu.memory_space<vmem>>, vector<8x128xf32>
    %174 = arith.index_cast %c7_i32 : i32 to index
    %c0_101 = arith.constant 0 : index
    %c0_102 = arith.constant 0 : index
    %175 = vector.load %arg9[%174, %c0_101, %c0_102] : memref<8x8x128xf32, #tpu.memory_space<vmem>>, vector<1x8x128xf32>
    %176 = vector.shape_cast %175 : vector<1x8x128xf32> to vector<8x128xf32>
    %177 = arith.truncf %173 : vector<8x128xf32> to vector<8x128xbf16>
    %c0_103 = arith.constant 0 : index
    %c0_104 = arith.constant 0 : index
    %178 = vector.load %arg3[%c0_103, %c0_104] : memref<128x128xbf16, #tpu.memory_space<vmem>>, vector<128x128xbf16>
    %cst_105 = arith.constant dense<0.000000e+00> : vector<8x128xf32>
    %179 = tpu.matmul %177, %178, %cst_105 {dimension_numbers = #tpu.dot_dimension_numbers<[1], [0], [0], [1], [0, 0, 1, 1], [], []>} : vector<8x128xbf16>, vector<128x128xbf16>, vector<8x128xf32> -> vector<8x128xf32>
    %180 = arith.addf %176, %179 : vector<8x128xf32>
    %181 = math.tanh %180 : vector<8x128xf32>
    %182 = vector.broadcast %c7_i32 : i32 to vector<8x1xi32>
    %183 = arith.cmpi sgt, %11, %182 : vector<8x1xi32>
    %184 = vector.shape_cast %183 : vector<8x1xi1> to vector<8x1xi1>
    %185 = vector.broadcast %184 : vector<8x1xi1> to vector<8x128xi1>
    %186 = arith.select %185, %181, %173 : vector<8x128xi1>, vector<8x128xf32>
    %c0_106 = arith.constant 0 : index
    %c0_107 = arith.constant 0 : index
    %187 = vector.load %arg8[%c0_106, %c0_107] : memref<8x128xf32, #tpu.memory_space<vmem>>, vector<8x128xf32>
    tpu.vector_store %arg8[%c0_106, %c0_107], %186 {strides = array<i32>} : memref<8x128xf32, #tpu.memory_space<vmem>>, vector<8x128xf32>,
    %cst_108 = arith.constant 0.000000e+00 : f32
    %188 = vector.shape_cast %183 : vector<8x1xi1> to vector<8x1xi1>
    %189 = vector.broadcast %188 : vector<8x1xi1> to vector<8x128xi1>
    %190 = vector.broadcast %cst_108 : f32 to vector<8x128xf32>
    %191 = arith.select %189, %181, %190 : vector<8x128xi1>, vector<8x128xf32>
    %192 = arith.index_cast %c7_i32 : i32 to index
    %c0_109 = arith.constant 0 : index
    %c0_110 = arith.constant 0 : index
    %193 = vector.load %arg6[%192, %c0_109, %c0_110] : memref<8x8x128xf32, #tpu.memory_space<vmem>>, vector<1x8x128xf32>
    %194 = vector.shape_cast %193 : vector<1x8x128xf32> to vector<8x128xf32>
    %195 = vector.shape_cast %191 : vector<8x128xf32> to vector<1x8x128xf32>
    tpu.vector_store %arg6[%192, %c0_109, %c0_110], %195 {strides = array<i32>} : memref<8x8x128xf32, #tpu.memory_space<vmem>>, vector<1x8x128xf32>,
    %c8_i32 = arith.constant 8 : i32
    %c0_111 = arith.constant 0 : index
    %c0_112 = arith.constant 0 : index
    %196 = vector.load %arg8[%c0_111, %c0_112] : memref<8x128xf32, #tpu.memory_space<vmem>>, vector<8x128xf32>
    %c0_113 = arith.constant 0 : index
    %c0_114 = arith.constant 0 : index
    %197 = vector.load %arg7[%c0_113, %c0_114] : memref<8x128xf32, #tpu.memory_space<vmem>>, vector<8x128xf32>
    tpu.vector_store %arg7[%c0_113, %c0_114], %196 {strides = array<i32>} : memref<8x128xf32, #tpu.memory_space<vmem>>, vector<8x128xf32>,
    return
  }
}

module attributes {stable_mosaic.version = 11 : i64} {
  func.func @_rnn_dir_kernel(%arg0: memref<8x8x16xbf16, #tpu.memory_space<vmem>>, %arg1: memref<8x128xf32, #tpu.memory_space<vmem>>, %arg2: memref<16x128xbf16, #tpu.memory_space<vmem>>, %arg3: memref<128x128xbf16, #tpu.memory_space<vmem>>, %arg4: memref<1x128xf32, #tpu.memory_space<vmem>>, %arg5: memref<8x1xi32, #tpu.memory_space<vmem>>, %arg6: memref<8x8x128xf32, #tpu.memory_space<vmem>>, %arg7: memref<8x128xf32, #tpu.memory_space<vmem>>, %arg8: memref<8x128xf32, #tpu.memory_space<vmem>>, %arg9: memref<8x8x128xf32, #tpu.memory_space<vmem>>) attributes {dimension_semantics = [], scalar_prefetch = 0 : i64, scratch_operands = 2 : i64, tpu.core_type = #tpu.core_type<tc>} {
    %c0 = arith.constant 0 : index
    %c0_0 = arith.constant 0 : index
    %c0_1 = arith.constant 0 : index
    %0 = vector.load %arg0[%c0, %c0_0, %c0_1] : memref<8x8x16xbf16, #tpu.memory_space<vmem>>, vector<8x8x16xbf16>
    %1 = vector.shape_cast %0 : vector<8x8x16xbf16> to vector<64x16xbf16>
    %c0_2 = arith.constant 0 : index
    %c0_3 = arith.constant 0 : index
    %2 = vector.load %arg2[%c0_2, %c0_3] : memref<16x128xbf16, #tpu.memory_space<vmem>>, vector<16x128xbf16>
    %cst = arith.constant dense<0.000000e+00> : vector<64x128xf32>
    %3 = tpu.matmul %1, %2, %cst {dimension_numbers = #tpu.dot_dimension_numbers<[1], [0], [0], [1], [0, 0, 1, 1], [], []>} : vector<64x16xbf16>, vector<16x128xbf16>, vector<64x128xf32> -> vector<64x128xf32>
    %c0_4 = arith.constant 0 : index
    %c0_5 = arith.constant 0 : index
    %4 = vector.load %arg4[%c0_4, %c0_5] : memref<1x128xf32, #tpu.memory_space<vmem>>, vector<1x128xf32>
    %5 = vector.broadcast %4 : vector<1x128xf32> to vector<64x128xf32>
    %6 = arith.addf %3, %5 : vector<64x128xf32>
    %7 = vector.shape_cast %6 : vector<64x128xf32> to vector<8x8x128xf32>
    %c0_6 = arith.constant 0 : index
    %c0_7 = arith.constant 0 : index
    %c0_8 = arith.constant 0 : index
    %8 = vector.load %arg9[%c0_6, %c0_7, %c0_8] : memref<8x8x128xf32, #tpu.memory_space<vmem>>, vector<8x8x128xf32>
    tpu.vector_store %arg9[%c0_6, %c0_7, %c0_8], %7 {strides = array<i32>} : memref<8x8x128xf32, #tpu.memory_space<vmem>>, vector<8x8x128xf32>,
    %c0_9 = arith.constant 0 : index
    %c0_10 = arith.constant 0 : index
    %9 = vector.load %arg1[%c0_9, %c0_10] : memref<8x128xf32, #tpu.memory_space<vmem>>, vector<8x128xf32>
    %c0_11 = arith.constant 0 : index
    %c0_12 = arith.constant 0 : index
    %10 = vector.load %arg8[%c0_11, %c0_12] : memref<8x128xf32, #tpu.memory_space<vmem>>, vector<8x128xf32>
    tpu.vector_store %arg8[%c0_11, %c0_12], %9 {strides = array<i32>} : memref<8x128xf32, #tpu.memory_space<vmem>>, vector<8x128xf32>,
    %c0_13 = arith.constant 0 : index
    %c0_14 = arith.constant 0 : index
    %11 = vector.load %arg5[%c0_13, %c0_14] : memref<8x1xi32, #tpu.memory_space<vmem>>, vector<8x1xi32>
    %c0_i32 = arith.constant 0 : i32
    %c7_i32 = arith.constant 7 : i32
    %12 = arith.subi %c7_i32, %c0_i32 : i32
    %c0_15 = arith.constant 0 : index
    %c0_16 = arith.constant 0 : index
    %13 = vector.load %arg8[%c0_15, %c0_16] : memref<8x128xf32, #tpu.memory_space<vmem>>, vector<8x128xf32>
    %14 = arith.index_cast %12 : i32 to index
    %c0_17 = arith.constant 0 : index
    %c0_18 = arith.constant 0 : index
    %15 = vector.load %arg9[%14, %c0_17, %c0_18] : memref<8x8x128xf32, #tpu.memory_space<vmem>>, vector<1x8x128xf32>
    %16 = vector.shape_cast %15 : vector<1x8x128xf32> to vector<8x128xf32>
    %17 = arith.truncf %13 : vector<8x128xf32> to vector<8x128xbf16>
    %c0_19 = arith.constant 0 : index
    %c0_20 = arith.constant 0 : index
    %18 = vector.load %arg3[%c0_19, %c0_20] : memref<128x128xbf16, #tpu.memory_space<vmem>>, vector<128x128xbf16>
    %cst_21 = arith.constant dense<0.000000e+00> : vector<8x128xf32>
    %19 = tpu.matmul %17, %18, %cst_21 {dimension_numbers = #tpu.dot_dimension_numbers<[1], [0], [0], [1], [0, 0, 1, 1], [], []>} : vector<8x128xbf16>, vector<128x128xbf16>, vector<8x128xf32> -> vector<8x128xf32>
    %20 = arith.addf %16, %19 : vector<8x128xf32>
    %21 = math.tanh %20 : vector<8x128xf32>
    %22 = vector.broadcast %12 : i32 to vector<8x1xi32>
    %23 = arith.cmpi sgt, %11, %22 : vector<8x1xi32>
    %24 = vector.shape_cast %23 : vector<8x1xi1> to vector<8x1xi1>
    %25 = vector.broadcast %24 : vector<8x1xi1> to vector<8x128xi1>
    %26 = arith.select %25, %21, %13 : vector<8x128xi1>, vector<8x128xf32>
    %c0_22 = arith.constant 0 : index
    %c0_23 = arith.constant 0 : index
    %27 = vector.load %arg8[%c0_22, %c0_23] : memref<8x128xf32, #tpu.memory_space<vmem>>, vector<8x128xf32>
    tpu.vector_store %arg8[%c0_22, %c0_23], %26 {strides = array<i32>} : memref<8x128xf32, #tpu.memory_space<vmem>>, vector<8x128xf32>,
    %cst_24 = arith.constant 0.000000e+00 : f32
    %28 = vector.shape_cast %23 : vector<8x1xi1> to vector<8x1xi1>
    %29 = vector.broadcast %28 : vector<8x1xi1> to vector<8x128xi1>
    %30 = vector.broadcast %cst_24 : f32 to vector<8x128xf32>
    %31 = arith.select %29, %21, %30 : vector<8x128xi1>, vector<8x128xf32>
    %32 = arith.index_cast %12 : i32 to index
    %c0_25 = arith.constant 0 : index
    %c0_26 = arith.constant 0 : index
    %33 = vector.load %arg6[%32, %c0_25, %c0_26] : memref<8x8x128xf32, #tpu.memory_space<vmem>>, vector<1x8x128xf32>
    %34 = vector.shape_cast %33 : vector<1x8x128xf32> to vector<8x128xf32>
    %35 = vector.shape_cast %31 : vector<8x128xf32> to vector<1x8x128xf32>
    tpu.vector_store %arg6[%32, %c0_25, %c0_26], %35 {strides = array<i32>} : memref<8x8x128xf32, #tpu.memory_space<vmem>>, vector<1x8x128xf32>,
    %c1_i32 = arith.constant 1 : i32
    %c7_i32_27 = arith.constant 7 : i32
    %36 = arith.subi %c7_i32_27, %c1_i32 : i32
    %c0_28 = arith.constant 0 : index
    %c0_29 = arith.constant 0 : index
    %37 = vector.load %arg8[%c0_28, %c0_29] : memref<8x128xf32, #tpu.memory_space<vmem>>, vector<8x128xf32>
    %38 = arith.index_cast %36 : i32 to index
    %c0_30 = arith.constant 0 : index
    %c0_31 = arith.constant 0 : index
    %39 = vector.load %arg9[%38, %c0_30, %c0_31] : memref<8x8x128xf32, #tpu.memory_space<vmem>>, vector<1x8x128xf32>
    %40 = vector.shape_cast %39 : vector<1x8x128xf32> to vector<8x128xf32>
    %41 = arith.truncf %37 : vector<8x128xf32> to vector<8x128xbf16>
    %c0_32 = arith.constant 0 : index
    %c0_33 = arith.constant 0 : index
    %42 = vector.load %arg3[%c0_32, %c0_33] : memref<128x128xbf16, #tpu.memory_space<vmem>>, vector<128x128xbf16>
    %cst_34 = arith.constant dense<0.000000e+00> : vector<8x128xf32>
    %43 = tpu.matmul %41, %42, %cst_34 {dimension_numbers = #tpu.dot_dimension_numbers<[1], [0], [0], [1], [0, 0, 1, 1], [], []>} : vector<8x128xbf16>, vector<128x128xbf16>, vector<8x128xf32> -> vector<8x128xf32>
    %44 = arith.addf %40, %43 : vector<8x128xf32>
    %45 = math.tanh %44 : vector<8x128xf32>
    %46 = vector.broadcast %36 : i32 to vector<8x1xi32>
    %47 = arith.cmpi sgt, %11, %46 : vector<8x1xi32>
    %48 = vector.shape_cast %47 : vector<8x1xi1> to vector<8x1xi1>
    %49 = vector.broadcast %48 : vector<8x1xi1> to vector<8x128xi1>
    %50 = arith.select %49, %45, %37 : vector<8x128xi1>, vector<8x128xf32>
    %c0_35 = arith.constant 0 : index
    %c0_36 = arith.constant 0 : index
    %51 = vector.load %arg8[%c0_35, %c0_36] : memref<8x128xf32, #tpu.memory_space<vmem>>, vector<8x128xf32>
    tpu.vector_store %arg8[%c0_35, %c0_36], %50 {strides = array<i32>} : memref<8x128xf32, #tpu.memory_space<vmem>>, vector<8x128xf32>,
    %cst_37 = arith.constant 0.000000e+00 : f32
    %52 = vector.shape_cast %47 : vector<8x1xi1> to vector<8x1xi1>
    %53 = vector.broadcast %52 : vector<8x1xi1> to vector<8x128xi1>
    %54 = vector.broadcast %cst_37 : f32 to vector<8x128xf32>
    %55 = arith.select %53, %45, %54 : vector<8x128xi1>, vector<8x128xf32>
    %56 = arith.index_cast %36 : i32 to index
    %c0_38 = arith.constant 0 : index
    %c0_39 = arith.constant 0 : index
    %57 = vector.load %arg6[%56, %c0_38, %c0_39] : memref<8x8x128xf32, #tpu.memory_space<vmem>>, vector<1x8x128xf32>
    %58 = vector.shape_cast %57 : vector<1x8x128xf32> to vector<8x128xf32>
    %59 = vector.shape_cast %55 : vector<8x128xf32> to vector<1x8x128xf32>
    tpu.vector_store %arg6[%56, %c0_38, %c0_39], %59 {strides = array<i32>} : memref<8x8x128xf32, #tpu.memory_space<vmem>>, vector<1x8x128xf32>,
    %c2_i32 = arith.constant 2 : i32
    %c7_i32_40 = arith.constant 7 : i32
    %60 = arith.subi %c7_i32_40, %c2_i32 : i32
    %c0_41 = arith.constant 0 : index
    %c0_42 = arith.constant 0 : index
    %61 = vector.load %arg8[%c0_41, %c0_42] : memref<8x128xf32, #tpu.memory_space<vmem>>, vector<8x128xf32>
    %62 = arith.index_cast %60 : i32 to index
    %c0_43 = arith.constant 0 : index
    %c0_44 = arith.constant 0 : index
    %63 = vector.load %arg9[%62, %c0_43, %c0_44] : memref<8x8x128xf32, #tpu.memory_space<vmem>>, vector<1x8x128xf32>
    %64 = vector.shape_cast %63 : vector<1x8x128xf32> to vector<8x128xf32>
    %65 = arith.truncf %61 : vector<8x128xf32> to vector<8x128xbf16>
    %c0_45 = arith.constant 0 : index
    %c0_46 = arith.constant 0 : index
    %66 = vector.load %arg3[%c0_45, %c0_46] : memref<128x128xbf16, #tpu.memory_space<vmem>>, vector<128x128xbf16>
    %cst_47 = arith.constant dense<0.000000e+00> : vector<8x128xf32>
    %67 = tpu.matmul %65, %66, %cst_47 {dimension_numbers = #tpu.dot_dimension_numbers<[1], [0], [0], [1], [0, 0, 1, 1], [], []>} : vector<8x128xbf16>, vector<128x128xbf16>, vector<8x128xf32> -> vector<8x128xf32>
    %68 = arith.addf %64, %67 : vector<8x128xf32>
    %69 = math.tanh %68 : vector<8x128xf32>
    %70 = vector.broadcast %60 : i32 to vector<8x1xi32>
    %71 = arith.cmpi sgt, %11, %70 : vector<8x1xi32>
    %72 = vector.shape_cast %71 : vector<8x1xi1> to vector<8x1xi1>
    %73 = vector.broadcast %72 : vector<8x1xi1> to vector<8x128xi1>
    %74 = arith.select %73, %69, %61 : vector<8x128xi1>, vector<8x128xf32>
    %c0_48 = arith.constant 0 : index
    %c0_49 = arith.constant 0 : index
    %75 = vector.load %arg8[%c0_48, %c0_49] : memref<8x128xf32, #tpu.memory_space<vmem>>, vector<8x128xf32>
    tpu.vector_store %arg8[%c0_48, %c0_49], %74 {strides = array<i32>} : memref<8x128xf32, #tpu.memory_space<vmem>>, vector<8x128xf32>,
    %cst_50 = arith.constant 0.000000e+00 : f32
    %76 = vector.shape_cast %71 : vector<8x1xi1> to vector<8x1xi1>
    %77 = vector.broadcast %76 : vector<8x1xi1> to vector<8x128xi1>
    %78 = vector.broadcast %cst_50 : f32 to vector<8x128xf32>
    %79 = arith.select %77, %69, %78 : vector<8x128xi1>, vector<8x128xf32>
    %80 = arith.index_cast %60 : i32 to index
    %c0_51 = arith.constant 0 : index
    %c0_52 = arith.constant 0 : index
    %81 = vector.load %arg6[%80, %c0_51, %c0_52] : memref<8x8x128xf32, #tpu.memory_space<vmem>>, vector<1x8x128xf32>
    %82 = vector.shape_cast %81 : vector<1x8x128xf32> to vector<8x128xf32>
    %83 = vector.shape_cast %79 : vector<8x128xf32> to vector<1x8x128xf32>
    tpu.vector_store %arg6[%80, %c0_51, %c0_52], %83 {strides = array<i32>} : memref<8x8x128xf32, #tpu.memory_space<vmem>>, vector<1x8x128xf32>,
    %c3_i32 = arith.constant 3 : i32
    %c7_i32_53 = arith.constant 7 : i32
    %84 = arith.subi %c7_i32_53, %c3_i32 : i32
    %c0_54 = arith.constant 0 : index
    %c0_55 = arith.constant 0 : index
    %85 = vector.load %arg8[%c0_54, %c0_55] : memref<8x128xf32, #tpu.memory_space<vmem>>, vector<8x128xf32>
    %86 = arith.index_cast %84 : i32 to index
    %c0_56 = arith.constant 0 : index
    %c0_57 = arith.constant 0 : index
    %87 = vector.load %arg9[%86, %c0_56, %c0_57] : memref<8x8x128xf32, #tpu.memory_space<vmem>>, vector<1x8x128xf32>
    %88 = vector.shape_cast %87 : vector<1x8x128xf32> to vector<8x128xf32>
    %89 = arith.truncf %85 : vector<8x128xf32> to vector<8x128xbf16>
    %c0_58 = arith.constant 0 : index
    %c0_59 = arith.constant 0 : index
    %90 = vector.load %arg3[%c0_58, %c0_59] : memref<128x128xbf16, #tpu.memory_space<vmem>>, vector<128x128xbf16>
    %cst_60 = arith.constant dense<0.000000e+00> : vector<8x128xf32>
    %91 = tpu.matmul %89, %90, %cst_60 {dimension_numbers = #tpu.dot_dimension_numbers<[1], [0], [0], [1], [0, 0, 1, 1], [], []>} : vector<8x128xbf16>, vector<128x128xbf16>, vector<8x128xf32> -> vector<8x128xf32>
    %92 = arith.addf %88, %91 : vector<8x128xf32>
    %93 = math.tanh %92 : vector<8x128xf32>
    %94 = vector.broadcast %84 : i32 to vector<8x1xi32>
    %95 = arith.cmpi sgt, %11, %94 : vector<8x1xi32>
    %96 = vector.shape_cast %95 : vector<8x1xi1> to vector<8x1xi1>
    %97 = vector.broadcast %96 : vector<8x1xi1> to vector<8x128xi1>
    %98 = arith.select %97, %93, %85 : vector<8x128xi1>, vector<8x128xf32>
    %c0_61 = arith.constant 0 : index
    %c0_62 = arith.constant 0 : index
    %99 = vector.load %arg8[%c0_61, %c0_62] : memref<8x128xf32, #tpu.memory_space<vmem>>, vector<8x128xf32>
    tpu.vector_store %arg8[%c0_61, %c0_62], %98 {strides = array<i32>} : memref<8x128xf32, #tpu.memory_space<vmem>>, vector<8x128xf32>,
    %cst_63 = arith.constant 0.000000e+00 : f32
    %100 = vector.shape_cast %95 : vector<8x1xi1> to vector<8x1xi1>
    %101 = vector.broadcast %100 : vector<8x1xi1> to vector<8x128xi1>
    %102 = vector.broadcast %cst_63 : f32 to vector<8x128xf32>
    %103 = arith.select %101, %93, %102 : vector<8x128xi1>, vector<8x128xf32>
    %104 = arith.index_cast %84 : i32 to index
    %c0_64 = arith.constant 0 : index
    %c0_65 = arith.constant 0 : index
    %105 = vector.load %arg6[%104, %c0_64, %c0_65] : memref<8x8x128xf32, #tpu.memory_space<vmem>>, vector<1x8x128xf32>
    %106 = vector.shape_cast %105 : vector<1x8x128xf32> to vector<8x128xf32>
    %107 = vector.shape_cast %103 : vector<8x128xf32> to vector<1x8x128xf32>
    tpu.vector_store %arg6[%104, %c0_64, %c0_65], %107 {strides = array<i32>} : memref<8x8x128xf32, #tpu.memory_space<vmem>>, vector<1x8x128xf32>,
    %c4_i32 = arith.constant 4 : i32
    %c7_i32_66 = arith.constant 7 : i32
    %108 = arith.subi %c7_i32_66, %c4_i32 : i32
    %c0_67 = arith.constant 0 : index
    %c0_68 = arith.constant 0 : index
    %109 = vector.load %arg8[%c0_67, %c0_68] : memref<8x128xf32, #tpu.memory_space<vmem>>, vector<8x128xf32>
    %110 = arith.index_cast %108 : i32 to index
    %c0_69 = arith.constant 0 : index
    %c0_70 = arith.constant 0 : index
    %111 = vector.load %arg9[%110, %c0_69, %c0_70] : memref<8x8x128xf32, #tpu.memory_space<vmem>>, vector<1x8x128xf32>
    %112 = vector.shape_cast %111 : vector<1x8x128xf32> to vector<8x128xf32>
    %113 = arith.truncf %109 : vector<8x128xf32> to vector<8x128xbf16>
    %c0_71 = arith.constant 0 : index
    %c0_72 = arith.constant 0 : index
    %114 = vector.load %arg3[%c0_71, %c0_72] : memref<128x128xbf16, #tpu.memory_space<vmem>>, vector<128x128xbf16>
    %cst_73 = arith.constant dense<0.000000e+00> : vector<8x128xf32>
    %115 = tpu.matmul %113, %114, %cst_73 {dimension_numbers = #tpu.dot_dimension_numbers<[1], [0], [0], [1], [0, 0, 1, 1], [], []>} : vector<8x128xbf16>, vector<128x128xbf16>, vector<8x128xf32> -> vector<8x128xf32>
    %116 = arith.addf %112, %115 : vector<8x128xf32>
    %117 = math.tanh %116 : vector<8x128xf32>
    %118 = vector.broadcast %108 : i32 to vector<8x1xi32>
    %119 = arith.cmpi sgt, %11, %118 : vector<8x1xi32>
    %120 = vector.shape_cast %119 : vector<8x1xi1> to vector<8x1xi1>
    %121 = vector.broadcast %120 : vector<8x1xi1> to vector<8x128xi1>
    %122 = arith.select %121, %117, %109 : vector<8x128xi1>, vector<8x128xf32>
    %c0_74 = arith.constant 0 : index
    %c0_75 = arith.constant 0 : index
    %123 = vector.load %arg8[%c0_74, %c0_75] : memref<8x128xf32, #tpu.memory_space<vmem>>, vector<8x128xf32>
    tpu.vector_store %arg8[%c0_74, %c0_75], %122 {strides = array<i32>} : memref<8x128xf32, #tpu.memory_space<vmem>>, vector<8x128xf32>,
    %cst_76 = arith.constant 0.000000e+00 : f32
    %124 = vector.shape_cast %119 : vector<8x1xi1> to vector<8x1xi1>
    %125 = vector.broadcast %124 : vector<8x1xi1> to vector<8x128xi1>
    %126 = vector.broadcast %cst_76 : f32 to vector<8x128xf32>
    %127 = arith.select %125, %117, %126 : vector<8x128xi1>, vector<8x128xf32>
    %128 = arith.index_cast %108 : i32 to index
    %c0_77 = arith.constant 0 : index
    %c0_78 = arith.constant 0 : index
    %129 = vector.load %arg6[%128, %c0_77, %c0_78] : memref<8x8x128xf32, #tpu.memory_space<vmem>>, vector<1x8x128xf32>
    %130 = vector.shape_cast %129 : vector<1x8x128xf32> to vector<8x128xf32>
    %131 = vector.shape_cast %127 : vector<8x128xf32> to vector<1x8x128xf32>
    tpu.vector_store %arg6[%128, %c0_77, %c0_78], %131 {strides = array<i32>} : memref<8x8x128xf32, #tpu.memory_space<vmem>>, vector<1x8x128xf32>,
    %c5_i32 = arith.constant 5 : i32
    %c7_i32_79 = arith.constant 7 : i32
    %132 = arith.subi %c7_i32_79, %c5_i32 : i32
    %c0_80 = arith.constant 0 : index
    %c0_81 = arith.constant 0 : index
    %133 = vector.load %arg8[%c0_80, %c0_81] : memref<8x128xf32, #tpu.memory_space<vmem>>, vector<8x128xf32>
    %134 = arith.index_cast %132 : i32 to index
    %c0_82 = arith.constant 0 : index
    %c0_83 = arith.constant 0 : index
    %135 = vector.load %arg9[%134, %c0_82, %c0_83] : memref<8x8x128xf32, #tpu.memory_space<vmem>>, vector<1x8x128xf32>
    %136 = vector.shape_cast %135 : vector<1x8x128xf32> to vector<8x128xf32>
    %137 = arith.truncf %133 : vector<8x128xf32> to vector<8x128xbf16>
    %c0_84 = arith.constant 0 : index
    %c0_85 = arith.constant 0 : index
    %138 = vector.load %arg3[%c0_84, %c0_85] : memref<128x128xbf16, #tpu.memory_space<vmem>>, vector<128x128xbf16>
    %cst_86 = arith.constant dense<0.000000e+00> : vector<8x128xf32>
    %139 = tpu.matmul %137, %138, %cst_86 {dimension_numbers = #tpu.dot_dimension_numbers<[1], [0], [0], [1], [0, 0, 1, 1], [], []>} : vector<8x128xbf16>, vector<128x128xbf16>, vector<8x128xf32> -> vector<8x128xf32>
    %140 = arith.addf %136, %139 : vector<8x128xf32>
    %141 = math.tanh %140 : vector<8x128xf32>
    %142 = vector.broadcast %132 : i32 to vector<8x1xi32>
    %143 = arith.cmpi sgt, %11, %142 : vector<8x1xi32>
    %144 = vector.shape_cast %143 : vector<8x1xi1> to vector<8x1xi1>
    %145 = vector.broadcast %144 : vector<8x1xi1> to vector<8x128xi1>
    %146 = arith.select %145, %141, %133 : vector<8x128xi1>, vector<8x128xf32>
    %c0_87 = arith.constant 0 : index
    %c0_88 = arith.constant 0 : index
    %147 = vector.load %arg8[%c0_87, %c0_88] : memref<8x128xf32, #tpu.memory_space<vmem>>, vector<8x128xf32>
    tpu.vector_store %arg8[%c0_87, %c0_88], %146 {strides = array<i32>} : memref<8x128xf32, #tpu.memory_space<vmem>>, vector<8x128xf32>,
    %cst_89 = arith.constant 0.000000e+00 : f32
    %148 = vector.shape_cast %143 : vector<8x1xi1> to vector<8x1xi1>
    %149 = vector.broadcast %148 : vector<8x1xi1> to vector<8x128xi1>
    %150 = vector.broadcast %cst_89 : f32 to vector<8x128xf32>
    %151 = arith.select %149, %141, %150 : vector<8x128xi1>, vector<8x128xf32>
    %152 = arith.index_cast %132 : i32 to index
    %c0_90 = arith.constant 0 : index
    %c0_91 = arith.constant 0 : index
    %153 = vector.load %arg6[%152, %c0_90, %c0_91] : memref<8x8x128xf32, #tpu.memory_space<vmem>>, vector<1x8x128xf32>
    %154 = vector.shape_cast %153 : vector<1x8x128xf32> to vector<8x128xf32>
    %155 = vector.shape_cast %151 : vector<8x128xf32> to vector<1x8x128xf32>
    tpu.vector_store %arg6[%152, %c0_90, %c0_91], %155 {strides = array<i32>} : memref<8x8x128xf32, #tpu.memory_space<vmem>>, vector<1x8x128xf32>,
    %c6_i32 = arith.constant 6 : i32
    %c7_i32_92 = arith.constant 7 : i32
    %156 = arith.subi %c7_i32_92, %c6_i32 : i32
    %c0_93 = arith.constant 0 : index
    %c0_94 = arith.constant 0 : index
    %157 = vector.load %arg8[%c0_93, %c0_94] : memref<8x128xf32, #tpu.memory_space<vmem>>, vector<8x128xf32>
    %158 = arith.index_cast %156 : i32 to index
    %c0_95 = arith.constant 0 : index
    %c0_96 = arith.constant 0 : index
    %159 = vector.load %arg9[%158, %c0_95, %c0_96] : memref<8x8x128xf32, #tpu.memory_space<vmem>>, vector<1x8x128xf32>
    %160 = vector.shape_cast %159 : vector<1x8x128xf32> to vector<8x128xf32>
    %161 = arith.truncf %157 : vector<8x128xf32> to vector<8x128xbf16>
    %c0_97 = arith.constant 0 : index
    %c0_98 = arith.constant 0 : index
    %162 = vector.load %arg3[%c0_97, %c0_98] : memref<128x128xbf16, #tpu.memory_space<vmem>>, vector<128x128xbf16>
    %cst_99 = arith.constant dense<0.000000e+00> : vector<8x128xf32>
    %163 = tpu.matmul %161, %162, %cst_99 {dimension_numbers = #tpu.dot_dimension_numbers<[1], [0], [0], [1], [0, 0, 1, 1], [], []>} : vector<8x128xbf16>, vector<128x128xbf16>, vector<8x128xf32> -> vector<8x128xf32>
    %164 = arith.addf %160, %163 : vector<8x128xf32>
    %165 = math.tanh %164 : vector<8x128xf32>
    %166 = vector.broadcast %156 : i32 to vector<8x1xi32>
    %167 = arith.cmpi sgt, %11, %166 : vector<8x1xi32>
    %168 = vector.shape_cast %167 : vector<8x1xi1> to vector<8x1xi1>
    %169 = vector.broadcast %168 : vector<8x1xi1> to vector<8x128xi1>
    %170 = arith.select %169, %165, %157 : vector<8x128xi1>, vector<8x128xf32>
    %c0_100 = arith.constant 0 : index
    %c0_101 = arith.constant 0 : index
    %171 = vector.load %arg8[%c0_100, %c0_101] : memref<8x128xf32, #tpu.memory_space<vmem>>, vector<8x128xf32>
    tpu.vector_store %arg8[%c0_100, %c0_101], %170 {strides = array<i32>} : memref<8x128xf32, #tpu.memory_space<vmem>>, vector<8x128xf32>,
    %cst_102 = arith.constant 0.000000e+00 : f32
    %172 = vector.shape_cast %167 : vector<8x1xi1> to vector<8x1xi1>
    %173 = vector.broadcast %172 : vector<8x1xi1> to vector<8x128xi1>
    %174 = vector.broadcast %cst_102 : f32 to vector<8x128xf32>
    %175 = arith.select %173, %165, %174 : vector<8x128xi1>, vector<8x128xf32>
    %176 = arith.index_cast %156 : i32 to index
    %c0_103 = arith.constant 0 : index
    %c0_104 = arith.constant 0 : index
    %177 = vector.load %arg6[%176, %c0_103, %c0_104] : memref<8x8x128xf32, #tpu.memory_space<vmem>>, vector<1x8x128xf32>
    %178 = vector.shape_cast %177 : vector<1x8x128xf32> to vector<8x128xf32>
    %179 = vector.shape_cast %175 : vector<8x128xf32> to vector<1x8x128xf32>
    tpu.vector_store %arg6[%176, %c0_103, %c0_104], %179 {strides = array<i32>} : memref<8x8x128xf32, #tpu.memory_space<vmem>>, vector<1x8x128xf32>,
    %c7_i32_105 = arith.constant 7 : i32
    %c7_i32_106 = arith.constant 7 : i32
    %180 = arith.subi %c7_i32_106, %c7_i32_105 : i32
    %c0_107 = arith.constant 0 : index
    %c0_108 = arith.constant 0 : index
    %181 = vector.load %arg8[%c0_107, %c0_108] : memref<8x128xf32, #tpu.memory_space<vmem>>, vector<8x128xf32>
    %182 = arith.index_cast %180 : i32 to index
    %c0_109 = arith.constant 0 : index
    %c0_110 = arith.constant 0 : index
    %183 = vector.load %arg9[%182, %c0_109, %c0_110] : memref<8x8x128xf32, #tpu.memory_space<vmem>>, vector<1x8x128xf32>
    %184 = vector.shape_cast %183 : vector<1x8x128xf32> to vector<8x128xf32>
    %185 = arith.truncf %181 : vector<8x128xf32> to vector<8x128xbf16>
    %c0_111 = arith.constant 0 : index
    %c0_112 = arith.constant 0 : index
    %186 = vector.load %arg3[%c0_111, %c0_112] : memref<128x128xbf16, #tpu.memory_space<vmem>>, vector<128x128xbf16>
    %cst_113 = arith.constant dense<0.000000e+00> : vector<8x128xf32>
    %187 = tpu.matmul %185, %186, %cst_113 {dimension_numbers = #tpu.dot_dimension_numbers<[1], [0], [0], [1], [0, 0, 1, 1], [], []>} : vector<8x128xbf16>, vector<128x128xbf16>, vector<8x128xf32> -> vector<8x128xf32>
    %188 = arith.addf %184, %187 : vector<8x128xf32>
    %189 = math.tanh %188 : vector<8x128xf32>
    %190 = vector.broadcast %180 : i32 to vector<8x1xi32>
    %191 = arith.cmpi sgt, %11, %190 : vector<8x1xi32>
    %192 = vector.shape_cast %191 : vector<8x1xi1> to vector<8x1xi1>
    %193 = vector.broadcast %192 : vector<8x1xi1> to vector<8x128xi1>
    %194 = arith.select %193, %189, %181 : vector<8x128xi1>, vector<8x128xf32>
    %c0_114 = arith.constant 0 : index
    %c0_115 = arith.constant 0 : index
    %195 = vector.load %arg8[%c0_114, %c0_115] : memref<8x128xf32, #tpu.memory_space<vmem>>, vector<8x128xf32>
    tpu.vector_store %arg8[%c0_114, %c0_115], %194 {strides = array<i32>} : memref<8x128xf32, #tpu.memory_space<vmem>>, vector<8x128xf32>,
    %cst_116 = arith.constant 0.000000e+00 : f32
    %196 = vector.shape_cast %191 : vector<8x1xi1> to vector<8x1xi1>
    %197 = vector.broadcast %196 : vector<8x1xi1> to vector<8x128xi1>
    %198 = vector.broadcast %cst_116 : f32 to vector<8x128xf32>
    %199 = arith.select %197, %189, %198 : vector<8x128xi1>, vector<8x128xf32>
    %200 = arith.index_cast %180 : i32 to index
    %c0_117 = arith.constant 0 : index
    %c0_118 = arith.constant 0 : index
    %201 = vector.load %arg6[%200, %c0_117, %c0_118] : memref<8x8x128xf32, #tpu.memory_space<vmem>>, vector<1x8x128xf32>
    %202 = vector.shape_cast %201 : vector<1x8x128xf32> to vector<8x128xf32>
    %203 = vector.shape_cast %199 : vector<8x128xf32> to vector<1x8x128xf32>
    tpu.vector_store %arg6[%200, %c0_117, %c0_118], %203 {strides = array<i32>} : memref<8x8x128xf32, #tpu.memory_space<vmem>>, vector<1x8x128xf32>,
    %c8_i32 = arith.constant 8 : i32
    %c0_119 = arith.constant 0 : index
    %c0_120 = arith.constant 0 : index
    %204 = vector.load %arg8[%c0_119, %c0_120] : memref<8x128xf32, #tpu.memory_space<vmem>>, vector<8x128xf32>
    %c0_121 = arith.constant 0 : index
    %c0_122 = arith.constant 0 : index
    %205 = vector.load %arg7[%c0_121, %c0_122] : memref<8x128xf32, #tpu.memory_space<vmem>>, vector<8x128xf32>
    tpu.vector_store %arg7[%c0_121, %c0_122], %204 {strides = array<i32>} : memref<8x128xf32, #tpu.memory_space<vmem>>, vector<8x128xf32>,
    return
  }
}

module attributes {stable_mosaic.version = 11 : i64} {
  func.func @_proj_logsoftmax_kernel(%arg0: i32, %arg1: memref<16x64xbf16, #tpu.memory_space<vmem>>, %arg2: memref<64x32xbf16, #tpu.memory_space<vmem>>, %arg3: memref<1x32xf32, #tpu.memory_space<vmem>>, %arg4: memref<16x32xf32, #tpu.memory_space<vmem>>) attributes {dimension_semantics = [#tpu.dimension_semantics<parallel>], iteration_bounds = array<i64: 1>, scalar_prefetch = 0 : i64, scratch_operands = 0 : i64, tpu.core_type = #tpu.core_type<tc>, window_params = [{transform_indices = @transform_0, window_bounds = array<i64: 16, 64>}, {pipeline_mode = #tpu.pipeline_mode<synchronous>, transform_indices = @transform_1, window_bounds = array<i64: 64, 32>}, {pipeline_mode = #tpu.pipeline_mode<synchronous>, transform_indices = @transform_2, window_bounds = array<i64: 1, 32>}, {transform_indices = @transform_3, window_bounds = array<i64: 16, 32>}]} {
    %c0 = arith.constant 0 : index
    %c0_0 = arith.constant 0 : index
    %0 = vector.load %arg1[%c0, %c0_0] : memref<16x64xbf16, #tpu.memory_space<vmem>>, vector<16x64xbf16>
    %c0_1 = arith.constant 0 : index
    %c0_2 = arith.constant 0 : index
    %1 = vector.load %arg2[%c0_1, %c0_2] : memref<64x32xbf16, #tpu.memory_space<vmem>>, vector<64x32xbf16>
    %cst = arith.constant dense<0.000000e+00> : vector<16x32xf32>
    %2 = tpu.matmul %0, %1, %cst {dimension_numbers = #tpu.dot_dimension_numbers<[1], [0], [0], [1], [0, 0, 1, 1], [], []>} : vector<16x64xbf16>, vector<64x32xbf16>, vector<16x32xf32> -> vector<16x32xf32>
    %c0_3 = arith.constant 0 : index
    %c0_4 = arith.constant 0 : index
    %3 = vector.load %arg3[%c0_3, %c0_4] : memref<1x32xf32, #tpu.memory_space<vmem>>, vector<1x32xf32>
    %4 = vector.broadcast %3 : vector<1x32xf32> to vector<16x32xf32>
    %5 = arith.addf %2, %4 : vector<16x32xf32>
    %cst_5 = arith.constant dense<0xFF800000> : vector<16xf32>
    %6 = vector.multi_reduction <maximumf>, %5, %cst_5 [1] : vector<16x32xf32> to vector<16xf32>
    %7 = vector.shape_cast %6 : vector<16xf32> to vector<16x1xf32>
    %8 = vector.broadcast %7 : vector<16x1xf32> to vector<16x32xf32>
    %9 = arith.subf %5, %8 : vector<16x32xf32>
    %10 = math.exp %9 : vector<16x32xf32>
    %cst_6 = arith.constant dense<0.000000e+00> : vector<16xf32>
    %11 = vector.multi_reduction <add>, %10, %cst_6 [1] : vector<16x32xf32> to vector<16xf32>
    %12 = vector.shape_cast %11 : vector<16xf32> to vector<16x1xf32>
    %13 = math.log %12 : vector<16x1xf32>
    %14 = arith.addf %13, %7 : vector<16x1xf32>
    %15 = vector.broadcast %14 : vector<16x1xf32> to vector<16x32xf32>
    %16 = arith.subf %5, %15 : vector<16x32xf32>
    %c0_7 = arith.constant 0 : index
    %c0_8 = arith.constant 0 : index
    %17 = vector.load %arg4[%c0_7, %c0_8] : memref<16x32xf32, #tpu.memory_space<vmem>>, vector<16x32xf32>
    tpu.vector_store %arg4[%c0_7, %c0_8], %16 {strides = array<i32>} : memref<16x32xf32, #tpu.memory_space<vmem>>, vector<16x32xf32>,
    return
  }
  func.func @transform_0(%arg0: i32) -> (i32, i32) {
    %c0_i32 = arith.constant 0 : i32
    %c0_i32_0 = arith.constant 0 : i32
    return %arg0, %c0_i32 : i32, i32
  }
  func.func @transform_1(%arg0: i32) -> (i32, i32) {
    %c0_i32 = arith.constant 0 : i32
    %c0_i32_0 = arith.constant 0 : i32
    %c0_i32_1 = arith.constant 0 : i32
    return %c0_i32, %c0_i32_0 : i32, i32
  }
  func.func @transform_2(%arg0: i32) -> (i32, i32) {
    %c0_i32 = arith.constant 0 : i32
    %c0_i32_0 = arith.constant 0 : i32
    %c0_i32_1 = arith.constant 0 : i32
    return %c0_i32, %c0_i32_0 : i32, i32
  }
  func.func @transform_3(%arg0: i32) -> (i32, i32) {
    %c0_i32 = arith.constant 0 : i32
    %c0_i32_0 = arith.constant 0 : i32
    return %arg0, %c0_i32 : i32, i32
  }
}

</mosaic_0001>

<bundles_post_ra>
// kernel: neg.1
= control target key start
LH: loop header
LB: loop body
LE: loop exit
PB: predicated region body
PF: predicated region fallthrough
CT: control target
= control target key end

     0   :  { %s24_s0 = inlined_call_operand.vmem [shape: s32[2], index: 0, kind: input, shape index: {}]   ;;  %s25_s1 = inlined_call_operand.vmem [shape: s32[2], index: 1, kind: output, shape index: {}]  }
   0x1   :  { %v2_v0 = vld [vmem:[%s24_s0] sm:$0x1] }
   0x2   :  { %v5_v1 = vsub.s32 0, %v2_v0 }
   0x4   :  { %7 = vst [vmem:[%s25_s1] sm:$0x1] %v5_v1 }

// kernel: squeeze.10
= control target key start
LH: loop header
LB: loop body
LE: loop exit
PB: predicated region body
PF: predicated region fallthrough
CT: control target
= control target key end

     0   :  { %vm8_vm0 = vcmask 261120   ;;  %s42_s0 = inlined_call_operand.vmem [shape: f32[64], index: 0, kind: input, shape index: {}]   ;;  %s43_s1 = inlined_call_operand.vmem [shape: f32[2,32], index: 1, kind: output, shape index: {}]  }
   0x1   :  { %v5_v0 = vld [vmem:[%s42_s0] sm:$0x1]  ;;  %s25_s0 = smov 96  }
   0x2   :  { %6 = vst [vmem:[#allocation1] sm:$0x1] %v5_v0 }
   0x9   :  { %v10_v1 = vld [vmem:[#allocation1] sm:$0x1]  }
   0xa   :  { %v7_v2 = vld [vmem:[#allocation1] sm:$0x1]   ;;  %11 = vrot.lane.b32.xlu0 %v10_v1, %s25_s0 }
   0xb   :  { %9 = vst.msk [vmem:[#allocation0] sm:$0x1] %vm8_vm0, %v7_v2  }
  0x7c   :  { %v12_v3 = vpop.permute.xlu0 %11  }
  0x7d   :  { %15 = vst.msk [vmem:[#allocation0 + $0x1] sm:$0x1] %vm8_vm0, %v12_v3  }
  0x84   :  { %v20_v4 = vld [vmem:[#allocation0] sm:$0x3] }
  0x85   :  { %23 = vst [vmem:[%s43_s1] sm:$0x3] %v20_v4 }

// kernel: sentence_vae_forward.8
= control target key start
LH: loop header
LB: loop body
LE: loop exit
PB: predicated region body
PF: predicated region fallthrough
CT: control target
= control target key end

     0   :  { %15 = vsyncpa [#allocation3], 0  ;;  %v377_v1 = vmov 0.0   ;;  %vm378_vm0 = vmmov 0   ;;  %s487_s0 = inlined_call_operand.vmem [shape: f32[2,64], index: 0, kind: input, shape index: {}]   ;;  %s488_s1 = inlined_call_operand.vmem [shape: f32[64,16], index: 1, kind: input, shape index: {}]   ;;  %s489_s2 = inlined_call_operand.vmem [shape: f32[1,16], index: 2, kind: input, shape index: {}]   ;;  %s490_s3 = inlined_call_operand.vmem [shape: f32[2,8], index: 3, kind: input, shape index: {}]   ;;  %s491_s4 = inlined_call_operand.vmem [shape: f32[8,64], index: 4, kind: input, shape index: {}]   ;;  %s492_s5 = inlined_call_operand.vmem [shape: f32[1,64], index: 5, kind: input, shape index: {}]   ;;  %s493_s6 = inlined_call_operand.hbm [shape: f32[2,8], index: 6, kind: output, shape index: {0}]   ;;  %s494_s7 = inlined_call_operand.hbm [shape: f32[2,8], index: 7, kind: output, shape index: {1}]   ;;  %s495_s8 = inlined_call_operand.hbm [shape: f32[2,8], index: 8, kind: output, shape index: {2}]   ;;  %s496_s9 = inlined_call_operand.vmem [shape: f32[2,64], index: 9, kind: output, shape index: {3}]  }
   0x1   :  { %v37_v0 = vld [vmem:[%s488_s1 + $0x38] sm:$0xff]  ;;  %281 = vmatprep.subr.mxu0 %v377_v1  ;;  %v36_v2 = vld [vmem:[%s488_s1 + $0x30] sm:$0xff]  ;;  %297 = vmatprep.mubr.msk.f32.mxu0 %vm378_vm0, %v377_v1  ;;  %v35_v3 = vld [vmem:[%s488_s1 + $0x28] sm:$0xff] }
   0x2   :  { %282 = vmatpush3.msra.mxu0 %v37_v0  ;;  %300 = vmatprep.subr.mxu1 %v377_v1 }
   0x3   :  { %283 = vmatprep.subr.mxu0 %v377_v1  ;;  %302 = vmatprep.mubr.msk.f32.mxu1 %vm378_vm0, %v377_v1 }
   0x4   :  { %16 = vsyncpa [#allocation5], 0  ;;  %284 = vmatpush3.msra.mxu0 %v36_v2  ;;  %v34_v4 = vld [vmem:[%s488_s1 + $0x20] sm:$0xff]  ;;  %v33_v5 = vld [vmem:[%s488_s1 + $0x18] sm:$0xff]  ;;  %vm45_vm1 = vcmask 523264   ;;  %vm211_vm2 = vcmask 58368  }
   0x5   :  { %285 = vmatprep.subr.mxu0 %v377_v1  ;;  %v32_v6 = vld [vmem:[%s488_s1 + $0x10] sm:$0xff]  ;;  %v31_v7 = vld [vmem:[%s488_s1 + $0x8] sm:$0xff]  ;;  %v30_v8 = vld [vmem:[%s488_s1] sm:$0xff]  ;;  %vm137_vm3 = vcmask 64512   ;;  %s381_s11 = smov [#allocation2]  }
   0x6   :  { %286 = vmatpush3.msra.mxu0 %v35_v3  ;;  %v29_v9 = vld [vmem:[%s487_s0] sm:$0x3]  ;;  %s379_s0 = smov 120   ;;  %s227_s12 = sshll.u32 %s381_s11, 4  ;;  %s228_s12 = int_to_ptr.vmem [resolvable:$true] %s227_s12 }
   0x7   :  { %287 = vmatprep.subr.mxu0 %v377_v1  ;;  %v266_v10 = vld [vmem:[%s489_s2] ss:$0 sm:$0xff] }
   0x8   :  { %288 = vmatpush3.msra.mxu0 %v34_v4  ;;  %v129_v16 = vld [vmem:[%s491_s4] sm:$0xff]  ;;  %s380_s4 = smov [#allocation4]  }
   0x9   :  { %289 = vmatprep.subr.mxu0 %v377_v1  ;;  %301 = vmatpush3.msra.mxu1 %v129_v16  ;;  %v122_v18 = vld [vmem:[%s490_s3] sm:$0x3]  ;;  %s237_s10 = sshll.u32 %s380_s4, 4  ;;  %s238_s10 = int_to_ptr.vmem [resolvable:$true] %s237_s10 }
   0xa   :  { %290 = vmatpush3.msra.mxu0 %v33_v5  ;;  %s313_s13 = scalar_lea.vmem %s238_s10, 32  ;;  %p318_p1 = scmp.lt.s32.totalorder %s238_s10, %s238_s10 }
   0xb   :  { %291 = vmatprep.subr.mxu0 %v377_v1  ;;  %p314_p0 = scmp.ne.s32.totalorder %s238_s10, %s313_s13  ;;  %p319_p2 = scmp.lt.s32.totalorder %s313_s13, %s313_s13 }
   0xc   :  { %292 = vmatpush3.msra.mxu0 %v32_v6 }
   0xd   :  { %293 = vmatprep.subr.mxu0 %v377_v1  ;;  %p320_p3 = por %p319_p2, %p318_p1 }
   0xe   :  { %294 = vmatpush3.msra.mxu0 %v31_v7 }
   0xf   :  { %295 = vmatprep.subr.mxu0 %v377_v1  ;;  %p321_p4 = pnand %p320_p3, %p314_p0 }
  0x10   :  { %296 = vmatpush3.msra.mxu0 %v30_v8 }
  0x11   :  { %298 = vmatmul.mubr.msk.f32.vlgmr.msra.gmra.mxu0 %vm45_vm1, %v29_v9 }
  0xd1   :  { %v115_v11 = vpop.f32.mrf.mxu0 }
  0xd2   :  { %v116_v12 = vadd.f32 %v266_v10, %v115_v11 }
  0xd3   :  { %v299_v13 = vpop.f32.mrf.mxu0 }
  0xd4   :  { %v119_v14 = vmul.f32 0.5, %v116_v12  ;;  %212 = vst.msk [vmem:[#allocation2] sm:$0x3] %vm211_vm2, %v116_v12 }
  0xd6   :  { %v120_v15 = vmul.f32 1.442695, %v119_v14 }
  0xd8   :  { %311 = vpow2.f32 %v120_v15 }
  0xe5   :  { %v312_v17 = vpop.eup %311 }
  0xe6   :  { %124 = vrot.lane.b32.xlu0 %v312_v17, %s379_s0 }
  0xea   :  { %214 = vrot.lane.b32.xlu0 %v116_v12, %s379_s0 }
 0x158   :  { %v125_v19 = vpop.permute.xlu0 %124 }
 0x159   :  { %v127_v20 = vmul.f32 %v125_v19, %v122_v18 }
 0x15b   :  { %v128_v21 = vadd.f32 %v127_v20, %v116_v12 }
 0x15c   :  { %v215_v22 = vpop.permute.xlu0 %214 }
 0x15d   :  { %217 = vst.msk [vmem:[#allocation4] sm:$0x3] %vm211_vm2, %v215_v22  ;;  %218 = vst.msk [vmem:[#allocation6] sm:$0x3] %vm211_vm2, %v128_v21  ;;  %303 = vmatmul.mubr.msk.f32.vlgmr.msra.gmra.mxu1 %vm137_vm3, %v128_v21 }
 0x15e   :  { %324 = shalt.err (!%p321_p4)
}
 0x15f   :  { %240 = dma.vmem_to_hbm [thread:$0]  %s238_s10, 32, %s494_s7, [#allocation5]  }
 0x160   :  { %s333_s15 = scalar_lea.vmem %s228_s12, 32  ;;  %p338_p6 = scmp.lt.s32.totalorder %s228_s12, %s228_s12 }
 0x161   :  { %p334_p5 = scmp.ne.s32.totalorder %s228_s12, %s333_s15  ;;  %p339_p7 = scmp.lt.s32.totalorder %s333_s15, %s333_s15 }
 0x163   :  { %p340_p8 = por %p339_p7, %p338_p6 }
 0x165   :  { %p341_p9 = pnand %p340_p8, %p334_p5 }
 0x167   :  { %344 = shalt.err (!%p341_p9)
}
 0x168   :  { %230 = dma.vmem_to_hbm [thread:$0]  %s228_s12, 32, %s493_s6, [#allocation3]  }
 0x169   :  { %s382_s18 = smov [#allocation6]  }
 0x16a   :  { %s247_s19 = sshll.u32 %s382_s18, 4  ;;  %s248_s19 = int_to_ptr.vmem [resolvable:$true] %s247_s19 }
 0x16b   :  { %s353_s20 = scalar_lea.vmem %s248_s19, 32  ;;  %p358_p11 = scmp.lt.s32.totalorder %s248_s19, %s248_s19 }
 0x16c   :  { %p354_p10 = scmp.ne.s32.totalorder %s248_s19, %s353_s20  ;;  %p359_p12 = scmp.lt.s32.totalorder %s353_s20, %s353_s20 }
 0x16e   :  { %p360_p13 = por %p359_p12, %p358_p11 }
 0x170   :  { %p361_p0 = pnand %p360_p13, %p354_p10 }
 0x172   :  { %364 = shalt.err (!%p361_p0)
}
 0x173   :  { %250 = dma.vmem_to_hbm [thread:$0]  %s248_s19, 32, %s495_s8, [#allocation5]   ;;  %v268_v23 = vld [vmem:[%s492_s5] ss:$0 sm:$0xff]  ;;  %vm219_vm4 = vcmask 517120  }
 0x21d   :  { %v207_v24 = vpop.f32.mrf.mxu1 }
 0x21e   :  { %v208_v25 = vadd.f32 %v268_v23, %v207_v24 }
 0x21f   :  { %v304_v26 = vpop.f32.mrf.mxu1 }
 0x220   :  { %220 = vst.msk [vmem:[%s496_s9] sm:$0x3] %vm219_vm4, %v208_v25 }
 0x221   :  { %373 = dma.done.wait [#allocation3], 32  }
 0x222   :  { %374 = vsyncadd [#allocation3], 4294967264 }
 0x223   :  { %375 = dma.done.wait [#allocation5], 64  }
 0x224   :  { %376 = vsyncadd [#allocation5], 4294967232 }
 0x225   :  { %264 = vsyncpa [#allocation3], 1 }
 0x226   :  { %265 = vsyncpa [#allocation5], 1 }

// kernel: sentence_vae_forward.7
= control target key start
LH: loop header
LB: loop body
LE: loop exit
PB: predicated region body
PF: predicated region fallthrough
CT: control target
= control target key end

     0   :  { %v1516_v0 = vmov 0.0   ;;  %vm1517_vm0 = vmmov 0   ;;  %v1518_v3 = vmov 0   ;;  %vm67_vm1 = vcmask 130048   ;;  %s1907_s3 = inlined_call_operand.vmem [shape: bf16[128,128], index: 3, kind: input, shape index: {}]   ;;  %s1908_s2 = inlined_call_operand.vmem [shape: bf16[16,128], index: 2, kind: input, shape index: {}]   ;;  %s1909_s0 = inlined_call_operand.vmem [shape: bf16[8,8,16], index: 0, kind: input, shape index: {}]   ;;  %s1910_s5 = inlined_call_operand.vmem [shape: s32[8,1], index: 5, kind: input, shape index: {}]   ;;  %s1911_s1 = inlined_call_operand.vmem [shape: f32[8,128], index: 1, kind: input, shape index: {}]   ;;  %s1912_s4 = inlined_call_operand.vmem [shape: f32[1,128], index: 4, kind: input, shape index: {}]   ;;  %s1913_s6 = inlined_call_operand.vmem [shape: f32[8,128], index: 6, kind: output, shape index: {}]  }
   0x1   :  { %1266 = vmatprep.subr.bf16.mxu1 %v1516_v0  ;;  %v1431_v1 = vld [vmem:[%s1907_s3 + $0x38] sm:$0xff]   ;;  %1282 = vmatprep.mubr.msk.bf16.mxu1 %vm1517_vm0, %v1516_v0  ;;  %v1432_v2 = vld [vmem:[%s1907_s3 + $0x30] sm:$0xff]   ;;  %v1433_v4 = vld [vmem:[%s1908_s2] sm:$0xff]  }
   0x2   :  { %1429 = vset.pattern.permute.xlu0 %v1518_v3  ;;  %1430 = vset.pattern.permute.xlu1 %v1518_v3  ;;  %v1435_v5 = vld [vmem:[%s1909_s0] sm:$0xff]   ;;  %v1436_v6 = vld [vmem:[%s1909_s0 + $0x8] sm:$0xff]   ;;  %v1439_v8 = vld [vmem:[%s1909_s0 + $0x10] sm:$0xff]  }
   0x3   :  { %1267 = vmatpush3.bf16.msra.mxu1 %v1431_v1  ;;  %1256 = vmatprep.subr.bf16.mxu0 %v1433_v4  ;;  %v1434_v7 = vld [vmem:[%s1907_s3 + $0x28] sm:$0xff]   ;;  %v1437_v9 = vld [vmem:[%s1907_s3 + $0x20] sm:$0xff]   ;;  %v1440_v10 = vld [vmem:[%s1909_s0 + $0x18] sm:$0xff]  }
   0x4   :  { %1268 = vmatprep.subr.bf16.mxu1 %v1516_v0  ;;  %1257 = vmatpush3.bf16.msra.mxu0 %v1433_v4  ;;  %v1596_v11 = vld [vmem:[%s1910_s5] sm:$0xff]  ;;  %v1438_v12 = vld [vmem:[%s1907_s3 + $0x18] sm:$0xff]   ;;  %v1441_v15 = vld [vmem:[%s1907_s3 + $0x10] sm:$0xff]  }
   0x5   :  { %1258 = vmatprep.mubr.msk.bf16.mxu0 %vm67_vm1, %v1435_v5  ;;  %1286 = vmatprep.subr.bf16.mxu0 %v1516_v0  ;;  %vm266_vm2 = vcmp.gt.s32.totalorder %v1596_v11, 7  ;;  %vm384_vm3 = vcmp.gt.s32.totalorder %v1596_v11, 6  ;;  %vm738_vm4 = vcmp.gt.s32.totalorder %v1596_v11, 3  ;;  %vm974_vm5 = vcmp.gt.s32.totalorder %v1596_v11, 1  ;;  %v1442_v18 = vld [vmem:[%s1907_s3 + $0x8] sm:$0xff]   ;;  %v1443_v19 = vld [vmem:[%s1907_s3] sm:$0xff]  }
   0x6   :  { %v267_v13 = vsel %vm266_vm2, 1, %v1518_v3  ;;  %v385_v14 = vsel %vm384_vm3, 1, %v1518_v3  ;;  %v739_v16 = vsel %vm738_vm4, 1, %v1518_v3  ;;  %v975_v17 = vsel %vm974_vm5, 1, %v1518_v3  ;;  %v1627_v20 = vld [vmem:[%s1911_s1] sm:$0xff]  ;;  %v1444_v22 = vld [vmem:[%s1907_s3 + $0x38] sm:$0xff]  }
   0x7   :  { %1269 = vmatpush3.bf16.msra.mxu1 %v1432_v2  ;;  %1259 = vmatmul.mubr.msk.bf16.vlgmr.msra.gmra.mxu0 %vm67_vm1, %v1436_v6  ;;  %v159_v21 = vpack.c.bf16 %v1627_v20, %v1627_v20  ;;  %v1445_v23 = vld [vmem:[%s1907_s3 + $0x30] sm:$0xff]   ;;  %v1446_v24 = vld [vmem:[%s1907_s3 + $0x28] sm:$0xff]   ;;  %v1447_v25 = vld [vmem:[%s1907_s3 + $0x20] sm:$0xff]   ;;  %vm502_vm7 = vcmp.gt.s32.totalorder %v1596_v11, 5  ;;  %vm620_vm8 = vcmp.gt.s32.totalorder %v1596_v11, 4  ;;  %vm856_vm9 = vcmp.gt.s32.totalorder %v1596_v11, 2 }
   0x8   :  { %1270 = vmatprep.subr.bf16.mxu1 %v1516_v0  ;;  %1262 = vmatprep.mubr.msk.bf16.mxu0 %vm67_vm1, %v1439_v8  ;;  %v1448_v26 = vld [vmem:[%s1907_s3 + $0x18] sm:$0xff]   ;;  %v1449_v27 = vld [vmem:[%s1907_s3 + $0x10] sm:$0xff]   ;;  %v1450_v28 = vld [vmem:[%s1907_s3 + $0x8] sm:$0xff]   ;;  %v503_v63 = vsel %vm502_vm7, 1, %v1518_v3  ;;  %v621_v2 = vsel %vm620_vm8, 1, %v1518_v3  ;;  %v857_v5 = vsel %vm856_vm9, 1, %v1518_v3 }
   0x9   :  { %269 = vperm.xlu0 %1429, %v267_v13   ;;  %1287 = vmatpush3.bf16.msra.mxu0 %v1444_v22  ;;  %v1451_v29 = vld [vmem:[%s1907_s3] sm:$0xff]   ;;  %v1452_v30 = vld [vmem:[%s1907_s3 + $0x38] sm:$0xff]   ;;  %v1453_v31 = vld [vmem:[%s1907_s3 + $0x30] sm:$0xff]   ;;  %vm1091_vm10 = vcmp.gt.s32.totalorder %v1596_v11, 0 }
   0xa   :  { %1288 = vmatprep.subr.bf16.mxu0 %v1516_v0  ;;  %v1454_v32 = vld [vmem:[%s1907_s3 + $0x28] sm:$0xff]   ;;  %v1682_v33 = vld [vmem:[%s1912_s4] ss:$0 sm:$0xff]  ;;  %v1456_v58 = vld [vmem:[%s1907_s3 + $0x18] sm:$0xff]   ;;  %505 = vperm.xlu1 %1430, %v503_v63   ;;  %v1092_v6 = vsel %vm1091_vm10, 1, %v1518_v3 }
   0xb   :  { %1271 = vmatpush3.bf16.msra.mxu1 %v1434_v7  ;;  %v1455_v57 = vld [vmem:[%s1907_s3 + $0x20] sm:$0xff]   ;;  %v1457_v59 = vld [vmem:[%s1907_s3 + $0x10] sm:$0xff]   ;;  %v1458_v60 = vld [vmem:[%s1907_s3 + $0x8] sm:$0xff]  }
   0xc   :  { %1272 = vmatprep.subr.bf16.mxu1 %v1516_v0  ;;  %v1459_v61 = vld [vmem:[%s1907_s3] sm:$0xff]   ;;  %v1460_v62 = vld [vmem:[%s1907_s3 + $0x38] sm:$0xff]   ;;  %v1461_v1 = vld [vmem:[%s1907_s3 + $0x30] sm:$0xff]  }
   0xd   :  { %387 = vperm.xlu0 %1429, %v385_v14   ;;  %1289 = vmatpush3.bf16.msra.mxu0 %v1445_v23  ;;  %v1462_v4 = vld [vmem:[%s1907_s3 + $0x28] sm:$0xff]   ;;  %v1463_v3 = vld [vmem:[%s1907_s3 + $0x20] sm:$0xff]   ;;  %v1464_v11 = vld [vmem:[%s1907_s3 + $0x18] sm:$0xff]  }
   0xe   :  { %1290 = vmatprep.subr.bf16.mxu0 %v1516_v0  ;;  %623 = vperm.xlu1 %1430, %v621_v2   ;;  %v1469_v22 = vld [vmem:[%s1907_s3 + $0x30] sm:$0xff]   ;;  %v1470_v23 = vld [vmem:[%s1907_s3 + $0x28] sm:$0xff]  }
   0xf   :  { %1273 = vmatpush3.bf16.msra.mxu1 %v1437_v9  ;;  %1263 = vmatmul.mubr.msk.bf16.gmra.mxu0 %vm67_vm1, %v1440_v10 }
  0x10   :  { %1274 = vmatprep.subr.bf16.mxu1 %v1516_v0  ;;  %1302 = vmatprep.mubr.msk.bf16.mxu0 %vm1517_vm0, %v1516_v0 }
  0x11   :  { %741 = vperm.xlu0 %1429, %v739_v16   ;;  %1291 = vmatpush3.bf16.msra.mxu0 %v1446_v24 }
  0x12   :  { %1292 = vmatprep.subr.bf16.mxu0 %v1516_v0  ;;  %859 = vperm.xlu1 %1430, %v857_v5  }
  0x13   :  { %1275 = vmatpush3.bf16.msra.mxu1 %v1438_v12 }
  0x14   :  { %1276 = vmatprep.subr.bf16.mxu1 %v1516_v0 }
  0x15   :  { %977 = vperm.xlu0 %1429, %v975_v17   ;;  %1293 = vmatpush3.bf16.msra.mxu0 %v1447_v25 }
  0x16   :  { %1294 = vmatprep.subr.bf16.mxu0 %v1516_v0  ;;  %1094 = vperm.xlu1 %1430, %v1092_v6  }
  0x17   :  { %1277 = vmatpush3.bf16.msra.mxu1 %v1441_v15 }
  0x18   :  { %1278 = vmatprep.subr.bf16.mxu1 %v1516_v0 }
  0x19   :  { %1295 = vmatpush3.bf16.msra.mxu0 %v1448_v26 }
  0x1a   :  { %1296 = vmatprep.subr.bf16.mxu0 %v1516_v0 }
  0x1b   :  { %1279 = vmatpush3.bf16.msra.mxu1 %v1442_v18  ;;  %v1465_v18 = vld [vmem:[%s1907_s3 + $0x10] sm:$0xff]  }
  0x1c   :  { %1280 = vmatprep.subr.bf16.mxu1 %v1516_v0 }
  0x1d   :  { %1297 = vmatpush3.bf16.msra.mxu0 %v1449_v27 }
  0x1e   :  { %1298 = vmatprep.subr.bf16.mxu0 %v1516_v0 }
  0x1f   :  { %1281 = vmatpush3.bf16.msra.mxu1 %v1443_v19  ;;  %v1466_v19 = vld [vmem:[%s1907_s3 + $0x8] sm:$0xff]  }
  0x20   :  { %1306 = vmatprep.subr.bf16.mxu1 %v1516_v0 }
  0x21   :  { %1299 = vmatpush3.bf16.msra.mxu0 %v1450_v28 }
  0x22   :  { %1283 = vmatmul.mubr.bf16.vlgmr.msra.gmra.mxu1 %v159_v21  ;;  %1300 = vmatprep.subr.bf16.mxu0 %v1516_v0  ;;  %v1468_v21 = vld [vmem:[%s1907_s3 + $0x38] sm:$0xff]  }
  0x23   :  { %1322 = vmatprep.mubr.msk.bf16.mxu1 %vm1517_vm0, %v1516_v0  ;;  %1307 = vmatpush3.bf16.msra.mxu1 %v1452_v30 }
  0x24   :  { %1308 = vmatprep.subr.bf16.mxu1 %v1516_v0 }
  0x25   :  { %1301 = vmatpush3.bf16.msra.mxu0 %v1451_v29 }
  0x26   :  { %1326 = vmatprep.subr.bf16.mxu0 %v1516_v0 }
  0x27   :  { %1309 = vmatpush3.bf16.msra.mxu1 %v1453_v31 }
  0x28   :  { %1310 = vmatprep.subr.bf16.mxu1 %v1516_v0 }
  0x2b   :  { %1311 = vmatpush3.bf16.msra.mxu1 %v1454_v32 }
  0x2c   :  { %1312 = vmatprep.subr.bf16.mxu1 %v1516_v0 }
  0x2f   :  { %1313 = vmatpush3.bf16.msra.mxu1 %v1455_v57  ;;  %v1481_v57 = vld [vmem:[%s1907_s3 + $0x10] sm:$0xff]  }
  0x30   :  { %1314 = vmatprep.subr.bf16.mxu1 %v1516_v0 }
  0x33   :  { %1315 = vmatpush3.bf16.msra.mxu1 %v1456_v58  ;;  %v1482_v58 = vld [vmem:[%s1907_s3 + $0x8] sm:$0xff]  }
  0x34   :  { %1316 = vmatprep.subr.bf16.mxu1 %v1516_v0 }
  0x37   :  { %1317 = vmatpush3.bf16.msra.mxu1 %v1457_v59  ;;  %v1483_v59 = vld [vmem:[%s1907_s3] sm:$0xff]  }
  0x38   :  { %1318 = vmatprep.subr.bf16.mxu1 %v1516_v0 }
  0x3b   :  { %1319 = vmatpush3.bf16.msra.mxu1 %v1458_v60  ;;  %v1484_v60 = vld [vmem:[%s1907_s3 + $0x38] sm:$0xff]  }
  0x3c   :  { %1320 = vmatprep.subr.bf16.mxu1 %v1516_v0 }
  0x3f   :  { %1321 = vmatpush3.bf16.msra.mxu1 %v1459_v61  ;;  %v1485_v61 = vld [vmem:[%s1907_s3 + $0x30] sm:$0xff]  }
  0x40   :  { %1346 = vmatprep.subr.bf16.mxu1 %v1516_v0 }
  0x84   :  { %v270_v53 = vpop.permute.xlu0 %269 }
  0x85   :  { %vm271_vm6 = vcmp.eq.s32.totalorder %v270_v53, 1  ;;  %v506_v30 = vpop.permute.xlu1 %505 }
  0x86   :  { %vm507_vm12 = vcmp.eq.s32.totalorder %v506_v30, 1 }
  0x88   :  { %v388_v14 = vpop.permute.xlu0 %387 }
  0x89   :  { %vm389_vm11 = vcmp.eq.s32.totalorder %v388_v14, 1  ;;  %v1491_v14 = vld [vmem:[%s1907_s3] sm:$0xff]  }
  0x8c   :  { %v742_v6 = vpop.permute.xlu0 %741 }
  0x8d   :  { %vm743_vm14 = vcmp.eq.s32.totalorder %v742_v6, 1 }
  0xc7   :  { %v1260_v34 = vpop.f32.mrf.mxu0 }
  0xc8   :  { %v1685_v35 = vadd.f32 %v1260_v34, %v1682_v33 }
  0xc9   :  { %v114_v36 = vpop.f32.mrf.mxu0 }
  0xca   :  { %v1688_v37 = vadd.f32 %v1682_v33, %v114_v36  ;;  %v1471_v36 = vld [vmem:[%s1907_s3 + $0x20] sm:$0xff]  }
  0xcb   :  { %v1261_v38 = vpop.f32.mrf.mxu0 }
  0xcc   :  { %v1691_v39 = vadd.f32 %v1261_v38, %v1682_v33  ;;  %v1473_v38 = vld [vmem:[%s1907_s3 + $0x10] sm:$0xff]  }
  0xcd   :  { %v117_v40 = vpop.f32.mrf.mxu0 }
  0xce   :  { %v1694_v41 = vadd.f32 %v1682_v33, %v117_v40  ;;  %v1474_v40 = vld [vmem:[%s1907_s3 + $0x8] sm:$0xff]  }
  0xcf   :  { %v1264_v42 = vpop.f32.mrf.mxu0 }
  0xd0   :  { %v139_v43 = vadd.f32 %v1264_v42, %v1682_v33  ;;  %v1475_v42 = vld [vmem:[%s1907_s3] sm:$0xff]  }
  0xd1   :  { %v130_v44 = vpop.f32.mrf.mxu0 }
  0xd2   :  { %v1698_v45 = vadd.f32 %v1682_v33, %v130_v44  ;;  %v1477_v44 = vld [vmem:[%s1907_s3 + $0x30] sm:$0xff]  }
  0xd3   :  { %v1265_v46 = vpop.f32.mrf.mxu0 }
  0xd4   :  { %v142_v47 = vadd.f32 %v1265_v46, %v1682_v33  ;;  %v1478_v46 = vld [vmem:[%s1907_s3 + $0x28] sm:$0xff]  }
  0xd5   :  { %v133_v7 = vpop.f32.mrf.mxu0 }
  0xd6   :  { %v134_v24 = vadd.f32 %v1682_v33, %v133_v7  ;;  %v1472_v33 = vld [vmem:[%s1907_s3 + $0x18] sm:$0xff]  }
  0xe2   :  { %v258_v48 = vpop.f32.mrf.mxu1 }
  0xe3   :  { %v264_v49 = vadd.f32 %v258_v48, %v142_v47 }
  0xe4   :  { %v1284_v50 = vpop.f32.mrf.mxu1 }
  0xe5   :  { %1500 = vtanh.f32 %v264_v49 }
  0xe6   :  { %v261_v51 = vpop.f32.mrf.mxu1 }
  0xe8   :  { %v1285_v52 = vpop.f32.mrf.mxu1 }
  0xe9   :  { %v624_v52 = vpop.permute.xlu1 %623 }
  0xea   :  { %vm625_vm13 = vcmp.eq.s32.totalorder %v624_v52, 1 }
  0xf2   :  { %v1501_v54 = vpop.eup %1500 }
  0xf3   :  { %v272_v55 = vsel %vm271_vm6, %v1501_v54, %v1627_v20  ;;  %v1467_v20 = vld [vmem:[%s1907_s3] sm:$0xff]  }
  0xf4   :  { %v277_v56 = vpack.c.bf16 %v272_v55, %v272_v55 }
  0xf6   :  { %1303 = vmatmul.mubr.bf16.vlgmr.msra.gmra.mxu0 %v277_v56  ;;  %v1479_v56 = vld [vmem:[%s1907_s3 + $0x20] sm:$0xff]  }
  0xf7   :  { %1342 = vmatprep.mubr.msk.bf16.mxu0 %vm1517_vm0, %v1516_v0  ;;  %1327 = vmatpush3.bf16.msra.mxu0 %v1460_v62  ;;  %v1486_v62 = vld [vmem:[%s1907_s3 + $0x28] sm:$0xff]  }
  0xf8   :  { %1328 = vmatprep.subr.bf16.mxu0 %v1516_v0 }
  0xfb   :  { %1329 = vmatpush3.bf16.msra.mxu0 %v1461_v1 }
  0xfc   :  { %1330 = vmatprep.subr.bf16.mxu0 %v1516_v0 }
  0xff   :  { %1331 = vmatpush3.bf16.msra.mxu0 %v1462_v4 }
 0x100   :  { %1332 = vmatprep.subr.bf16.mxu0 %v1516_v0 }
 0x103   :  { %1333 = vmatpush3.bf16.msra.mxu0 %v1463_v3 }
 0x104   :  { %1334 = vmatprep.subr.bf16.mxu0 %v1516_v0 }
 0x107   :  { %1335 = vmatpush3.bf16.msra.mxu0 %v1464_v11 }
 0x108   :  { %1336 = vmatprep.subr.bf16.mxu0 %v1516_v0 }
 0x10b   :  { %1337 = vmatpush3.bf16.msra.mxu0 %v1465_v18 }
 0x10c   :  { %1338 = vmatprep.subr.bf16.mxu0 %v1516_v0 }
 0x10f   :  { %1339 = vmatpush3.bf16.msra.mxu0 %v1466_v19 }
 0x110   :  { %1340 = vmatprep.subr.bf16.mxu0 %v1516_v0 }
 0x113   :  { %1341 = vmatpush3.bf16.msra.mxu0 %v1467_v20 }
 0x114   :  { %1366 = vmatprep.subr.bf16.mxu0 %v1516_v0 }
 0x1b6   :  { %v376_v8 = vpop.f32.mrf.mxu0 }
 0x1b7   :  { %v382_v9 = vadd.f32 %v376_v8, %v139_v43  ;;  %v1476_v43 = vld [vmem:[%s1907_s3 + $0x38] sm:$0xff]  }
 0x1b8   :  { %v1304_v10 = vpop.f32.mrf.mxu0 }
 0x1b9   :  { %1502 = vtanh.f32 %v382_v9  ;;  %v1487_v10 = vld [vmem:[%s1907_s3 + $0x20] sm:$0xff]  }
 0x1ba   :  { %v379_v12 = vpop.f32.mrf.mxu0 }
 0x1bb   :  { %v1489_v12 = vld [vmem:[%s1907_s3 + $0x10] sm:$0xff]  }
 0x1bc   :  { %v1305_v13 = vpop.f32.mrf.mxu0 }
 0x1bd   :  { %v1490_v13 = vld [vmem:[%s1907_s3 + $0x8] sm:$0xff]  }
 0x1c6   :  { %v1503_v15 = vpop.eup %1502 }
 0x1c7   :  { %v390_v16 = vsel %vm389_vm11, %v1503_v15, %v272_v55  ;;  %v1492_v15 = vld [vmem:[%s1907_s3 + $0x38] sm:$0xff]  }
 0x1c8   :  { %v395_v17 = vpack.c.bf16 %v390_v16, %v390_v16 }
 0x1ca   :  { %1323 = vmatmul.mubr.bf16.vlgmr.msra.gmra.mxu1 %v395_v17  ;;  %v1494_v17 = vld [vmem:[%s1907_s3 + $0x28] sm:$0xff]  }
 0x1cb   :  { %1362 = vmatprep.mubr.msk.bf16.mxu1 %vm1517_vm0, %v1516_v0  ;;  %1347 = vmatpush3.bf16.msra.mxu1 %v1468_v21  ;;  %v860_v21 = vpop.permute.xlu1 %859 }
 0x1cc   :  { %1348 = vmatprep.subr.bf16.mxu1 %v1516_v0  ;;  %vm861_vm15 = vcmp.eq.s32.totalorder %v860_v21, 1 }
 0x1cf   :  { %1349 = vmatpush3.bf16.msra.mxu1 %v1469_v22 }
 0x1d0   :  { %1350 = vmatprep.subr.bf16.mxu1 %v1516_v0 }
 0x1d3   :  { %1351 = vmatpush3.bf16.msra.mxu1 %v1470_v23 }
 0x1d4   :  { %1352 = vmatprep.subr.bf16.mxu1 %v1516_v0 }
 0x1d7   :  { %1353 = vmatpush3.bf16.msra.mxu1 %v1471_v36  ;;  %v978_v36 = vpop.permute.xlu0 %977 }
 0x1d8   :  { %1354 = vmatprep.subr.bf16.mxu1 %v1516_v0 }
 0x1db   :  { %1355 = vmatpush3.bf16.msra.mxu1 %v1472_v33 }
 0x1dc   :  { %1356 = vmatprep.subr.bf16.mxu1 %v1516_v0 }
 0x1df   :  { %1357 = vmatpush3.bf16.msra.mxu1 %v1473_v38 }
 0x1e0   :  { %1358 = vmatprep.subr.bf16.mxu1 %v1516_v0 }
 0x1e3   :  { %1359 = vmatpush3.bf16.msra.mxu1 %v1474_v40 }
 0x1e4   :  { %1360 = vmatprep.subr.bf16.mxu1 %v1516_v0 }
 0x1e7   :  { %1361 = vmatpush3.bf16.msra.mxu1 %v1475_v42 }
 0x1e8   :  { %1386 = vmatprep.subr.bf16.mxu1 %v1516_v0 }
 0x28a   :  { %v494_v25 = vpop.f32.mrf.mxu1 }
 0x28b   :  { %v500_v26 = vadd.f32 %v494_v25, %v134_v24  ;;  %v1495_v25 = vld [vmem:[%s1907_s3 + $0x20] sm:$0xff]  }
 0x28c   :  { %v1324_v27 = vpop.f32.mrf.mxu1 }
 0x28d   :  { %1504 = vtanh.f32 %v500_v26  ;;  %v1497_v26 = vld [vmem:[%s1907_s3 + $0x10] sm:$0xff]   ;;  %v1498_v27 = vld [vmem:[%s1907_s3 + $0x8] sm:$0xff]  }
 0x28e   :  { %v497_v28 = vpop.f32.mrf.mxu1 }
 0x28f   :  { %v1499_v28 = vld [vmem:[%s1907_s3] sm:$0xff]  }
 0x290   :  { %v1325_v29 = vpop.f32.mrf.mxu1 }
 0x29a   :  { %v1505_v31 = vpop.eup %1504 }
 0x29b   :  { %v508_v32 = vsel %vm507_vm12, %v1505_v31, %v390_v16  ;;  %v1493_v16 = vld [vmem:[%s1907_s3 + $0x30] sm:$0xff]  }
 0x29c   :  { %v513_v34 = vpack.c.bf16 %v508_v32, %v508_v32 }
 0x29e   :  { %1343 = vmatmul.mubr.bf16.vlgmr.msra.gmra.mxu0 %v513_v34 }
 0x29f   :  { %1382 = vmatprep.mubr.msk.bf16.mxu0 %vm1517_vm0, %v1516_v0  ;;  %1367 = vmatpush3.bf16.msra.mxu0 %v1476_v43 }
 0x2a0   :  { %1368 = vmatprep.subr.bf16.mxu0 %v1516_v0 }
 0x2a3   :  { %1369 = vmatpush3.bf16.msra.mxu0 %v1477_v44 }
 0x2a4   :  { %1370 = vmatprep.subr.bf16.mxu0 %v1516_v0 }
 0x2a7   :  { %1371 = vmatpush3.bf16.msra.mxu0 %v1478_v46 }
 0x2a8   :  { %1372 = vmatprep.subr.bf16.mxu0 %v1516_v0 }
 0x2ab   :  { %1373 = vmatpush3.bf16.msra.mxu0 %v1479_v56 }
 0x2ac   :  { %1374 = vmatprep.subr.bf16.mxu0 %v1516_v0 }
 0x35e   :  { %v612_v47 = vpop.f32.mrf.mxu0 }
 0x35f   :  { %v618_v48 = vadd.f32 %v612_v47, %v1698_v45  ;;  %v1480_v45 = vld [vmem:[%s1907_s3 + $0x18] sm:$0xff]   ;;  %v1095_v47 = vpop.permute.xlu1 %1094 }
 0x360   :  { %v1344_v49 = vpop.f32.mrf.mxu0  ;;  %1375 = vmatpush3.bf16.msra.mxu0 %v1480_v45  ;;  %vm1096_vm1 = vcmp.eq.s32.totalorder %v1095_v47, 1 }
 0x361   :  { %1506 = vtanh.f32 %v618_v48  ;;  %1376 = vmatprep.subr.bf16.mxu0 %v1516_v0 }
 0x362   :  { %v615_v50 = vpop.f32.mrf.mxu0 }
 0x364   :  { %v1345_v51 = vpop.f32.mrf.mxu0  ;;  %1377 = vmatpush3.bf16.msra.mxu0 %v1481_v57 }
 0x365   :  { %1378 = vmatprep.subr.bf16.mxu0 %v1516_v0 }
 0x368   :  { %1379 = vmatpush3.bf16.msra.mxu0 %v1482_v58 }
 0x369   :  { %1380 = vmatprep.subr.bf16.mxu0 %v1516_v0 }
 0x36c   :  { %1381 = vmatpush3.bf16.msra.mxu0 %v1483_v59 }
 0x36d   :  { %1406 = vmatprep.subr.bf16.mxu0 %v1516_v0 }
 0x36e   :  { %v1507_v53 = vpop.eup %1506 }
 0x36f   :  { %v626_v54 = vsel %vm625_vm13, %v1507_v53, %v508_v32 }
 0x370   :  { %v631_v55 = vpack.c.bf16 %v626_v54, %v626_v54 }
 0x372   :  { %1363 = vmatmul.mubr.bf16.vlgmr.msra.gmra.mxu1 %v631_v55 }
 0x373   :  { %1402 = vmatprep.mubr.msk.bf16.mxu1 %vm1517_vm0, %v1516_v0  ;;  %1387 = vmatpush3.bf16.msra.mxu1 %v1484_v60 }
 0x374   :  { %1388 = vmatprep.subr.bf16.mxu1 %v1516_v0 }
 0x377   :  { %1389 = vmatpush3.bf16.msra.mxu1 %v1485_v61 }
 0x378   :  { %1390 = vmatprep.subr.bf16.mxu1 %v1516_v0 }
 0x37b   :  { %1391 = vmatpush3.bf16.msra.mxu1 %v1486_v62 }
 0x37c   :  { %1392 = vmatprep.subr.bf16.mxu1 %v1516_v0 }
 0x37f   :  { %1393 = vmatpush3.bf16.msra.mxu1 %v1487_v10 }
 0x380   :  { %1394 = vmatprep.subr.bf16.mxu1 %v1516_v0 }
 0x432   :  { %v730_v63 = vpop.f32.mrf.mxu1 }
 0x433   :  { %v736_v1 = vadd.f32 %v730_v63, %v1691_v39  ;;  %v1488_v39 = vld [vmem:[%s1907_s3 + $0x18] sm:$0xff]  }
 0x434   :  { %v1364_v2 = vpop.f32.mrf.mxu1  ;;  %1395 = vmatpush3.bf16.msra.mxu1 %v1488_v39 }
 0x435   :  { %1508 = vtanh.f32 %v736_v1  ;;  %1396 = vmatprep.subr.bf16.mxu1 %v1516_v0 }
 0x436   :  { %v733_v4 = vpop.f32.mrf.mxu1 }
 0x438   :  { %v1365_v5 = vpop.f32.mrf.mxu1  ;;  %1397 = vmatpush3.bf16.msra.mxu1 %v1489_v12 }
 0x439   :  { %1398 = vmatprep.subr.bf16.mxu1 %v1516_v0 }
 0x43c   :  { %1399 = vmatpush3.bf16.msra.mxu1 %v1490_v13 }
 0x43d   :  { %1400 = vmatprep.subr.bf16.mxu1 %v1516_v0 }
 0x440   :  { %1401 = vmatpush3.bf16.msra.mxu1 %v1491_v14 }
 0x442   :  { %v1509_v7 = vpop.eup %1508 }
 0x443   :  { %v744_v8 = vsel %vm743_vm14, %v1509_v7, %v626_v54 }
 0x444   :  { %v749_v9 = vpack.c.bf16 %v744_v8, %v744_v8 }
 0x446   :  { %1383 = vmatmul.mubr.bf16.vlgmr.msra.gmra.mxu0 %v749_v9 }
 0x447   :  { %1422 = vmatprep.mubr.msk.bf16.mxu0 %vm1517_vm0, %v1516_v0  ;;  %1407 = vmatpush3.bf16.msra.mxu0 %v1492_v15  ;;  %vm979_vm0 = vcmp.eq.s32.totalorder %v978_v36, 1 }
 0x448   :  { %1408 = vmatprep.subr.bf16.mxu0 %v1516_v0 }
 0x44b   :  { %1409 = vmatpush3.bf16.msra.mxu0 %v1493_v16 }
 0x44c   :  { %1410 = vmatprep.subr.bf16.mxu0 %v1516_v0 }
 0x44f   :  { %1411 = vmatpush3.bf16.msra.mxu0 %v1494_v17 }
 0x450   :  { %1412 = vmatprep.subr.bf16.mxu0 %v1516_v0 }
 0x453   :  { %1413 = vmatpush3.bf16.msra.mxu0 %v1495_v25 }
 0x454   :  { %1414 = vmatprep.subr.bf16.mxu0 %v1516_v0 }
 0x506   :  { %v848_v3 = vpop.f32.mrf.mxu0 }
 0x507   :  { %v854_v11 = vadd.f32 %v848_v3, %v1685_v35  ;;  %v1496_v35 = vld [vmem:[%s1907_s3 + $0x18] sm:$0xff]  }
 0x508   :  { %v1384_v18 = vpop.f32.mrf.mxu0  ;;  %1415 = vmatpush3.bf16.msra.mxu0 %v1496_v35 }
 0x509   :  { %1510 = vtanh.f32 %v854_v11  ;;  %1416 = vmatprep.subr.bf16.mxu0 %v1516_v0 }
 0x50a   :  { %v851_v19 = vpop.f32.mrf.mxu0 }
 0x50c   :  { %v1385_v20 = vpop.f32.mrf.mxu0  ;;  %1417 = vmatpush3.bf16.msra.mxu0 %v1497_v26 }
 0x50d   :  { %1418 = vmatprep.subr.bf16.mxu0 %v1516_v0 }
 0x510   :  { %1419 = vmatpush3.bf16.msra.mxu0 %v1498_v27 }
 0x511   :  { %1420 = vmatprep.subr.bf16.mxu0 %v1516_v0 }
 0x514   :  { %1421 = vmatpush3.bf16.msra.mxu0 %v1499_v28 }
 0x516   :  { %v1511_v22 = vpop.eup %1510 }
 0x517   :  { %v862_v23 = vsel %vm861_vm15, %v1511_v22, %v744_v8 }
 0x518   :  { %v867_v24 = vpack.c.bf16 %v862_v23, %v862_v23 }
 0x51a   :  { %1403 = vmatmul.mubr.bf16.vlgmr.msra.gmra.mxu1 %v867_v24 }
 0x5da   :  { %v966_v29 = vpop.f32.mrf.mxu1 }
 0x5db   :  { %v972_v30 = vadd.f32 %v966_v29, %v1694_v41 }
 0x5dc   :  { %v1404_v31 = vpop.f32.mrf.mxu1 }
 0x5dd   :  { %1512 = vtanh.f32 %v972_v30 }
 0x5de   :  { %v969_v32 = vpop.f32.mrf.mxu1 }
 0x5e0   :  { %v1405_v34 = vpop.f32.mrf.mxu1 }
 0x5ea   :  { %v1513_v33 = vpop.eup %1512 }
 0x5eb   :  { %v980_v38 = vsel %vm979_vm0, %v1513_v33, %v862_v23 }
 0x5ec   :  { %v984_v40 = vpack.c.bf16 %v980_v38, %v980_v38 }
 0x5ee   :  { %1423 = vmatmul.mubr.bf16.vlgmr.msra.gmra.mxu0 %v984_v40 }
 0x6ae   :  { %v1083_v42 = vpop.f32.mrf.mxu0 }
 0x6af   :  { %v1089_v43 = vadd.f32 %v1083_v42, %v1688_v37 }
 0x6b0   :  { %v1424_v44 = vpop.f32.mrf.mxu0 }
 0x6b1   :  { %1514 = vtanh.f32 %v1089_v43 }
 0x6b2   :  { %v1086_v0 = vpop.f32.mrf.mxu0 }
 0x6b4   :  { %v1425_v46 = vpop.f32.mrf.mxu0 }
 0x6be   :  { %v1515_v48 = vpop.eup %1514 }
 0x6bf   :  { %v1097_v41 = vsel %vm1096_vm1, %v1515_v48, %v980_v38 }
 0x6c0   :  { %1100 = vst [vmem:[%s1913_s6] sm:$0xff] %v1097_v41 }

// kernel: sentence_vae_forward.6
= control target key start
LH: loop header
LB: loop body
LE: loop exit
PB: predicated region body
PF: predicated region fallthrough
CT: control target
= control target key end

     0   :  { %v1516_v0 = vmov 0.0   ;;  %vm1517_vm0 = vmmov 0   ;;  %v1518_v2 = vmov 0   ;;  %vm67_vm1 = vcmask 130048   ;;  %s1905_s3 = inlined_call_operand.vmem [shape: bf16[128,128], index: 3, kind: input, shape index: {}]   ;;  %s1906_s2 = inlined_call_operand.vmem [shape: bf16[16,128], index: 2, kind: input, shape index: {}]   ;;  %s1907_s0 = inlined_call_operand.vmem [shape: bf16[8,8,16], index: 0, kind: input, shape index: {}]   ;;  %s1908_s5 = inlined_call_operand.vmem [shape: s32[8,1], index: 5, kind: input, shape index: {}]   ;;  %s1909_s1 = inlined_call_operand.vmem [shape: f32[8,128], index: 1, kind: input, shape index: {}]   ;;  %s1910_s4 = inlined_call_operand.vmem [shape: f32[1,128], index: 4, kind: input, shape index: {}]   ;;  %s1911_s6 = inlined_call_operand.vmem [shape: f32[8,128], index: 6, kind: output, shape index: {}]  }
   0x1   :  { %1266 = vmatprep.subr.bf16.mxu1 %v1516_v0  ;;  %v1431_v1 = vld [vmem:[%s1905_s3 + $0x38] sm:$0xff]   ;;  %1282 = vmatprep.mubr.msk.bf16.mxu1 %vm1517_vm0, %v1516_v0  ;;  %v1432_v3 = vld [vmem:[%s1905_s3 + $0x30] sm:$0xff]   ;;  %v1433_v4 = vld [vmem:[%s1905_s3 + $0x28] sm:$0xff]  }
   0x2   :  { %1429 = vset.pattern.permute.xlu0 %v1518_v2  ;;  %1430 = vset.pattern.permute.xlu1 %v1518_v2  ;;  %v1436_v5 = vld [vmem:[%s1906_s2] sm:$0xff]   ;;  %v1439_v7 = vld [vmem:[%s1907_s0 + $0x8] sm:$0xff]   ;;  %v1442_v10 = vld [vmem:[%s1905_s3 + $0x38] sm:$0xff]  }
   0x3   :  { %1267 = vmatpush3.bf16.msra.mxu1 %v1431_v1  ;;  %v1437_v6 = vld [vmem:[%s1907_s0] sm:$0xff]   ;;  %1256 = vmatprep.subr.bf16.mxu0 %v1436_v5  ;;  %v1435_v11 = vld [vmem:[%s1905_s3 + $0x18] sm:$0xff]   ;;  %v1438_v16 = vld [vmem:[%s1905_s3 + $0x10] sm:$0xff]  }
   0x4   :  { %1268 = vmatprep.subr.bf16.mxu1 %v1516_v0  ;;  %1257 = vmatpush3.bf16.msra.mxu0 %v1436_v5  ;;  %v1434_v8 = vld [vmem:[%s1905_s3 + $0x20] sm:$0xff]   ;;  %v1440_v17 = vld [vmem:[%s1905_s3 + $0x8] sm:$0xff]   ;;  %v1443_v21 = vld [vmem:[%s1905_s3 + $0x30] sm:$0xff]  }
   0x5   :  { %1258 = vmatprep.mubr.msk.bf16.mxu0 %vm67_vm1, %v1437_v6  ;;  %1286 = vmatprep.subr.bf16.mxu0 %v1516_v0  ;;  %v1589_v9 = vld [vmem:[%s1908_s5] sm:$0xff]  ;;  %v1444_v22 = vld [vmem:[%s1905_s3 + $0x28] sm:$0xff]   ;;  %v1446_v24 = vld [vmem:[%s1907_s0 + $0x10] sm:$0xff]  }
   0x6   :  { %vm265_vm2 = vcmp.gt.s32.totalorder %v1589_v9, 0  ;;  %vm383_vm3 = vcmp.gt.s32.totalorder %v1589_v9, 1  ;;  %vm737_vm4 = vcmp.gt.s32.totalorder %v1589_v9, 4  ;;  %vm973_vm5 = vcmp.gt.s32.totalorder %v1589_v9, 6  ;;  %v1441_v18 = vld [vmem:[%s1905_s3] sm:$0xff]   ;;  %v1447_v25 = vld [vmem:[%s1905_s3 + $0x18] sm:$0xff]  }
   0x7   :  { %1269 = vmatpush3.bf16.msra.mxu1 %v1432_v3  ;;  %1259 = vmatmul.mubr.msk.bf16.vlgmr.msra.gmra.mxu0 %vm67_vm1, %v1439_v7  ;;  %v266_v12 = vsel %vm265_vm2, 1, %v1518_v2  ;;  %v384_v13 = vsel %vm383_vm3, 1, %v1518_v2  ;;  %v738_v14 = vsel %vm737_vm4, 1, %v1518_v2  ;;  %v974_v15 = vsel %vm973_vm5, 1, %v1518_v2  ;;  %v153_v19 = vld [vmem:[%s1909_s1] sm:$0xff]  ;;  %v1448_v26 = vld [vmem:[%s1907_s0 + $0x18] sm:$0xff]  }
   0x8   :  { %1270 = vmatprep.subr.bf16.mxu1 %v1516_v0  ;;  %268 = vperm.xlu0 %1429, %v266_v12   ;;  %v158_v20 = vpack.c.bf16 %v153_v19, %v153_v19  ;;  %v1445_v23 = vld [vmem:[%s1905_s3 + $0x20] sm:$0xff]   ;;  %v1449_v27 = vld [vmem:[%s1905_s3 + $0x10] sm:$0xff]   ;;  %v1450_v28 = vld [vmem:[%s1905_s3 + $0x8] sm:$0xff]   ;;  %vm501_vm7 = vcmp.gt.s32.totalorder %v1589_v9, 2  ;;  %vm619_vm8 = vcmp.gt.s32.totalorder %v1589_v9, 3  ;;  %vm855_vm9 = vcmp.gt.s32.totalorder %v1589_v9, 5 }
   0x9   :  { %1287 = vmatpush3.bf16.msra.mxu0 %v1442_v10  ;;  %1262 = vmatprep.mubr.msk.bf16.mxu0 %vm67_vm1, %v1446_v24  ;;  %v1451_v29 = vld [vmem:[%s1905_s3] sm:$0xff]   ;;  %v1452_v30 = vld [vmem:[%s1905_s3 + $0x38] sm:$0xff]   ;;  %v1453_v31 = vld [vmem:[%s1905_s3 + $0x30] sm:$0xff]   ;;  %v502_v52 = vsel %vm501_vm7, 1, %v1518_v2  ;;  %v620_v54 = vsel %vm619_vm8, 1, %v1518_v2  ;;  %v856_v56 = vsel %vm855_vm9, 1, %v1518_v2 }
   0xa   :  { %1288 = vmatprep.subr.bf16.mxu0 %v1516_v0  ;;  %v1454_v32 = vld [vmem:[%s1905_s3 + $0x28] sm:$0xff]   ;;  %v1680_v34 = vld [vmem:[%s1910_s4] ss:$0 sm:$0xff]  ;;  %v1456_v47 = vld [vmem:[%s1905_s3 + $0x18] sm:$0xff]   ;;  %504 = vperm.xlu1 %1430, %v502_v52   ;;  %vm1091_vm10 = vcmp.gt.s32.totalorder %v1589_v9, 7 }
   0xb   :  { %1271 = vmatpush3.bf16.msra.mxu1 %v1433_v4  ;;  %v1455_v46 = vld [vmem:[%s1905_s3 + $0x20] sm:$0xff]   ;;  %v1457_v48 = vld [vmem:[%s1905_s3 + $0x10] sm:$0xff]   ;;  %v1458_v49 = vld [vmem:[%s1905_s3 + $0x8] sm:$0xff]   ;;  %v1092_v57 = vsel %vm1091_vm10, 1, %v1518_v2 }
   0xc   :  { %1272 = vmatprep.subr.bf16.mxu1 %v1516_v0  ;;  %386 = vperm.xlu0 %1429, %v384_v13   ;;  %v1459_v50 = vld [vmem:[%s1905_s3] sm:$0xff]   ;;  %v1460_v51 = vld [vmem:[%s1905_s3 + $0x38] sm:$0xff]   ;;  %v1461_v53 = vld [vmem:[%s1905_s3 + $0x30] sm:$0xff]  }
   0xd   :  { %1289 = vmatpush3.bf16.msra.mxu0 %v1443_v21  ;;  %v1462_v55 = vld [vmem:[%s1905_s3 + $0x28] sm:$0xff]   ;;  %v1464_v12 = vld [vmem:[%s1905_s3 + $0x18] sm:$0xff]   ;;  %v1465_v13 = vld [vmem:[%s1905_s3 + $0x10] sm:$0xff]  }
   0xe   :  { %1290 = vmatprep.subr.bf16.mxu0 %v1516_v0  ;;  %622 = vperm.xlu1 %1430, %v620_v54   ;;  %v1483_v52 = vld [vmem:[%s1905_s3] sm:$0xff]   ;;  %v1485_v54 = vld [vmem:[%s1905_s3 + $0x30] sm:$0xff]  }
   0xf   :  { %1273 = vmatpush3.bf16.msra.mxu1 %v1434_v8  ;;  %1263 = vmatmul.mubr.msk.bf16.gmra.mxu0 %vm67_vm1, %v1448_v26 }
  0x10   :  { %1274 = vmatprep.subr.bf16.mxu1 %v1516_v0  ;;  %740 = vperm.xlu0 %1429, %v738_v14   ;;  %v1466_v14 = vld [vmem:[%s1905_s3 + $0x8] sm:$0xff]  }
  0x11   :  { %1291 = vmatpush3.bf16.msra.mxu0 %v1444_v22  ;;  %1302 = vmatprep.mubr.msk.bf16.mxu0 %vm1517_vm0, %v1516_v0 }
  0x12   :  { %1292 = vmatprep.subr.bf16.mxu0 %v1516_v0  ;;  %858 = vperm.xlu1 %1430, %v856_v56  }
  0x13   :  { %1275 = vmatpush3.bf16.msra.mxu1 %v1435_v11  ;;  %v1463_v11 = vld [vmem:[%s1905_s3 + $0x20] sm:$0xff]  }
  0x14   :  { %1276 = vmatprep.subr.bf16.mxu1 %v1516_v0  ;;  %976 = vperm.xlu0 %1429, %v974_v15   ;;  %v1467_v15 = vld [vmem:[%s1905_s3] sm:$0xff]  }
  0x15   :  { %1293 = vmatpush3.bf16.msra.mxu0 %v1445_v23 }
  0x16   :  { %1294 = vmatprep.subr.bf16.mxu0 %v1516_v0  ;;  %1094 = vperm.xlu1 %1430, %v1092_v57  }
  0x17   :  { %1277 = vmatpush3.bf16.msra.mxu1 %v1438_v16  ;;  %v1468_v16 = vld [vmem:[%s1905_s3 + $0x38] sm:$0xff]  }
  0x18   :  { %1278 = vmatprep.subr.bf16.mxu1 %v1516_v0 }
  0x19   :  { %1295 = vmatpush3.bf16.msra.mxu0 %v1447_v25 }
  0x1a   :  { %1296 = vmatprep.subr.bf16.mxu0 %v1516_v0 }
  0x1b   :  { %1279 = vmatpush3.bf16.msra.mxu1 %v1440_v17  ;;  %v1469_v17 = vld [vmem:[%s1905_s3 + $0x30] sm:$0xff]  }
  0x1c   :  { %1280 = vmatprep.subr.bf16.mxu1 %v1516_v0 }
  0x1d   :  { %1297 = vmatpush3.bf16.msra.mxu0 %v1449_v27 }
  0x1e   :  { %1298 = vmatprep.subr.bf16.mxu0 %v1516_v0 }
  0x1f   :  { %1281 = vmatpush3.bf16.msra.mxu1 %v1441_v18  ;;  %v1470_v18 = vld [vmem:[%s1905_s3 + $0x28] sm:$0xff]  }
  0x20   :  { %1306 = vmatprep.subr.bf16.mxu1 %v1516_v0 }
  0x21   :  { %1299 = vmatpush3.bf16.msra.mxu0 %v1450_v28 }
  0x22   :  { %1283 = vmatmul.mubr.bf16.vlgmr.msra.gmra.mxu1 %v158_v20  ;;  %1300 = vmatprep.subr.bf16.mxu0 %v1516_v0 }
  0x23   :  { %1322 = vmatprep.mubr.msk.bf16.mxu1 %vm1517_vm0, %v1516_v0  ;;  %1307 = vmatpush3.bf16.msra.mxu1 %v1452_v30  ;;  %v1472_v30 = vld [vmem:[%s1905_s3 + $0x18] sm:$0xff]  }
  0x24   :  { %1308 = vmatprep.subr.bf16.mxu1 %v1516_v0 }
  0x25   :  { %1301 = vmatpush3.bf16.msra.mxu0 %v1451_v29  ;;  %v1471_v29 = vld [vmem:[%s1905_s3 + $0x20] sm:$0xff]  }
  0x26   :  { %1326 = vmatprep.subr.bf16.mxu0 %v1516_v0 }
  0x27   :  { %1309 = vmatpush3.bf16.msra.mxu1 %v1453_v31  ;;  %v1473_v31 = vld [vmem:[%s1905_s3 + $0x10] sm:$0xff]  }
  0x28   :  { %1310 = vmatprep.subr.bf16.mxu1 %v1516_v0 }
  0x2b   :  { %1311 = vmatpush3.bf16.msra.mxu1 %v1454_v32  ;;  %v1474_v32 = vld [vmem:[%s1905_s3 + $0x8] sm:$0xff]  }
  0x2c   :  { %1312 = vmatprep.subr.bf16.mxu1 %v1516_v0 }
  0x2f   :  { %1313 = vmatpush3.bf16.msra.mxu1 %v1455_v46 }
  0x30   :  { %1314 = vmatprep.subr.bf16.mxu1 %v1516_v0 }
  0x33   :  { %1315 = vmatpush3.bf16.msra.mxu1 %v1456_v47 }
  0x34   :  { %1316 = vmatprep.subr.bf16.mxu1 %v1516_v0 }
  0x37   :  { %1317 = vmatpush3.bf16.msra.mxu1 %v1457_v48  ;;  %v1479_v48 = vld [vmem:[%s1905_s3 + $0x20] sm:$0xff]  }
  0x38   :  { %1318 = vmatprep.subr.bf16.mxu1 %v1516_v0 }
  0x3b   :  { %1319 = vmatpush3.bf16.msra.mxu1 %v1458_v49  ;;  %v1480_v49 = vld [vmem:[%s1905_s3 + $0x18] sm:$0xff]  }
  0x3c   :  { %1320 = vmatprep.subr.bf16.mxu1 %v1516_v0 }
  0x3f   :  { %1321 = vmatpush3.bf16.msra.mxu1 %v1459_v50  ;;  %v1481_v50 = vld [vmem:[%s1905_s3 + $0x10] sm:$0xff]  }
  0x40   :  { %1346 = vmatprep.subr.bf16.mxu1 %v1516_v0 }
  0x83   :  { %v269_v42 = vpop.permute.xlu0 %268 }
  0x84   :  { %vm270_vm6 = vcmp.eq.s32.totalorder %v269_v42, 1 }
  0x85   :  { %v505_v25 = vpop.permute.xlu1 %504 }
  0x86   :  { %vm506_vm12 = vcmp.eq.s32.totalorder %v505_v25, 1  ;;  %v1497_v25 = vld [vmem:[%s1905_s3 + $0x10] sm:$0xff]  }
  0x87   :  { %v387_v7 = vpop.permute.xlu0 %386 }
  0x88   :  { %vm388_vm11 = vcmp.eq.s32.totalorder %v387_v7, 1  ;;  %v1487_v7 = vld [vmem:[%s1905_s3 + $0x20] sm:$0xff]  }
  0xc7   :  { %v1675_v33 = vpop.f32.mrf.mxu0 }
  0xc9   :  { %v114_v35 = vpop.f32.mrf.mxu0 }
  0xca   :  { %v115_v36 = vadd.f32 %v1680_v34, %v114_v35  ;;  %v1476_v35 = vld [vmem:[%s1905_s3 + $0x38] sm:$0xff]  }
  0xcb   :  { %v1725_v58 = vpop.f32.mrf.mxu0 }
  0xcd   :  { %v117_v59 = vpop.f32.mrf.mxu0 }
  0xce   :  { %v118_v1 = vadd.f32 %v1680_v34, %v117_v59 }
  0xcf   :  { %v1727_v60 = vpop.f32.mrf.mxu0 }
  0xd1   :  { %v1729_v61 = vpop.f32.mrf.mxu0 }
  0xd2   :  { %v131_v56 = vadd.f32 %v1680_v34, %v1729_v61  ;;  %v1488_v61 = vld [vmem:[%s1905_s3 + $0x18] sm:$0xff]  }
  0xd3   :  { %v1731_v62 = vpop.f32.mrf.mxu0 }
  0xd5   :  { %v1733_v63 = vpop.f32.mrf.mxu0 }
  0xe2   :  { %v257_v37 = vpop.f32.mrf.mxu1 }
  0xe3   :  { %v263_v38 = vadd.f32 %v257_v37, %v115_v36  ;;  %v1477_v36 = vld [vmem:[%s1905_s3 + $0x30] sm:$0xff]   ;;  %v1478_v37 = vld [vmem:[%s1905_s3 + $0x28] sm:$0xff]  }
  0xe4   :  { %v1284_v39 = vpop.f32.mrf.mxu1 }
  0xe5   :  { %1500 = vtanh.f32 %v263_v38  ;;  %v126_v38 = vadd.f32 %v1725_v58, %v1680_v34 }
  0xe6   :  { %v260_v40 = vpop.f32.mrf.mxu1 }
  0xe8   :  { %v1285_v41 = vpop.f32.mrf.mxu1 }
  0xf2   :  { %v1501_v43 = vpop.eup %1500 }
  0xf3   :  { %v271_v44 = vsel %vm270_vm6, %v1501_v43, %v153_v19  ;;  %v123_v19 = vadd.f32 %v1675_v33, %v1680_v34  ;;  %v1475_v33 = vld [vmem:[%s1905_s3] sm:$0xff]  }
  0xf4   :  { %v276_v45 = vpack.c.bf16 %v271_v44, %v271_v44 }
  0xf6   :  { %1303 = vmatmul.mubr.bf16.vlgmr.msra.gmra.mxu0 %v276_v45 }
  0xf7   :  { %1342 = vmatprep.mubr.msk.bf16.mxu0 %vm1517_vm0, %v1516_v0  ;;  %1327 = vmatpush3.bf16.msra.mxu0 %v1460_v51  ;;  %v1482_v51 = vld [vmem:[%s1905_s3 + $0x8] sm:$0xff]  }
  0xf8   :  { %1328 = vmatprep.subr.bf16.mxu0 %v1516_v0 }
  0xfb   :  { %1329 = vmatpush3.bf16.msra.mxu0 %v1461_v53  ;;  %v1484_v53 = vld [vmem:[%s1905_s3 + $0x38] sm:$0xff]  }
  0xfc   :  { %1330 = vmatprep.subr.bf16.mxu0 %v1516_v0 }
  0xff   :  { %1331 = vmatpush3.bf16.msra.mxu0 %v1462_v55  ;;  %v1486_v55 = vld [vmem:[%s1905_s3 + $0x28] sm:$0xff]  }
 0x100   :  { %1332 = vmatprep.subr.bf16.mxu0 %v1516_v0 }
 0x103   :  { %1333 = vmatpush3.bf16.msra.mxu0 %v1463_v11  ;;  %v1492_v11 = vld [vmem:[%s1905_s3 + $0x38] sm:$0xff]  }
 0x104   :  { %1334 = vmatprep.subr.bf16.mxu0 %v1516_v0 }
 0x107   :  { %1335 = vmatpush3.bf16.msra.mxu0 %v1464_v12  ;;  %v1493_v12 = vld [vmem:[%s1905_s3 + $0x30] sm:$0xff]  }
 0x108   :  { %1336 = vmatprep.subr.bf16.mxu0 %v1516_v0 }
 0x10b   :  { %1337 = vmatpush3.bf16.msra.mxu0 %v1465_v13  ;;  %v1494_v13 = vld [vmem:[%s1905_s3 + $0x28] sm:$0xff]  }
 0x10c   :  { %1338 = vmatprep.subr.bf16.mxu0 %v1516_v0 }
 0x10f   :  { %1339 = vmatpush3.bf16.msra.mxu0 %v1466_v14  ;;  %v134_v14 = vadd.f32 %v1680_v34, %v1733_v63  ;;  %v1496_v63 = vld [vmem:[%s1905_s3 + $0x18] sm:$0xff]  }
 0x110   :  { %1340 = vmatprep.subr.bf16.mxu0 %v1516_v0 }
 0x113   :  { %1341 = vmatpush3.bf16.msra.mxu0 %v1467_v15 }
 0x114   :  { %1366 = vmatprep.subr.bf16.mxu0 %v1516_v0 }
 0x1b6   :  { %v375_v3 = vpop.f32.mrf.mxu0 }
 0x1b7   :  { %v381_v4 = vadd.f32 %v375_v3, %v118_v1 }
 0x1b8   :  { %v1304_v5 = vpop.f32.mrf.mxu0 }
 0x1b9   :  { %1502 = vtanh.f32 %v381_v4  ;;  %v741_v4 = vpop.permute.xlu0 %740 }
 0x1ba   :  { %v378_v2 = vpop.f32.mrf.mxu0  ;;  %vm742_vm14 = vcmp.eq.s32.totalorder %v741_v4, 1 }
 0x1bc   :  { %v1305_v6 = vpop.f32.mrf.mxu0 }
 0x1c6   :  { %v1503_v8 = vpop.eup %1502 }
 0x1c7   :  { %v389_v9 = vsel %vm388_vm11, %v1503_v8, %v271_v44  ;;  %v623_v44 = vpop.permute.xlu1 %622  ;;  %v1489_v8 = vld [vmem:[%s1905_s3 + $0x10] sm:$0xff]  }
 0x1c8   :  { %v394_v10 = vpack.c.bf16 %v389_v9, %v389_v9  ;;  %vm624_vm13 = vcmp.eq.s32.totalorder %v623_v44, 1 }
 0x1ca   :  { %1323 = vmatmul.mubr.bf16.vlgmr.msra.gmra.mxu1 %v394_v10  ;;  %v1491_v10 = vld [vmem:[%s1905_s3] sm:$0xff]  }
 0x1cb   :  { %1362 = vmatprep.mubr.msk.bf16.mxu1 %vm1517_vm0, %v1516_v0  ;;  %1347 = vmatpush3.bf16.msra.mxu1 %v1468_v16 }
 0x1cc   :  { %1348 = vmatprep.subr.bf16.mxu1 %v1516_v0 }
 0x1cf   :  { %1349 = vmatpush3.bf16.msra.mxu1 %v1469_v17 }
 0x1d0   :  { %1350 = vmatprep.subr.bf16.mxu1 %v1516_v0 }
 0x1d3   :  { %1351 = vmatpush3.bf16.msra.mxu1 %v1470_v18 }
 0x1d4   :  { %1352 = vmatprep.subr.bf16.mxu1 %v1516_v0 }
 0x1d7   :  { %1353 = vmatpush3.bf16.msra.mxu1 %v1471_v29 }
 0x1d8   :  { %1354 = vmatprep.subr.bf16.mxu1 %v1516_v0 }
 0x1db   :  { %1355 = vmatpush3.bf16.msra.mxu1 %v1472_v30 }
 0x1dc   :  { %1356 = vmatprep.subr.bf16.mxu1 %v1516_v0 }
 0x1df   :  { %1357 = vmatpush3.bf16.msra.mxu1 %v1473_v31 }
 0x1e0   :  { %1358 = vmatprep.subr.bf16.mxu1 %v1516_v0 }
 0x1e3   :  { %1359 = vmatpush3.bf16.msra.mxu1 %v1474_v32 }
 0x1e4   :  { %1360 = vmatprep.subr.bf16.mxu1 %v1516_v0 }
 0x1e7   :  { %1361 = vmatpush3.bf16.msra.mxu1 %v1475_v33 }
 0x1e8   :  { %1386 = vmatprep.subr.bf16.mxu1 %v1516_v0 }
 0x28a   :  { %v493_v20 = vpop.f32.mrf.mxu1 }
 0x28b   :  { %v499_v21 = vadd.f32 %v493_v20, %v123_v19  ;;  %v859_v20 = vpop.permute.xlu1 %858 }
 0x28c   :  { %v1324_v22 = vpop.f32.mrf.mxu1  ;;  %vm860_vm15 = vcmp.eq.s32.totalorder %v859_v20, 1 }
 0x28d   :  { %1504 = vtanh.f32 %v499_v21 }
 0x28e   :  { %v496_v23 = vpop.f32.mrf.mxu1 }
 0x290   :  { %v1325_v24 = vpop.f32.mrf.mxu1 }
 0x291   :  { %v1495_v24 = vld [vmem:[%s1905_s3 + $0x20] sm:$0xff]  }
 0x29a   :  { %v1505_v26 = vpop.eup %1504 }
 0x29b   :  { %v507_v27 = vsel %vm506_vm12, %v1505_v26, %v389_v9  ;;  %v1490_v9 = vld [vmem:[%s1905_s3 + $0x8] sm:$0xff]  }
 0x29c   :  { %v512_v28 = vpack.c.bf16 %v507_v27, %v507_v27  ;;  %v1498_v26 = vld [vmem:[%s1905_s3 + $0x8] sm:$0xff]  }
 0x29e   :  { %1343 = vmatmul.mubr.bf16.vlgmr.msra.gmra.mxu0 %v512_v28  ;;  %v139_v28 = vadd.f32 %v1727_v60, %v1680_v34 }
 0x29f   :  { %1382 = vmatprep.mubr.msk.bf16.mxu0 %vm1517_vm0, %v1516_v0  ;;  %1367 = vmatpush3.bf16.msra.mxu0 %v1476_v35  ;;  %v977_v35 = vpop.permute.xlu0 %976 }
 0x2a0   :  { %1368 = vmatprep.subr.bf16.mxu0 %v1516_v0 }
 0x2a3   :  { %1369 = vmatpush3.bf16.msra.mxu0 %v1477_v36 }
 0x2a4   :  { %1370 = vmatprep.subr.bf16.mxu0 %v1516_v0 }
 0x2a7   :  { %1371 = vmatpush3.bf16.msra.mxu0 %v1478_v37 }
 0x2a8   :  { %1372 = vmatprep.subr.bf16.mxu0 %v1516_v0 }
 0x2ab   :  { %1373 = vmatpush3.bf16.msra.mxu0 %v1479_v48 }
 0x2ac   :  { %1374 = vmatprep.subr.bf16.mxu0 %v1516_v0 }
 0x2af   :  { %1375 = vmatpush3.bf16.msra.mxu0 %v1480_v49 }
 0x2b0   :  { %1376 = vmatprep.subr.bf16.mxu0 %v1516_v0 }
 0x2b3   :  { %1377 = vmatpush3.bf16.msra.mxu0 %v1481_v50 }
 0x2b4   :  { %1378 = vmatprep.subr.bf16.mxu0 %v1516_v0 }
 0x2b7   :  { %1379 = vmatpush3.bf16.msra.mxu0 %v1482_v51 }
 0x2b8   :  { %1380 = vmatprep.subr.bf16.mxu0 %v1516_v0 }
 0x2bb   :  { %1381 = vmatpush3.bf16.msra.mxu0 %v1483_v52 }
 0x2bc   :  { %1406 = vmatprep.subr.bf16.mxu0 %v1516_v0 }
 0x35e   :  { %v611_v39 = vpop.f32.mrf.mxu0 }
 0x35f   :  { %v617_v40 = vadd.f32 %v611_v39, %v126_v38  ;;  %v142_v39 = vadd.f32 %v1731_v62, %v1680_v34 }
 0x360   :  { %v1344_v41 = vpop.f32.mrf.mxu0 }
 0x361   :  { %1506 = vtanh.f32 %v617_v40 }
 0x362   :  { %v614_v42 = vpop.f32.mrf.mxu0 }
 0x364   :  { %v1345_v43 = vpop.f32.mrf.mxu0 }
 0x365   :  { %v1095_v43 = vpop.permute.xlu1 %1094 }
 0x366   :  { %vm1096_vm1 = vcmp.eq.s32.totalorder %v1095_v43, 1 }
 0x36e   :  { %v1507_v45 = vpop.eup %1506 }
 0x36f   :  { %v625_v46 = vsel %vm624_vm13, %v1507_v45, %v507_v27  ;;  %v1499_v27 = vld [vmem:[%s1905_s3] sm:$0xff]  }
 0x370   :  { %v630_v47 = vpack.c.bf16 %v625_v46, %v625_v46 }
 0x372   :  { %1363 = vmatmul.mubr.bf16.vlgmr.msra.gmra.mxu1 %v630_v47 }
 0x373   :  { %1402 = vmatprep.mubr.msk.bf16.mxu1 %vm1517_vm0, %v1516_v0  ;;  %1387 = vmatpush3.bf16.msra.mxu1 %v1484_v53 }
 0x374   :  { %1388 = vmatprep.subr.bf16.mxu1 %v1516_v0 }
 0x377   :  { %1389 = vmatpush3.bf16.msra.mxu1 %v1485_v54 }
 0x378   :  { %1390 = vmatprep.subr.bf16.mxu1 %v1516_v0 }
 0x37b   :  { %1391 = vmatpush3.bf16.msra.mxu1 %v1486_v55 }
 0x37c   :  { %1392 = vmatprep.subr.bf16.mxu1 %v1516_v0 }
 0x37f   :  { %1393 = vmatpush3.bf16.msra.mxu1 %v1487_v7 }
 0x380   :  { %1394 = vmatprep.subr.bf16.mxu1 %v1516_v0 }
 0x383   :  { %1395 = vmatpush3.bf16.msra.mxu1 %v1488_v61 }
 0x384   :  { %1396 = vmatprep.subr.bf16.mxu1 %v1516_v0 }
 0x387   :  { %1397 = vmatpush3.bf16.msra.mxu1 %v1489_v8 }
 0x388   :  { %1398 = vmatprep.subr.bf16.mxu1 %v1516_v0 }
 0x38b   :  { %1399 = vmatpush3.bf16.msra.mxu1 %v1490_v9 }
 0x38c   :  { %1400 = vmatprep.subr.bf16.mxu1 %v1516_v0 }
 0x38f   :  { %1401 = vmatpush3.bf16.msra.mxu1 %v1491_v10 }
 0x432   :  { %v729_v57 = vpop.f32.mrf.mxu1 }
 0x433   :  { %v735_v58 = vadd.f32 %v729_v57, %v131_v56 }
 0x434   :  { %v1364_v59 = vpop.f32.mrf.mxu1 }
 0x435   :  { %1508 = vtanh.f32 %v735_v58 }
 0x436   :  { %v732_v1 = vpop.f32.mrf.mxu1 }
 0x438   :  { %v1365_v3 = vpop.f32.mrf.mxu1 }
 0x442   :  { %v1509_v5 = vpop.eup %1508 }
 0x443   :  { %v743_v2 = vsel %vm742_vm14, %v1509_v5, %v625_v46 }
 0x444   :  { %v748_v6 = vpack.c.bf16 %v743_v2, %v743_v2 }
 0x446   :  { %1383 = vmatmul.mubr.bf16.vlgmr.msra.gmra.mxu0 %v748_v6 }
 0x447   :  { %1422 = vmatprep.mubr.msk.bf16.mxu0 %vm1517_vm0, %v1516_v0  ;;  %1407 = vmatpush3.bf16.msra.mxu0 %v1492_v11  ;;  %vm978_vm0 = vcmp.eq.s32.totalorder %v977_v35, 1 }
 0x448   :  { %1408 = vmatprep.subr.bf16.mxu0 %v1516_v0 }
 0x44b   :  { %1409 = vmatpush3.bf16.msra.mxu0 %v1493_v12 }
 0x44c   :  { %1410 = vmatprep.subr.bf16.mxu0 %v1516_v0 }
 0x44f   :  { %1411 = vmatpush3.bf16.msra.mxu0 %v1494_v13 }
 0x450   :  { %1412 = vmatprep.subr.bf16.mxu0 %v1516_v0 }
 0x453   :  { %1413 = vmatpush3.bf16.msra.mxu0 %v1495_v24 }
 0x454   :  { %1414 = vmatprep.subr.bf16.mxu0 %v1516_v0 }
 0x457   :  { %1415 = vmatpush3.bf16.msra.mxu0 %v1496_v63 }
 0x458   :  { %1416 = vmatprep.subr.bf16.mxu0 %v1516_v0 }
 0x45b   :  { %1417 = vmatpush3.bf16.msra.mxu0 %v1497_v25 }
 0x45c   :  { %1418 = vmatprep.subr.bf16.mxu0 %v1516_v0 }
 0x45f   :  { %1419 = vmatpush3.bf16.msra.mxu0 %v1498_v26 }
 0x460   :  { %1420 = vmatprep.subr.bf16.mxu0 %v1516_v0 }
 0x463   :  { %1421 = vmatpush3.bf16.msra.mxu0 %v1499_v27 }
 0x506   :  { %v847_v15 = vpop.f32.mrf.mxu0 }
 0x507   :  { %v853_v16 = vadd.f32 %v847_v15, %v134_v14 }
 0x508   :  { %v1384_v17 = vpop.f32.mrf.mxu0 }
 0x509   :  { %1510 = vtanh.f32 %v853_v16 }
 0x50a   :  { %v850_v18 = vpop.f32.mrf.mxu0 }
 0x50c   :  { %v1385_v19 = vpop.f32.mrf.mxu0 }
 0x516   :  { %v1511_v21 = vpop.eup %1510 }
 0x517   :  { %v861_v22 = vsel %vm860_vm15, %v1511_v21, %v743_v2 }
 0x518   :  { %v866_v23 = vpack.c.bf16 %v861_v22, %v861_v22 }
 0x51a   :  { %1403 = vmatmul.mubr.bf16.vlgmr.msra.gmra.mxu1 %v866_v23 }
 0x5da   :  { %v965_v29 = vpop.f32.mrf.mxu1 }
 0x5db   :  { %v971_v30 = vadd.f32 %v965_v29, %v139_v28 }
 0x5dc   :  { %v1404_v31 = vpop.f32.mrf.mxu1 }
 0x5dd   :  { %1512 = vtanh.f32 %v971_v30 }
 0x5de   :  { %v968_v32 = vpop.f32.mrf.mxu1 }
 0x5e0   :  { %v1405_v33 = vpop.f32.mrf.mxu1 }
 0x5ea   :  { %v1513_v36 = vpop.eup %1512 }
 0x5eb   :  { %v979_v37 = vsel %vm978_vm0, %v1513_v36, %v861_v22 }
 0x5ec   :  { %v984_v38 = vpack.c.bf16 %v979_v37, %v979_v37 }
 0x5ee   :  { %1423 = vmatmul.mubr.bf16.vlgmr.msra.gmra.mxu0 %v984_v38 }
 0x6ae   :  { %v1083_v0 = vpop.f32.mrf.mxu0 }
 0x6af   :  { %v1089_v40 = vadd.f32 %v1083_v0, %v142_v39 }
 0x6b0   :  { %v1424_v41 = vpop.f32.mrf.mxu0 }
 0x6b1   :  { %1514 = vtanh.f32 %v1089_v40 }
 0x6b2   :  { %v1086_v60 = vpop.f32.mrf.mxu0 }
 0x6b4   :  { %v1425_v42 = vpop.f32.mrf.mxu0 }
 0x6be   :  { %v1515_v44 = vpop.eup %1514 }
 0x6bf   :  { %v1097_v45 = vsel %vm1096_vm1, %v1515_v44, %v979_v37 }
 0x6c0   :  { %1100 = vst [vmem:[%s1911_s6] sm:$0xff] %v1097_v45 }

// kernel: sentence_vae_forward.9
= control target key start
LH: loop header
LB: loop body
LE: loop exit
PB: predicated region body
PF: predicated region fallthrough
CT: control target
= control target key end

     0   :  { %v1586_v1 = vmov 0.0   ;;  %vm1587_vm0 = vmmov 0   ;;  %v1588_v4 = vmov 0   ;;  %vm70_vm1 = vcmask 130048   ;;  %s2005_s0 = inlined_call_operand.vmem [shape: bf16[8,8,16], index: 0, kind: input, shape index: {}]   ;;  %s2006_s1 = inlined_call_operand.vmem [shape: f32[8,128], index: 1, kind: input, shape index: {}]   ;;  %s2007_s2 = inlined_call_operand.vmem [shape: bf16[16,128], index: 2, kind: input, shape index: {}]   ;;  %s2008_s3 = inlined_call_operand.vmem [shape: bf16[128,128], index: 3, kind: input, shape index: {}]   ;;  %s2009_s4 = inlined_call_operand.vmem [shape: f32[1,128], index: 4, kind: input, shape index: {}]   ;;  %s2010_s5 = inlined_call_operand.vmem [shape: s32[8,1], index: 5, kind: input, shape index: {}]   ;;  %s2011_s6 = inlined_call_operand.vmem [shape: f32[8,8,128], index: 6, kind: output, shape index: {0}]   ;;  %s2012_s7 = inlined_call_operand.hbm [shape: f32[8,128], index: 7, kind: output, shape index: {1}]  }
   0x1   :  { %v1479_v0 = vld [vmem:[%s2008_s3 + $0x38] sm:$0xff]   ;;  %1313 = vmatprep.subr.bf16.mxu1 %v1586_v1  ;;  %v1480_v2 = vld [vmem:[%s2008_s3 + $0x30] sm:$0xff]   ;;  %1329 = vmatprep.mubr.msk.bf16.mxu1 %vm1587_vm0, %v1586_v1  ;;  %v1481_v3 = vld [vmem:[%s2008_s3 + $0x28] sm:$0xff]  }
   0x2   :  { %1314 = vmatpush3.bf16.msra.mxu1 %v1479_v0  ;;  %1477 = vset.pattern.permute.xlu0 %v1588_v4  ;;  %v1484_v5 = vld [vmem:[%s2007_s2] sm:$0xff]   ;;  %v1487_v7 = vld [vmem:[%s2005_s0 + $0x8] sm:$0xff]   ;;  %v1490_v10 = vld [vmem:[%s2008_s3 + $0x38] sm:$0xff]  }
   0x3   :  { %1315 = vmatprep.subr.bf16.mxu1 %v1586_v1  ;;  %1478 = vset.pattern.permute.xlu1 %v1588_v4  ;;  %v1485_v6 = vld [vmem:[%s2005_s0] sm:$0xff]   ;;  %v1483_v11 = vld [vmem:[%s2008_s3 + $0x18] sm:$0xff]   ;;  %v1486_v16 = vld [vmem:[%s2008_s3 + $0x10] sm:$0xff]  }
   0x4   :  { %1303 = vmatprep.subr.bf16.mxu0 %v1484_v5  ;;  %1305 = vmatprep.mubr.msk.bf16.mxu0 %vm70_vm1, %v1485_v6  ;;  %v1482_v8 = vld [vmem:[%s2008_s3 + $0x20] sm:$0xff]   ;;  %v1488_v17 = vld [vmem:[%s2008_s3 + $0x8] sm:$0xff]  }
   0x5   :  { %1304 = vmatpush3.bf16.msra.mxu0 %v1484_v5  ;;  %v1665_v9 = vld [vmem:[%s2010_s5] sm:$0xff] }
   0x6   :  { %1316 = vmatpush3.bf16.msra.mxu1 %v1480_v2  ;;  %1333 = vmatprep.subr.bf16.mxu0 %v1586_v1  ;;  %vm268_vm2 = vcmp.gt.s32.totalorder %v1665_v9, 0  ;;  %vm388_vm3 = vcmp.gt.s32.totalorder %v1665_v9, 1  ;;  %vm751_vm4 = vcmp.gt.s32.totalorder %v1665_v9, 4  ;;  %vm993_vm5 = vcmp.gt.s32.totalorder %v1665_v9, 6  ;;  %v1489_v18 = vld [vmem:[%s2008_s3] sm:$0xff]  }
   0x7   :  { %1317 = vmatprep.subr.bf16.mxu1 %v1586_v1  ;;  %v269_v12 = vsel %vm268_vm2, 1, %v1588_v4  ;;  %v389_v13 = vsel %vm388_vm3, 1, %v1588_v4  ;;  %v752_v14 = vsel %vm751_vm4, 1, %v1588_v4  ;;  %v994_v15 = vsel %vm993_vm5, 1, %v1588_v4  ;;  %v156_v19 = vld [vmem:[%s2006_s1] sm:$0xff] }
   0x8   :  { %1306 = vmatmul.mubr.msk.bf16.vlgmr.msra.gmra.mxu0 %vm70_vm1, %v1487_v7  ;;  %271 = vperm.xlu0 %1477, %v269_v12   ;;  %v161_v20 = vpack.c.bf16 %v156_v19, %v156_v19 }
   0x9   :  { %1334 = vmatpush3.bf16.msra.mxu0 %v1490_v10 }
   0xa   :  { %1318 = vmatpush3.bf16.msra.mxu1 %v1481_v3  ;;  %1335 = vmatprep.subr.bf16.mxu0 %v1586_v1 }
   0xb   :  { %1319 = vmatprep.subr.bf16.mxu1 %v1586_v1 }
   0xc   :  { %391 = vperm.xlu0 %1477, %v389_v13  }
   0xe   :  { %1320 = vmatpush3.bf16.msra.mxu1 %v1482_v8 }
   0xf   :  { %1321 = vmatprep.subr.bf16.mxu1 %v1586_v1 }
  0x10   :  { %754 = vperm.xlu0 %1477, %v752_v14  }
  0x12   :  { %1322 = vmatpush3.bf16.msra.mxu1 %v1483_v11 }
  0x13   :  { %1323 = vmatprep.subr.bf16.mxu1 %v1586_v1 }
  0x14   :  { %996 = vperm.xlu0 %1477, %v994_v15  }
  0x16   :  { %1324 = vmatpush3.bf16.msra.mxu1 %v1486_v16 }
  0x17   :  { %1325 = vmatprep.subr.bf16.mxu1 %v1586_v1 }
  0x1a   :  { %1326 = vmatpush3.bf16.msra.mxu1 %v1488_v17 }
  0x1b   :  { %1327 = vmatprep.subr.bf16.mxu1 %v1586_v1 }
  0x1e   :  { %1328 = vmatpush3.bf16.msra.mxu1 %v1489_v18 }
  0x1f   :  { %1353 = vmatprep.subr.bf16.mxu1 %v1586_v1 }
  0x21   :  { %1330 = vmatmul.mubr.bf16.vlgmr.msra.gmra.mxu1 %v161_v20 }
  0x22   :  { %1369 = vmatprep.mubr.msk.bf16.mxu1 %vm1587_vm0, %v1586_v1 }
  0x23   :  { %13 = vsyncpa [#allocation5], 0  ;;  %v1491_v21 = vld [vmem:[%s2008_s3 + $0x30] sm:$0xff]   ;;  %v1492_v22 = vld [vmem:[%s2008_s3 + $0x28] sm:$0xff]   ;;  %vm509_vm7 = vcmp.gt.s32.totalorder %v1665_v9, 2  ;;  %vm630_vm8 = vcmp.gt.s32.totalorder %v1665_v9, 3 }
  0x24   :  { %1336 = vmatpush3.bf16.msra.mxu0 %v1491_v21  ;;  %v1493_v23 = vld [vmem:[%s2008_s3 + $0x20] sm:$0xff]   ;;  %v1494_v24 = vld [vmem:[%s2005_s0 + $0x10] sm:$0xff]   ;;  %v1495_v25 = vld [vmem:[%s2008_s3 + $0x18] sm:$0xff]   ;;  %v510_v53 = vsel %vm509_vm7, 1, %v1588_v4  ;;  %v631_v55 = vsel %vm630_vm8, 1, %v1588_v4  ;;  %vm872_vm9 = vcmp.gt.s32.totalorder %v1665_v9, 5 }
  0x25   :  { %1337 = vmatprep.subr.bf16.mxu0 %v1586_v1  ;;  %v1496_v26 = vld [vmem:[%s2005_s0 + $0x18] sm:$0xff]   ;;  %1309 = vmatprep.mubr.msk.bf16.mxu0 %vm70_vm1, %v1494_v24  ;;  %v1497_v27 = vld [vmem:[%s2008_s3 + $0x10] sm:$0xff]   ;;  %v1498_v28 = vld [vmem:[%s2008_s3 + $0x8] sm:$0xff]   ;;  %v873_v57 = vsel %vm872_vm9, 1, %v1588_v4  ;;  %vm1114_vm10 = vcmp.gt.s32.totalorder %v1665_v9, 7 }
  0x26   :  { %1310 = vmatmul.mubr.msk.bf16.gmra.mxu0 %vm70_vm1, %v1496_v26  ;;  %v1499_v29 = vld [vmem:[%s2008_s3] sm:$0xff]   ;;  %v1500_v30 = vld [vmem:[%s2008_s3 + $0x38] sm:$0xff]   ;;  %v1501_v31 = vld [vmem:[%s2008_s3 + $0x30] sm:$0xff]   ;;  %512 = vperm.xlu1 %1478, %v510_v53   ;;  %v1115_v58 = vsel %vm1114_vm10, 1, %v1588_v4 }
  0x27   :  { %1349 = vmatprep.mubr.msk.bf16.mxu0 %vm1587_vm0, %v1586_v1  ;;  %1354 = vmatpush3.bf16.msra.mxu1 %v1500_v30  ;;  %v1502_v32 = vld [vmem:[%s2008_s3 + $0x28] sm:$0xff]   ;;  %v1756_v34 = vld [vmem:[%s2009_s4] ss:$0 sm:$0xff]  ;;  %v1504_v48 = vld [vmem:[%s2008_s3 + $0x18] sm:$0xff]  }
  0x28   :  { %1338 = vmatpush3.bf16.msra.mxu0 %v1492_v22  ;;  %1355 = vmatprep.subr.bf16.mxu1 %v1586_v1  ;;  %v1503_v47 = vld [vmem:[%s2008_s3 + $0x20] sm:$0xff]   ;;  %v1505_v49 = vld [vmem:[%s2008_s3 + $0x10] sm:$0xff]   ;;  %v1506_v50 = vld [vmem:[%s2008_s3 + $0x8] sm:$0xff]  }
  0x29   :  { %1339 = vmatprep.subr.bf16.mxu0 %v1586_v1  ;;  %v1507_v51 = vld [vmem:[%s2008_s3] sm:$0xff]   ;;  %v1508_v52 = vld [vmem:[%s2008_s3 + $0x38] sm:$0xff]   ;;  %v1509_v54 = vld [vmem:[%s2008_s3 + $0x30] sm:$0xff]  }
  0x2a   :  { %633 = vperm.xlu1 %1478, %v631_v55   ;;  %v1510_v56 = vld [vmem:[%s2008_s3 + $0x28] sm:$0xff]   ;;  %v1511_v13 = vld [vmem:[%s2008_s3 + $0x20] sm:$0xff]   ;;  %v1512_v14 = vld [vmem:[%s2008_s3 + $0x18] sm:$0xff]  }
  0x2b   :  { %1356 = vmatpush3.bf16.msra.mxu1 %v1501_v31  ;;  %v1513_v15 = vld [vmem:[%s2008_s3 + $0x10] sm:$0xff]   ;;  %v1514_v16 = vld [vmem:[%s2008_s3 + $0x8] sm:$0xff]   ;;  %v1515_v17 = vld [vmem:[%s2008_s3] sm:$0xff]  }
  0x2c   :  { %1340 = vmatpush3.bf16.msra.mxu0 %v1493_v23  ;;  %1357 = vmatprep.subr.bf16.mxu1 %v1586_v1  ;;  %v1516_v18 = vld [vmem:[%s2008_s3 + $0x38] sm:$0xff]   ;;  %v1518_v20 = vld [vmem:[%s2008_s3 + $0x28] sm:$0xff]  }
  0x2d   :  { %1341 = vmatprep.subr.bf16.mxu0 %v1586_v1  ;;  %v1528_v53 = vld [vmem:[%s2008_s3 + $0x18] sm:$0xff]   ;;  %v1530_v55 = vld [vmem:[%s2008_s3 + $0x8] sm:$0xff]  }
  0x2e   :  { %875 = vperm.xlu1 %1478, %v873_v57   ;;  %v1532_v57 = vld [vmem:[%s2008_s3 + $0x38] sm:$0xff]  }
  0x2f   :  { %1358 = vmatpush3.bf16.msra.mxu1 %v1502_v32  ;;  %v1519_v32 = vld [vmem:[%s2008_s3 + $0x20] sm:$0xff]  }
  0x30   :  { %1342 = vmatpush3.bf16.msra.mxu0 %v1495_v25  ;;  %1359 = vmatprep.subr.bf16.mxu1 %v1586_v1 }
  0x31   :  { %1343 = vmatprep.subr.bf16.mxu0 %v1586_v1 }
  0x32   :  { %1117 = vperm.xlu1 %1478, %v1115_v58   ;;  %v1533_v58 = vld [vmem:[%s2008_s3 + $0x30] sm:$0xff]  }
  0x33   :  { %1360 = vmatpush3.bf16.msra.mxu1 %v1503_v47 }
  0x34   :  { %1344 = vmatpush3.bf16.msra.mxu0 %v1497_v27  ;;  %1361 = vmatprep.subr.bf16.mxu1 %v1586_v1 }
  0x35   :  { %1345 = vmatprep.subr.bf16.mxu0 %v1586_v1 }
  0x37   :  { %1362 = vmatpush3.bf16.msra.mxu1 %v1504_v48 }
  0x38   :  { %1346 = vmatpush3.bf16.msra.mxu0 %v1498_v28  ;;  %1363 = vmatprep.subr.bf16.mxu1 %v1586_v1 }
  0x39   :  { %1347 = vmatprep.subr.bf16.mxu0 %v1586_v1 }
  0x3b   :  { %1364 = vmatpush3.bf16.msra.mxu1 %v1505_v49 }
  0x3c   :  { %1348 = vmatpush3.bf16.msra.mxu0 %v1499_v29  ;;  %1365 = vmatprep.subr.bf16.mxu1 %v1586_v1 }
  0x3d   :  { %1373 = vmatprep.subr.bf16.mxu0 %v1586_v1 }
  0x3f   :  { %1366 = vmatpush3.bf16.msra.mxu1 %v1506_v50 }
  0x40   :  { %1367 = vmatprep.subr.bf16.mxu1 %v1586_v1 }
  0x43   :  { %1368 = vmatpush3.bf16.msra.mxu1 %v1507_v51 }
  0x44   :  { %1393 = vmatprep.subr.bf16.mxu1 %v1586_v1 }
  0x83   :  { %v272_v42 = vpop.permute.xlu0 %271 }
  0x84   :  { %vm273_vm6 = vcmp.eq.s32.totalorder %v272_v42, 1 }
  0x87   :  { %v392_v8 = vpop.permute.xlu0 %391 }
  0x88   :  { %vm393_vm11 = vcmp.eq.s32.totalorder %v392_v8, 1 }
  0xa1   :  { %v513_v27 = vpop.permute.xlu1 %512 }
  0xa2   :  { %vm514_vm12 = vcmp.eq.s32.totalorder %v513_v27, 1 }
  0xa5   :  { %v634_v47 = vpop.permute.xlu1 %633 }
  0xa6   :  { %vm635_vm13 = vcmp.eq.s32.totalorder %v634_v47, 1 }
  0xc8   :  { %v1751_v33 = vpop.f32.mrf.mxu0 }
  0xc9   :  { %v126_v21 = vadd.f32 %v1751_v33, %v1756_v34  ;;  %v1520_v33 = vld [vmem:[%s2008_s3 + $0x18] sm:$0xff]  }
  0xca   :  { %v117_v35 = vpop.f32.mrf.mxu0 }
  0xcb   :  { %v118_v36 = vadd.f32 %v1756_v34, %v117_v35  ;;  %v1521_v35 = vld [vmem:[%s2008_s3 + $0x10] sm:$0xff]  }
  0xcc   :  { %v1804_v59 = vpop.f32.mrf.mxu0 }
  0xce   :  { %v120_v60 = vpop.f32.mrf.mxu0 }
  0xcf   :  { %v121_v2 = vadd.f32 %v1756_v34, %v120_v60 }
  0xe1   :  { %v260_v37 = vpop.f32.mrf.mxu1 }
  0xe2   :  { %v266_v38 = vadd.f32 %v260_v37, %v118_v36  ;;  %v1522_v36 = vld [vmem:[%s2008_s3 + $0x8] sm:$0xff]   ;;  %v1523_v37 = vld [vmem:[%s2008_s3] sm:$0xff]  }
  0xe3   :  { %v1331_v39 = vpop.f32.mrf.mxu1 }
  0xe4   :  { %1548 = vtanh.f32 %v266_v38  ;;  %v1524_v38 = vld [vmem:[%s2008_s3 + $0x38] sm:$0xff]   ;;  %v1525_v39 = vld [vmem:[%s2008_s3 + $0x30] sm:$0xff]  }
  0xe5   :  { %v263_v40 = vpop.f32.mrf.mxu1 }
  0xe6   :  { %v1806_v61 = vpop.f32.mrf.mxu0  ;;  %v1526_v40 = vld [vmem:[%s2008_s3 + $0x28] sm:$0xff]  }
  0xe7   :  { %v1332_v41 = vpop.f32.mrf.mxu1 }
  0xe8   :  { %v1808_v62 = vpop.f32.mrf.mxu0  ;;  %v129_v41 = vadd.f32 %v1804_v59, %v1756_v34  ;;  %v1534_v59 = vld [vmem:[%s2008_s3 + $0x28] sm:$0xff]  }
  0xe9   :  { %v134_v60 = vadd.f32 %v1756_v34, %v1808_v62  ;;  %v1535_v62 = vld [vmem:[%s2008_s3 + $0x20] sm:$0xff]  }
  0xea   :  { %v1810_v63 = vpop.f32.mrf.mxu0 }
  0xec   :  { %v1812_v0 = vpop.f32.mrf.mxu0 }
  0xf1   :  { %v1549_v43 = vpop.eup %1548 }
  0xf2   :  { %v274_v44 = vsel %vm273_vm6, %v1549_v43, %v156_v19  ;;  %v276_v45 = vsel %vm273_vm6, %v1549_v43, 0.0  ;;  %v1517_v19 = vld [vmem:[%s2008_s3 + $0x30] sm:$0xff]  }
  0xf3   :  { %277 = vst [vmem:[%s2011_s6] sm:$0xff] %v276_v45  ;;  %v281_v46 = vpack.c.bf16 %v274_v44, %v274_v44 }
  0xf5   :  { %1350 = vmatmul.mubr.bf16.vlgmr.msra.gmra.mxu0 %v281_v46 }
  0xf6   :  { %1389 = vmatprep.mubr.msk.bf16.mxu0 %vm1587_vm0, %v1586_v1  ;;  %1374 = vmatpush3.bf16.msra.mxu0 %v1508_v52  ;;  %v1527_v52 = vld [vmem:[%s2008_s3 + $0x20] sm:$0xff]  }
  0xf7   :  { %1375 = vmatprep.subr.bf16.mxu0 %v1586_v1 }
  0xfa   :  { %1376 = vmatpush3.bf16.msra.mxu0 %v1509_v54  ;;  %v1529_v54 = vld [vmem:[%s2008_s3 + $0x10] sm:$0xff]  }
  0xfb   :  { %1377 = vmatprep.subr.bf16.mxu0 %v1586_v1 }
  0xfe   :  { %1378 = vmatpush3.bf16.msra.mxu0 %v1510_v56  ;;  %v1531_v56 = vld [vmem:[%s2008_s3] sm:$0xff]  }
  0xff   :  { %1379 = vmatprep.subr.bf16.mxu0 %v1586_v1 }
 0x102   :  { %1380 = vmatpush3.bf16.msra.mxu0 %v1511_v13  ;;  %v1537_v13 = vld [vmem:[%s2008_s3 + $0x10] sm:$0xff]  }
 0x103   :  { %1381 = vmatprep.subr.bf16.mxu0 %v1586_v1 }
 0x106   :  { %1382 = vmatpush3.bf16.msra.mxu0 %v1512_v14  ;;  %v1538_v14 = vld [vmem:[%s2008_s3 + $0x8] sm:$0xff]  }
 0x107   :  { %1383 = vmatprep.subr.bf16.mxu0 %v1586_v1 }
 0x10a   :  { %1384 = vmatpush3.bf16.msra.mxu0 %v1513_v15  ;;  %v1539_v15 = vld [vmem:[%s2008_s3] sm:$0xff]  }
 0x10b   :  { %1385 = vmatprep.subr.bf16.mxu0 %v1586_v1 }
 0x10e   :  { %1386 = vmatpush3.bf16.msra.mxu0 %v1514_v16  ;;  %v1540_v16 = vld [vmem:[%s2008_s3 + $0x38] sm:$0xff]  }
 0x10f   :  { %1387 = vmatprep.subr.bf16.mxu0 %v1586_v1 }
 0x112   :  { %1388 = vmatpush3.bf16.msra.mxu0 %v1515_v17  ;;  %v1541_v17 = vld [vmem:[%s2008_s3 + $0x30] sm:$0xff]  }
 0x113   :  { %1413 = vmatprep.subr.bf16.mxu0 %v1586_v1 }
 0x1b5   :  { %v380_v3 = vpop.f32.mrf.mxu0 }
 0x1b6   :  { %v386_v5 = vadd.f32 %v380_v3, %v121_v2 }
 0x1b7   :  { %v1351_v6 = vpop.f32.mrf.mxu0 }
 0x1b8   :  { %1550 = vtanh.f32 %v386_v5 }
 0x1b9   :  { %v383_v4 = vpop.f32.mrf.mxu0 }
 0x1bb   :  { %v1352_v7 = vpop.f32.mrf.mxu0 }
 0x1bc   :  { %v755_v7 = vpop.permute.xlu0 %754 }
 0x1bd   :  { %vm756_vm14 = vcmp.eq.s32.totalorder %v755_v7, 1 }
 0x1c5   :  { %v1551_v9 = vpop.eup %1550 }
 0x1c6   :  { %v396_v10 = vsel %vm393_vm11, %v1551_v9, 0.0  ;;  %v394_v11 = vsel %vm393_vm11, %v1551_v9, %v274_v44 }
 0x1c7   :  { %1171 = vst [vmem:[%s2011_s6 + $0x8] sm:$0xff] %v396_v10  ;;  %v402_v12 = vpack.c.bf16 %v394_v11, %v394_v11 }
 0x1c9   :  { %1370 = vmatmul.mubr.bf16.vlgmr.msra.gmra.mxu1 %v402_v12  ;;  %v1536_v12 = vld [vmem:[%s2008_s3 + $0x18] sm:$0xff]  }
 0x1ca   :  { %1409 = vmatprep.mubr.msk.bf16.mxu1 %vm1587_vm0, %v1586_v1  ;;  %1394 = vmatpush3.bf16.msra.mxu1 %v1516_v18  ;;  %v1542_v18 = vld [vmem:[%s2008_s3 + $0x28] sm:$0xff]  }
 0x1cb   :  { %1395 = vmatprep.subr.bf16.mxu1 %v1586_v1 }
 0x1ce   :  { %1396 = vmatpush3.bf16.msra.mxu1 %v1517_v19  ;;  %v137_v19 = vadd.f32 %v1756_v34, %v1812_v0  ;;  %v1543_v0 = vld [vmem:[%s2008_s3 + $0x20] sm:$0xff]  }
 0x1cf   :  { %1397 = vmatprep.subr.bf16.mxu1 %v1586_v1 }
 0x1d2   :  { %1398 = vmatpush3.bf16.msra.mxu1 %v1518_v20 }
 0x1d3   :  { %1399 = vmatprep.subr.bf16.mxu1 %v1586_v1 }
 0x1d6   :  { %1400 = vmatpush3.bf16.msra.mxu1 %v1519_v32  ;;  %v1546_v32 = vld [vmem:[%s2008_s3 + $0x8] sm:$0xff]  }
 0x1d7   :  { %1401 = vmatprep.subr.bf16.mxu1 %v1586_v1 }
 0x1da   :  { %1402 = vmatpush3.bf16.msra.mxu1 %v1520_v33  ;;  %v1547_v33 = vld [vmem:[%s2008_s3] sm:$0xff]  }
 0x1db   :  { %1403 = vmatprep.subr.bf16.mxu1 %v1586_v1 }
 0x1de   :  { %1404 = vmatpush3.bf16.msra.mxu1 %v1521_v35  ;;  %v142_v35 = vadd.f32 %v1806_v61, %v1756_v34  ;;  %v145_v61 = vadd.f32 %v1810_v63, %v1756_v34 }
 0x1df   :  { %1405 = vmatprep.subr.bf16.mxu1 %v1586_v1 }
 0x1e2   :  { %1406 = vmatpush3.bf16.msra.mxu1 %v1522_v36 }
 0x1e3   :  { %1407 = vmatprep.subr.bf16.mxu1 %v1586_v1 }
 0x1e6   :  { %1408 = vmatpush3.bf16.msra.mxu1 %v1523_v37 }
 0x1e7   :  { %1433 = vmatprep.subr.bf16.mxu1 %v1586_v1 }
 0x289   :  { %v501_v22 = vpop.f32.mrf.mxu1 }
 0x28a   :  { %v507_v23 = vadd.f32 %v501_v22, %v126_v21 }
 0x28b   :  { %v1371_v24 = vpop.f32.mrf.mxu1 }
 0x28c   :  { %1552 = vtanh.f32 %v507_v23 }
 0x28d   :  { %v504_v25 = vpop.f32.mrf.mxu1 }
 0x28e   :  { %v876_v25 = vpop.permute.xlu1 %875 }
 0x28f   :  { %v1372_v26 = vpop.f32.mrf.mxu1  ;;  %vm877_vm15 = vcmp.eq.s32.totalorder %v876_v25, 1 }
 0x299   :  { %v1553_v28 = vpop.eup %1552 }
 0x29a   :  { %v515_v29 = vsel %vm514_vm12, %v1553_v28, %v394_v11  ;;  %v517_v30 = vsel %vm514_vm12, %v1553_v28, 0.0 }
 0x29b   :  { %1180 = vst [vmem:[%s2011_s6 + $0x10] sm:$0xff] %v517_v30  ;;  %v523_v31 = vpack.c.bf16 %v515_v29, %v515_v29  ;;  %v1544_v30 = vld [vmem:[%s2008_s3 + $0x18] sm:$0xff]  }
 0x29d   :  { %1390 = vmatmul.mubr.bf16.vlgmr.msra.gmra.mxu0 %v523_v31  ;;  %v1545_v31 = vld [vmem:[%s2008_s3 + $0x10] sm:$0xff]   ;;  %s1589_s3 = smov [#allocation4]  }
 0x29e   :  { %1429 = vmatprep.mubr.msk.bf16.mxu0 %vm1587_vm0, %v1586_v1  ;;  %1414 = vmatpush3.bf16.msra.mxu0 %v1524_v38  ;;  %s1135_s19 = sshll.u32 %s1589_s3, 4  ;;  %s1136_s19 = int_to_ptr.vmem [resolvable:$true] %s1135_s19 }
 0x29f   :  { %1415 = vmatprep.subr.bf16.mxu0 %v1586_v1  ;;  %s1564_s21 = scalar_lea.vmem %s1136_s19, 128  ;;  %p1569_p1 = scmp.lt.s32.totalorder %s1136_s19, %s1136_s19 }
 0x2a0   :  { %p1565_p0 = scmp.ne.s32.totalorder %s1136_s19, %s1564_s21  ;;  %p1570_p2 = scmp.lt.s32.totalorder %s1564_s21, %s1564_s21 }
 0x2a2   :  { %1416 = vmatpush3.bf16.msra.mxu0 %v1525_v39  ;;  %p1571_p3 = por %p1570_p2, %p1569_p1 }
 0x2a3   :  { %1417 = vmatprep.subr.bf16.mxu0 %v1586_v1 }
 0x2a4   :  { %p1572_p4 = pnand %p1571_p3, %p1565_p0 }
 0x2a6   :  { %1418 = vmatpush3.bf16.msra.mxu0 %v1526_v40 }
 0x2a7   :  { %1419 = vmatprep.subr.bf16.mxu0 %v1586_v1 }
 0x2aa   :  { %1420 = vmatpush3.bf16.msra.mxu0 %v1527_v52 }
 0x2ab   :  { %1421 = vmatprep.subr.bf16.mxu0 %v1586_v1 }
 0x2ae   :  { %1422 = vmatpush3.bf16.msra.mxu0 %v1528_v53 }
 0x2af   :  { %1423 = vmatprep.subr.bf16.mxu0 %v1586_v1 }
 0x2b2   :  { %1424 = vmatpush3.bf16.msra.mxu0 %v1529_v54 }
 0x2b3   :  { %1425 = vmatprep.subr.bf16.mxu0 %v1586_v1 }
 0x2b6   :  { %1426 = vmatpush3.bf16.msra.mxu0 %v1530_v55 }
 0x2b7   :  { %1427 = vmatprep.subr.bf16.mxu0 %v1586_v1 }
 0x2ba   :  { %1428 = vmatpush3.bf16.msra.mxu0 %v1531_v56 }
 0x2bb   :  { %1453 = vmatprep.subr.bf16.mxu0 %v1586_v1 }
 0x35d   :  { %v622_v42 = vpop.f32.mrf.mxu0 }
 0x35e   :  { %v628_v43 = vadd.f32 %v622_v42, %v129_v41  ;;  %v997_v41 = vpop.permute.xlu0 %996 }
 0x35f   :  { %v1391_v44 = vpop.f32.mrf.mxu0 }
 0x360   :  { %1554 = vtanh.f32 %v628_v43 }
 0x361   :  { %v625_v45 = vpop.f32.mrf.mxu0 }
 0x363   :  { %v1392_v46 = vpop.f32.mrf.mxu0 }
 0x36d   :  { %v1555_v48 = vpop.eup %1554 }
 0x36e   :  { %v638_v49 = vsel %vm635_vm13, %v1555_v48, 0.0  ;;  %v636_v50 = vsel %vm635_vm13, %v1555_v48, %v515_v29 }
 0x36f   :  { %1189 = vst [vmem:[%s2011_s6 + $0x18] sm:$0xff] %v638_v49  ;;  %v644_v51 = vpack.c.bf16 %v636_v50, %v636_v50 }
 0x371   :  { %1410 = vmatmul.mubr.bf16.vlgmr.msra.gmra.mxu1 %v644_v51 }
 0x372   :  { %1449 = vmatprep.mubr.msk.bf16.mxu1 %vm1587_vm0, %v1586_v1  ;;  %1434 = vmatpush3.bf16.msra.mxu1 %v1532_v57 }
 0x373   :  { %1435 = vmatprep.subr.bf16.mxu1 %v1586_v1 }
 0x376   :  { %1436 = vmatpush3.bf16.msra.mxu1 %v1533_v58 }
 0x377   :  { %1437 = vmatprep.subr.bf16.mxu1 %v1586_v1 }
 0x37a   :  { %1438 = vmatpush3.bf16.msra.mxu1 %v1534_v59 }
 0x37b   :  { %1439 = vmatprep.subr.bf16.mxu1 %v1586_v1 }
 0x37e   :  { %1440 = vmatpush3.bf16.msra.mxu1 %v1535_v62 }
 0x37f   :  { %1441 = vmatprep.subr.bf16.mxu1 %v1586_v1 }
 0x382   :  { %1442 = vmatpush3.bf16.msra.mxu1 %v1536_v12 }
 0x383   :  { %1443 = vmatprep.subr.bf16.mxu1 %v1586_v1 }
 0x386   :  { %1444 = vmatpush3.bf16.msra.mxu1 %v1537_v13 }
 0x387   :  { %1445 = vmatprep.subr.bf16.mxu1 %v1586_v1 }
 0x38a   :  { %1446 = vmatpush3.bf16.msra.mxu1 %v1538_v14 }
 0x38b   :  { %1447 = vmatprep.subr.bf16.mxu1 %v1586_v1 }
 0x38e   :  { %1448 = vmatpush3.bf16.msra.mxu1 %v1539_v15 }
 0x431   :  { %v743_v2 = vpop.f32.mrf.mxu1 }
 0x432   :  { %v749_v3 = vadd.f32 %v743_v2, %v134_v60 }
 0x433   :  { %v1411_v5 = vpop.f32.mrf.mxu1 }
 0x434   :  { %1556 = vtanh.f32 %v749_v3 }
 0x435   :  { %v746_v6 = vpop.f32.mrf.mxu1 }
 0x437   :  { %v1412_v4 = vpop.f32.mrf.mxu1 }
 0x441   :  { %v1557_v8 = vpop.eup %1556 }
 0x442   :  { %v759_v9 = vsel %vm756_vm14, %v1557_v8, 0.0  ;;  %v757_v10 = vsel %vm756_vm14, %v1557_v8, %v636_v50  ;;  %v1118_v50 = vpop.permute.xlu1 %1117 }
 0x443   :  { %1198 = vst [vmem:[%s2011_s6 + $0x20] sm:$0xff] %v759_v9  ;;  %v765_v11 = vpack.c.bf16 %v757_v10, %v757_v10  ;;  %vm1119_vm1 = vcmp.eq.s32.totalorder %v1118_v50, 1 }
 0x445   :  { %1430 = vmatmul.mubr.bf16.vlgmr.msra.gmra.mxu0 %v765_v11 }
 0x446   :  { %1469 = vmatprep.mubr.msk.bf16.mxu0 %vm1587_vm0, %v1586_v1  ;;  %1454 = vmatpush3.bf16.msra.mxu0 %v1540_v16  ;;  %vm998_vm0 = vcmp.eq.s32.totalorder %v997_v41, 1 }
 0x447   :  { %1455 = vmatprep.subr.bf16.mxu0 %v1586_v1 }
 0x44a   :  { %1456 = vmatpush3.bf16.msra.mxu0 %v1541_v17 }
 0x44b   :  { %1457 = vmatprep.subr.bf16.mxu0 %v1586_v1 }
 0x44e   :  { %1458 = vmatpush3.bf16.msra.mxu0 %v1542_v18 }
 0x44f   :  { %1459 = vmatprep.subr.bf16.mxu0 %v1586_v1 }
 0x452   :  { %1460 = vmatpush3.bf16.msra.mxu0 %v1543_v0 }
 0x453   :  { %1461 = vmatprep.subr.bf16.mxu0 %v1586_v1 }
 0x456   :  { %1462 = vmatpush3.bf16.msra.mxu0 %v1544_v30 }
 0x457   :  { %1463 = vmatprep.subr.bf16.mxu0 %v1586_v1 }
 0x45a   :  { %1464 = vmatpush3.bf16.msra.mxu0 %v1545_v31 }
 0x45b   :  { %1465 = vmatprep.subr.bf16.mxu0 %v1586_v1 }
 0x45e   :  { %1466 = vmatpush3.bf16.msra.mxu0 %v1546_v32 }
 0x45f   :  { %1467 = vmatprep.subr.bf16.mxu0 %v1586_v1 }
 0x462   :  { %1468 = vmatpush3.bf16.msra.mxu0 %v1547_v33 }
 0x505   :  { %v864_v20 = vpop.f32.mrf.mxu0 }
 0x506   :  { %v870_v21 = vadd.f32 %v864_v20, %v137_v19 }
 0x507   :  { %v1431_v22 = vpop.f32.mrf.mxu0 }
 0x508   :  { %1558 = vtanh.f32 %v870_v21 }
 0x509   :  { %v867_v23 = vpop.f32.mrf.mxu0 }
 0x50b   :  { %v1432_v24 = vpop.f32.mrf.mxu0 }
 0x515   :  { %v1559_v26 = vpop.eup %1558 }
 0x516   :  { %v880_v27 = vsel %vm877_vm15, %v1559_v26, 0.0  ;;  %v878_v28 = vsel %vm877_vm15, %v1559_v26, %v757_v10 }
 0x517   :  { %1207 = vst [vmem:[%s2011_s6 + $0x28] sm:$0xff] %v880_v27  ;;  %v886_v29 = vpack.c.bf16 %v878_v28, %v878_v28 }
 0x519   :  { %1450 = vmatmul.mubr.bf16.vlgmr.msra.gmra.mxu1 %v886_v29 }
 0x5d9   :  { %v985_v36 = vpop.f32.mrf.mxu1 }
 0x5da   :  { %v991_v37 = vadd.f32 %v985_v36, %v142_v35 }
 0x5db   :  { %v1451_v38 = vpop.f32.mrf.mxu1 }
 0x5dc   :  { %1560 = vtanh.f32 %v991_v37 }
 0x5dd   :  { %v988_v39 = vpop.f32.mrf.mxu1 }
 0x5df   :  { %v1452_v40 = vpop.f32.mrf.mxu1 }
 0x5e9   :  { %v1561_v42 = vpop.eup %1560 }
 0x5ea   :  { %v1001_v43 = vsel %vm998_vm0, %v1561_v42, 0.0  ;;  %v999_v44 = vsel %vm998_vm0, %v1561_v42, %v878_v28 }
 0x5eb   :  { %1216 = vst [vmem:[%s2011_s6 + $0x30] sm:$0xff] %v1001_v43  ;;  %v1007_v1 = vpack.c.bf16 %v999_v44, %v999_v44 }
 0x5ed   :  { %1470 = vmatmul.mubr.bf16.vlgmr.msra.gmra.mxu0 %v1007_v1 }
 0x6ad   :  { %v1106_v45 = vpop.f32.mrf.mxu0 }
 0x6ae   :  { %v1112_v46 = vadd.f32 %v1106_v45, %v145_v61 }
 0x6af   :  { %v1471_v47 = vpop.f32.mrf.mxu0 }
 0x6b0   :  { %1562 = vtanh.f32 %v1112_v46 }
 0x6b1   :  { %v1109_v48 = vpop.f32.mrf.mxu0 }
 0x6b3   :  { %v1472_v49 = vpop.f32.mrf.mxu0 }
 0x6bd   :  { %v1563_v51 = vpop.eup %1562 }
 0x6be   :  { %v1122_v52 = vsel %vm1119_vm1, %v1563_v51, 0.0  ;;  %v1120_v53 = vsel %vm1119_vm1, %v1563_v51, %v999_v44 }
 0x6bf   :  { %1225 = vst [vmem:[%s2011_s6 + $0x38] sm:$0xff] %v1122_v52  ;;  %1126 = vst [vmem:[#allocation4] sm:$0xff] %v1120_v53 }
 0x6c0   :  { %1575 = shalt.err (!%p1572_p4)
}
 0x6c1   :  { %1138 = dma.vmem_to_hbm [thread:$0]  %s1136_s19, 128, %s2012_s7, [#allocation5]  }
 0x6c2   :  { %1584 = dma.done.wait [#allocation5], 128  }
 0x6c3   :  { %1585 = vsyncadd [#allocation5], 4294967168 }
 0x6c4   :  { %1144 = vsyncpa [#allocation5], 1 }

// kernel: sentence_vae_forward.11
= control target key start
LH: loop header
LB: loop body
LE: loop exit
PB: predicated region body
PF: predicated region fallthrough
CT: control target
= control target key end

     0   :  { %v178_v0 = vmov 0.0   ;;  %vm179_vm0 = vmmov 0   ;;  %vm61_vm1 = vcmask 523264   ;;  %vm106_vm2 = vcmask 261120   ;;  %s230_s1 = inlined_call_operand.vmem [shape: bf16[64,32], index: 1, kind: input, shape index: {}]   ;;  %s231_s0 = inlined_call_operand.vmem [shape: bf16[16,64], index: 0, kind: input, shape index: {}]   ;;  %s232_s2 = inlined_call_operand.vmem [shape: f32[1,32], index: 2, kind: input, shape index: {}]   ;;  %s233_s3 = inlined_call_operand.vmem [shape: f32[16,32], index: 3, kind: output, shape index: {}]  }
   0x1   :  { %151 = vmatprep.subr.bf16.mxu0 %v178_v0  ;;  %v165_v1 = vld [vmem:[%s230_s1 + $0x18] sm:$0xff]   ;;  %159 = vmatprep.mubr.msk.bf16.mxu0 %vm179_vm0, %v178_v0  ;;  %v166_v2 = vld [vmem:[%s230_s1 + $0x10] sm:$0xff]   ;;  %v167_v3 = vld [vmem:[%s230_s1 + $0x8] sm:$0xff]  }
   0x2   :  { %152 = vmatpush3.bf16.msra.mxu0 %v165_v1  ;;  %v168_v4 = vld [vmem:[%s230_s1] sm:$0xff]  }
   0x3   :  { %153 = vmatprep.subr.bf16.mxu0 %v178_v0  ;;  %v169_v5 = vld [vmem:[%s231_s0] sm:$0xff]  }
   0x4   :  { %v139_v6 = vld [vmem:[%s232_s2] ss:$0 sm:$0xff] }
   0x6   :  { %154 = vmatpush3.bf16.msra.mxu0 %v166_v2 }
   0x7   :  { %155 = vmatprep.subr.bf16.mxu0 %v178_v0 }
   0xa   :  { %156 = vmatpush3.bf16.msra.mxu0 %v167_v3 }
   0xb   :  { %157 = vmatprep.subr.bf16.mxu0 %v178_v0 }
   0xe   :  { %158 = vmatpush3.bf16.msra.mxu0 %v168_v4 }
  0x11   :  { %160 = vmatmul.mubr.msk.bf16.vlgmr.msra.gmra.mxu0 %vm61_vm1, %v169_v5 }
  0xd1   :  { %v99_v7 = vpop.f32.mrf.mxu0 }
  0xd2   :  { %v100_v8 = vadd.f32 %v139_v6, %v99_v7 }
  0xd3   :  { %v161_v9 = vpop.f32.mrf.mxu0 }
  0xd4   :  { %v107_v10 = vsel %vm106_vm2, %v100_v8, -inf }
  0xd5   :  { %108 = vmax.xlane.f32.xlu0 %v107_v10  ;;  %v102_v11 = vpop.f32.mrf.mxu0 }
  0xd6   :  { %v103_v12 = vadd.f32 %v139_v6, %v102_v11 }
  0xd7   :  { %v162_v13 = vpop.f32.mrf.mxu0 }
  0xd8   :  { %v110_v14 = vsel %vm106_vm2, %v103_v12, -inf }
  0xd9   :  { %111 = vmax.xlane.f32.xlu0 %v110_v14 }
 0x15e   :  { %v109_v15 = vpop.xlane.xlu0 %108 }
 0x15f   :  { %v113_v16 = vsub.f32 %v100_v8, %v109_v15 }
 0x161   :  { %v115_v17 = vmul.f32 1.442695, %v113_v16 }
 0x162   :  { %v112_v18 = vpop.xlane.xlu0 %111 }
 0x163   :  { %170 = vpow2.f32 %v115_v17  ;;  %v114_v19 = vsub.f32 %v103_v12, %v112_v18 }
 0x165   :  { %v117_v20 = vmul.f32 1.442695, %v114_v19 }
 0x167   :  { %172 = vpow2.f32 %v117_v20 }
 0x170   :  { %v171_v21 = vpop.eup %170 }
 0x171   :  { %v119_v22 = vsel %vm106_vm2, %v171_v21, 0.0 }
 0x172   :  { %120 = vadd.xlane.f32.xlu1 %v119_v22 }
 0x174   :  { %v173_v23 = vpop.eup %172 }
 0x175   :  { %v122_v24 = vsel %vm106_vm2, %v173_v23, 0.0 }
 0x176   :  { %123 = vadd.xlane.f32.xlu1 %v122_v24 }
 0x1fb   :  { %v121_v25 = vpop.xlane.xlu1 %120 }
 0x1fc   :  { %174 = vlog2.f32 %v121_v25 }
 0x1ff   :  { %v124_v26 = vpop.xlane.xlu1 %123 }
 0x200   :  { %176 = vlog2.f32 %v124_v26 }
 0x209   :  { %v175_v27 = vpop.eup %174 }
 0x20a   :  { %v126_v28 = vmul.f32 0.6931472, %v175_v27 }
 0x20c   :  { %v129_v29 = vadd.f32 %v126_v28, %v109_v15 }
 0x20d   :  { %v177_v30 = vpop.eup %176 }
 0x20e   :  { %v131_v31 = vsub.f32 %v100_v8, %v129_v29  ;;  %v128_v32 = vmul.f32 0.6931472, %v177_v30 }
 0x210   :  { %133 = vst.msk [vmem:[%s233_s3] sm:$0xff] %vm106_vm2, %v131_v31  ;;  %v130_v33 = vadd.f32 %v128_v32, %v112_v18 }
 0x212   :  { %v132_v34 = vsub.f32 %v103_v12, %v130_v33 }
 0x214   :  { %134 = vst.msk [vmem:[%s233_s3 + $0x8] sm:$0xff] %vm106_vm2, %v132_v34 }

// kernel: sentence_vae_forward.10
= control target key start
LH: loop header
LB: loop body
LE: loop exit
PB: predicated region body
PF: predicated region fallthrough
CT: control target
= control target key end

     0   :  { %v1586_v1 = vmov 0.0   ;;  %vm70_vm0 = vcmask 130048   ;;  %vm1587_vm1 = vmmov 0   ;;  %v1588_v5 = vmov 0   ;;  %s2007_s0 = inlined_call_operand.vmem [shape: bf16[8,8,16], index: 0, kind: input, shape index: {}]   ;;  %s2008_s1 = inlined_call_operand.vmem [shape: f32[8,128], index: 1, kind: input, shape index: {}]   ;;  %s2009_s2 = inlined_call_operand.vmem [shape: bf16[16,128], index: 2, kind: input, shape index: {}]   ;;  %s2010_s3 = inlined_call_operand.vmem [shape: bf16[128,128], index: 3, kind: input, shape index: {}]   ;;  %s2011_s4 = inlined_call_operand.vmem [shape: f32[1,128], index: 4, kind: input, shape index: {}]   ;;  %s2012_s5 = inlined_call_operand.vmem [shape: s32[8,1], index: 5, kind: input, shape index: {}]   ;;  %s2013_s6 = inlined_call_operand.vmem [shape: f32[8,8,128], index: 6, kind: output, shape index: {0}]   ;;  %s2014_s7 = inlined_call_operand.hbm [shape: f32[8,128], index: 7, kind: output, shape index: {1}]  }
   0x1   :  { %v1479_v0 = vld [vmem:[%s2010_s3 + $0x38] sm:$0xff]   ;;  %1313 = vmatprep.subr.bf16.mxu1 %v1586_v1  ;;  %v1480_v2 = vld [vmem:[%s2010_s3 + $0x30] sm:$0xff]   ;;  %v1481_v3 = vld [vmem:[%s2009_s2] sm:$0xff]   ;;  %1329 = vmatprep.mubr.msk.bf16.mxu1 %vm1587_vm1, %v1586_v1 }
   0x2   :  { %1314 = vmatpush3.bf16.msra.mxu1 %v1479_v0  ;;  %1303 = vmatprep.subr.bf16.mxu0 %v1481_v3  ;;  %v1483_v4 = vld [vmem:[%s2007_s0] sm:$0xff]   ;;  %v1484_v6 = vld [vmem:[%s2007_s0 + $0x8] sm:$0xff]   ;;  %v1487_v8 = vld [vmem:[%s2007_s0 + $0x10] sm:$0xff]  }
   0x3   :  { %1315 = vmatprep.subr.bf16.mxu1 %v1586_v1  ;;  %1477 = vset.pattern.permute.xlu0 %v1588_v5  ;;  %v1482_v7 = vld [vmem:[%s2010_s3 + $0x28] sm:$0xff]   ;;  %v1485_v9 = vld [vmem:[%s2010_s3 + $0x20] sm:$0xff]   ;;  %v1488_v10 = vld [vmem:[%s2007_s0 + $0x18] sm:$0xff]  }
   0x4   :  { %1304 = vmatpush3.bf16.msra.mxu0 %v1481_v3  ;;  %1478 = vset.pattern.permute.xlu1 %v1588_v5  ;;  %v1672_v11 = vld [vmem:[%s2012_s5] sm:$0xff]  ;;  %v1486_v12 = vld [vmem:[%s2010_s3 + $0x18] sm:$0xff]   ;;  %v1489_v15 = vld [vmem:[%s2010_s3 + $0x10] sm:$0xff]  }
   0x5   :  { %1305 = vmatprep.mubr.msk.bf16.mxu0 %vm70_vm0, %v1483_v4  ;;  %1333 = vmatprep.subr.bf16.mxu0 %v1586_v1  ;;  %vm269_vm2 = vcmp.gt.s32.totalorder %v1672_v11, 7  ;;  %vm390_vm3 = vcmp.gt.s32.totalorder %v1672_v11, 6  ;;  %vm753_vm4 = vcmp.gt.s32.totalorder %v1672_v11, 3  ;;  %vm995_vm5 = vcmp.gt.s32.totalorder %v1672_v11, 1  ;;  %v1490_v18 = vld [vmem:[%s2010_s3 + $0x8] sm:$0xff]   ;;  %v1491_v19 = vld [vmem:[%s2010_s3] sm:$0xff]  }
   0x6   :  { %1316 = vmatpush3.bf16.msra.mxu1 %v1480_v2  ;;  %v270_v13 = vsel %vm269_vm2, 1, %v1588_v5  ;;  %v391_v14 = vsel %vm390_vm3, 1, %v1588_v5  ;;  %v754_v16 = vsel %vm753_vm4, 1, %v1588_v5  ;;  %v996_v17 = vsel %vm995_vm5, 1, %v1588_v5  ;;  %v1703_v20 = vld [vmem:[%s2008_s1] sm:$0xff] }
   0x7   :  { %1317 = vmatprep.subr.bf16.mxu1 %v1586_v1  ;;  %1306 = vmatmul.mubr.msk.bf16.vlgmr.msra.gmra.mxu0 %vm70_vm0, %v1484_v6  ;;  %v162_v21 = vpack.c.bf16 %v1703_v20, %v1703_v20 }
   0x8   :  { %1309 = vmatprep.mubr.msk.bf16.mxu0 %vm70_vm0, %v1487_v8  ;;  %272 = vperm.xlu0 %1477, %v270_v13  }
   0xa   :  { %1318 = vmatpush3.bf16.msra.mxu1 %v1482_v7 }
   0xb   :  { %1319 = vmatprep.subr.bf16.mxu1 %v1586_v1 }
   0xc   :  { %393 = vperm.xlu0 %1477, %v391_v14  }
   0xe   :  { %1320 = vmatpush3.bf16.msra.mxu1 %v1485_v9 }
   0xf   :  { %1321 = vmatprep.subr.bf16.mxu1 %v1586_v1  ;;  %1310 = vmatmul.mubr.msk.bf16.gmra.mxu0 %vm70_vm0, %v1488_v10 }
  0x10   :  { %1349 = vmatprep.mubr.msk.bf16.mxu0 %vm1587_vm1, %v1586_v1  ;;  %756 = vperm.xlu0 %1477, %v754_v16  }
  0x12   :  { %1322 = vmatpush3.bf16.msra.mxu1 %v1486_v12 }
  0x13   :  { %1323 = vmatprep.subr.bf16.mxu1 %v1586_v1 }
  0x14   :  { %998 = vperm.xlu0 %1477, %v996_v17  }
  0x16   :  { %1324 = vmatpush3.bf16.msra.mxu1 %v1489_v15 }
  0x17   :  { %1325 = vmatprep.subr.bf16.mxu1 %v1586_v1 }
  0x1a   :  { %1326 = vmatpush3.bf16.msra.mxu1 %v1490_v18 }
  0x1b   :  { %1327 = vmatprep.subr.bf16.mxu1 %v1586_v1 }
  0x1e   :  { %1328 = vmatpush3.bf16.msra.mxu1 %v1491_v19 }
  0x1f   :  { %1353 = vmatprep.subr.bf16.mxu1 %v1586_v1 }
  0x21   :  { %1330 = vmatmul.mubr.bf16.vlgmr.msra.gmra.mxu1 %v162_v21 }
  0x22   :  { %1369 = vmatprep.mubr.msk.bf16.mxu1 %vm1587_vm1, %v1586_v1 }
  0x23   :  { %13 = vsyncpa [#allocation5], 0  ;;  %v1492_v22 = vld [vmem:[%s2010_s3 + $0x38] sm:$0xff]   ;;  %v1493_v23 = vld [vmem:[%s2010_s3 + $0x30] sm:$0xff]   ;;  %vm511_vm7 = vcmp.gt.s32.totalorder %v1672_v11, 5  ;;  %vm632_vm8 = vcmp.gt.s32.totalorder %v1672_v11, 4 }
  0x24   :  { %1334 = vmatpush3.bf16.msra.mxu0 %v1492_v22  ;;  %v1494_v24 = vld [vmem:[%s2010_s3 + $0x28] sm:$0xff]   ;;  %v1495_v25 = vld [vmem:[%s2010_s3 + $0x20] sm:$0xff]   ;;  %v1496_v26 = vld [vmem:[%s2010_s3 + $0x18] sm:$0xff]   ;;  %v512_v0 = vsel %vm511_vm7, 1, %v1588_v5  ;;  %v633_v3 = vsel %vm632_vm8, 1, %v1588_v5  ;;  %vm874_vm9 = vcmp.gt.s32.totalorder %v1672_v11, 2 }
  0x25   :  { %1335 = vmatprep.subr.bf16.mxu0 %v1586_v1  ;;  %v1497_v27 = vld [vmem:[%s2010_s3 + $0x10] sm:$0xff]   ;;  %v1498_v28 = vld [vmem:[%s2010_s3 + $0x8] sm:$0xff]   ;;  %v1499_v29 = vld [vmem:[%s2010_s3] sm:$0xff]   ;;  %514 = vperm.xlu1 %1478, %v512_v0   ;;  %v875_v6 = vsel %vm874_vm9, 1, %v1588_v5  ;;  %vm1115_vm10 = vcmp.gt.s32.totalorder %v1672_v11, 0 }
  0x26   :  { %v1500_v30 = vld [vmem:[%s2010_s3 + $0x38] sm:$0xff]   ;;  %v1501_v31 = vld [vmem:[%s2010_s3 + $0x30] sm:$0xff]   ;;  %v1502_v32 = vld [vmem:[%s2010_s3 + $0x28] sm:$0xff]   ;;  %v1116_v7 = vsel %vm1115_vm10, 1, %v1588_v5 }
  0x27   :  { %1354 = vmatpush3.bf16.msra.mxu1 %v1500_v30  ;;  %v1758_v33 = vld [vmem:[%s2011_s4] ss:$0 sm:$0xff]  ;;  %v1504_v59 = vld [vmem:[%s2010_s3 + $0x18] sm:$0xff]   ;;  %v1505_v60 = vld [vmem:[%s2010_s3 + $0x10] sm:$0xff]  }
  0x28   :  { %1336 = vmatpush3.bf16.msra.mxu0 %v1493_v23  ;;  %1355 = vmatprep.subr.bf16.mxu1 %v1586_v1  ;;  %v1503_v58 = vld [vmem:[%s2010_s3 + $0x20] sm:$0xff]   ;;  %v1506_v61 = vld [vmem:[%s2010_s3 + $0x8] sm:$0xff]   ;;  %v1508_v63 = vld [vmem:[%s2010_s3 + $0x38] sm:$0xff]  }
  0x29   :  { %1337 = vmatprep.subr.bf16.mxu0 %v1586_v1  ;;  %v1507_v62 = vld [vmem:[%s2010_s3] sm:$0xff]   ;;  %v1509_v2 = vld [vmem:[%s2010_s3 + $0x30] sm:$0xff]   ;;  %635 = vperm.xlu1 %1478, %v633_v3   ;;  %v1510_v4 = vld [vmem:[%s2010_s3 + $0x28] sm:$0xff]  }
  0x2a   :  { %v1511_v11 = vld [vmem:[%s2010_s3 + $0x20] sm:$0xff]   ;;  %v1512_v19 = vld [vmem:[%s2010_s3 + $0x18] sm:$0xff]   ;;  %v1514_v21 = vld [vmem:[%s2010_s3 + $0x8] sm:$0xff]  }
  0x2b   :  { %1356 = vmatpush3.bf16.msra.mxu1 %v1501_v31  ;;  %v1515_v22 = vld [vmem:[%s2010_s3] sm:$0xff]   ;;  %v1516_v23 = vld [vmem:[%s2010_s3 + $0x38] sm:$0xff]   ;;  %v1534_v3 = vld [vmem:[%s2010_s3 + $0x28] sm:$0xff]  }
  0x2c   :  { %1338 = vmatpush3.bf16.msra.mxu0 %v1494_v24  ;;  %1357 = vmatprep.subr.bf16.mxu1 %v1586_v1  ;;  %v1517_v24 = vld [vmem:[%s2010_s3 + $0x30] sm:$0xff]   ;;  %v1532_v0 = vld [vmem:[%s2010_s3 + $0x38] sm:$0xff]  }
  0x2d   :  { %1339 = vmatprep.subr.bf16.mxu0 %v1586_v1  ;;  %877 = vperm.xlu1 %1478, %v875_v6  }
  0x2f   :  { %1358 = vmatpush3.bf16.msra.mxu1 %v1502_v32 }
  0x30   :  { %1340 = vmatpush3.bf16.msra.mxu0 %v1495_v25  ;;  %1359 = vmatprep.subr.bf16.mxu1 %v1586_v1  ;;  %v1518_v25 = vld [vmem:[%s2010_s3 + $0x28] sm:$0xff]  }
  0x31   :  { %1341 = vmatprep.subr.bf16.mxu0 %v1586_v1  ;;  %1118 = vperm.xlu1 %1478, %v1116_v7  }
  0x33   :  { %1360 = vmatpush3.bf16.msra.mxu1 %v1503_v58 }
  0x34   :  { %1342 = vmatpush3.bf16.msra.mxu0 %v1496_v26  ;;  %1361 = vmatprep.subr.bf16.mxu1 %v1586_v1 }
  0x35   :  { %1343 = vmatprep.subr.bf16.mxu0 %v1586_v1 }
  0x37   :  { %1362 = vmatpush3.bf16.msra.mxu1 %v1504_v59 }
  0x38   :  { %1344 = vmatpush3.bf16.msra.mxu0 %v1497_v27  ;;  %1363 = vmatprep.subr.bf16.mxu1 %v1586_v1 }
  0x39   :  { %1345 = vmatprep.subr.bf16.mxu0 %v1586_v1 }
  0x3b   :  { %1364 = vmatpush3.bf16.msra.mxu1 %v1505_v60  ;;  %v1528_v60 = vld [vmem:[%s2010_s3 + $0x18] sm:$0xff]  }
  0x3c   :  { %1346 = vmatpush3.bf16.msra.mxu0 %v1498_v28  ;;  %1365 = vmatprep.subr.bf16.mxu1 %v1586_v1 }
  0x3d   :  { %1347 = vmatprep.subr.bf16.mxu0 %v1586_v1 }
  0x3f   :  { %1366 = vmatpush3.bf16.msra.mxu1 %v1506_v61  ;;  %v1529_v61 = vld [vmem:[%s2010_s3 + $0x10] sm:$0xff]  }
  0x40   :  { %1348 = vmatpush3.bf16.msra.mxu0 %v1499_v29  ;;  %1367 = vmatprep.subr.bf16.mxu1 %v1586_v1 }
  0x41   :  { %1373 = vmatprep.subr.bf16.mxu0 %v1586_v1 }
  0x43   :  { %1368 = vmatpush3.bf16.msra.mxu1 %v1507_v62  ;;  %v1530_v62 = vld [vmem:[%s2010_s3 + $0x8] sm:$0xff]  }
  0x44   :  { %1393 = vmatprep.subr.bf16.mxu1 %v1586_v1 }
  0x83   :  { %v273_v53 = vpop.permute.xlu0 %272 }
  0x84   :  { %vm274_vm6 = vcmp.eq.s32.totalorder %v273_v53, 1 }
  0x87   :  { %v394_v15 = vpop.permute.xlu0 %393 }
  0x88   :  { %vm395_vm11 = vcmp.eq.s32.totalorder %v394_v15, 1 }
  0xa0   :  { %v515_v32 = vpop.permute.xlu1 %514 }
  0xa1   :  { %vm516_vm12 = vcmp.eq.s32.totalorder %v515_v32, 1  ;;  %v1545_v32 = vld [vmem:[%s2010_s3 + $0x10] sm:$0xff]  }
  0xc7   :  { %v1307_v34 = vpop.f32.mrf.mxu0 }
  0xc8   :  { %v1761_v35 = vadd.f32 %v1307_v34, %v1758_v33 }
  0xc9   :  { %v117_v36 = vpop.f32.mrf.mxu0 }
  0xca   :  { %v1764_v37 = vadd.f32 %v1758_v33, %v117_v36 }
  0xcb   :  { %v1308_v38 = vpop.f32.mrf.mxu0 }
  0xcc   :  { %v1767_v39 = vadd.f32 %v1308_v38, %v1758_v33 }
  0xcd   :  { %v120_v40 = vpop.f32.mrf.mxu0 }
  0xce   :  { %v1770_v41 = vadd.f32 %v1758_v33, %v120_v40 }
  0xcf   :  { %v1311_v42 = vpop.f32.mrf.mxu0 }
  0xd0   :  { %v142_v43 = vadd.f32 %v1311_v42, %v1758_v33  ;;  %v1520_v42 = vld [vmem:[%s2010_s3 + $0x18] sm:$0xff]  }
  0xd1   :  { %v133_v44 = vpop.f32.mrf.mxu0 }
  0xd2   :  { %v1774_v45 = vadd.f32 %v1758_v33, %v133_v44  ;;  %v1522_v44 = vld [vmem:[%s2010_s3 + $0x8] sm:$0xff]  }
  0xd3   :  { %v1312_v46 = vpop.f32.mrf.mxu0 }
  0xd4   :  { %v145_v47 = vadd.f32 %v1312_v46, %v1758_v33  ;;  %v1523_v46 = vld [vmem:[%s2010_s3] sm:$0xff]  }
  0xd5   :  { %v136_v8 = vpop.f32.mrf.mxu0 }
  0xd6   :  { %v137_v26 = vadd.f32 %v1758_v33, %v136_v8  ;;  %v1519_v33 = vld [vmem:[%s2010_s3 + $0x20] sm:$0xff]  }
  0xe1   :  { %v261_v48 = vpop.f32.mrf.mxu1 }
  0xe2   :  { %v267_v49 = vadd.f32 %v261_v48, %v145_v47  ;;  %v1524_v47 = vld [vmem:[%s2010_s3 + $0x38] sm:$0xff]   ;;  %v1525_v48 = vld [vmem:[%s2010_s3 + $0x30] sm:$0xff]  }
  0xe3   :  { %v1331_v50 = vpop.f32.mrf.mxu1 }
  0xe4   :  { %1548 = vtanh.f32 %v267_v49  ;;  %v1526_v49 = vld [vmem:[%s2010_s3 + $0x28] sm:$0xff]  }
  0xe5   :  { %v264_v51 = vpop.f32.mrf.mxu1 }
  0xe7   :  { %v1332_v52 = vpop.f32.mrf.mxu1 }
  0xf1   :  { %v1549_v54 = vpop.eup %1548 }
  0xf2   :  { %v275_v55 = vsel %vm274_vm6, %v1549_v54, %v1703_v20  ;;  %v277_v56 = vsel %vm274_vm6, %v1549_v54, 0.0  ;;  %v1513_v20 = vld [vmem:[%s2010_s3 + $0x10] sm:$0xff]  }
  0xf3   :  { %1163 = vst [vmem:[%s2013_s6 + $0x38] sm:$0xff] %v277_v56  ;;  %v283_v57 = vpack.c.bf16 %v275_v55, %v275_v55 }
  0xf5   :  { %1350 = vmatmul.mubr.bf16.vlgmr.msra.gmra.mxu0 %v283_v57 }
  0xf6   :  { %1389 = vmatprep.mubr.msk.bf16.mxu0 %vm1587_vm1, %v1586_v1  ;;  %1374 = vmatpush3.bf16.msra.mxu0 %v1508_v63  ;;  %v1531_v63 = vld [vmem:[%s2010_s3] sm:$0xff]  }
  0xf7   :  { %1375 = vmatprep.subr.bf16.mxu0 %v1586_v1 }
  0xfa   :  { %1376 = vmatpush3.bf16.msra.mxu0 %v1509_v2  ;;  %v1533_v2 = vld [vmem:[%s2010_s3 + $0x30] sm:$0xff]  }
  0xfb   :  { %1377 = vmatprep.subr.bf16.mxu0 %v1586_v1 }
  0xfe   :  { %1378 = vmatpush3.bf16.msra.mxu0 %v1510_v4 }
  0xff   :  { %1379 = vmatprep.subr.bf16.mxu0 %v1586_v1 }
 0x102   :  { %1380 = vmatpush3.bf16.msra.mxu0 %v1511_v11  ;;  %v1540_v11 = vld [vmem:[%s2010_s3 + $0x38] sm:$0xff]  }
 0x103   :  { %1381 = vmatprep.subr.bf16.mxu0 %v1586_v1 }
 0x106   :  { %1382 = vmatpush3.bf16.msra.mxu0 %v1512_v19  ;;  %v1541_v19 = vld [vmem:[%s2010_s3 + $0x30] sm:$0xff]  }
 0x107   :  { %1383 = vmatprep.subr.bf16.mxu0 %v1586_v1 }
 0x10a   :  { %1384 = vmatpush3.bf16.msra.mxu0 %v1513_v20  ;;  %v1542_v20 = vld [vmem:[%s2010_s3 + $0x28] sm:$0xff]  }
 0x10b   :  { %1385 = vmatprep.subr.bf16.mxu0 %v1586_v1 }
 0x10e   :  { %1386 = vmatpush3.bf16.msra.mxu0 %v1514_v21 }
 0x10f   :  { %1387 = vmatprep.subr.bf16.mxu0 %v1586_v1 }
 0x112   :  { %1388 = vmatpush3.bf16.msra.mxu0 %v1515_v22 }
 0x113   :  { %1413 = vmatprep.subr.bf16.mxu0 %v1586_v1 }
 0x1b5   :  { %v382_v9 = vpop.f32.mrf.mxu0 }
 0x1b6   :  { %v388_v10 = vadd.f32 %v382_v9, %v142_v43  ;;  %v1521_v43 = vld [vmem:[%s2010_s3 + $0x10] sm:$0xff]  }
 0x1b7   :  { %v1351_v12 = vpop.f32.mrf.mxu0 }
 0x1b8   :  { %1550 = vtanh.f32 %v388_v10  ;;  %v757_v10 = vpop.permute.xlu0 %756 }
 0x1b9   :  { %v385_v13 = vpop.f32.mrf.mxu0  ;;  %vm758_vm14 = vcmp.eq.s32.totalorder %v757_v10, 1 }
 0x1bb   :  { %v1352_v14 = vpop.f32.mrf.mxu0 }
 0x1c5   :  { %v1551_v16 = vpop.eup %1550 }
 0x1c6   :  { %v398_v17 = vsel %vm395_vm11, %v1551_v16, 0.0  ;;  %v396_v18 = vsel %vm395_vm11, %v1551_v16, %v275_v55  ;;  %v636_v55 = vpop.permute.xlu1 %635  ;;  %v1536_v16 = vld [vmem:[%s2010_s3 + $0x18] sm:$0xff]  }
 0x1c7   :  { %1172 = vst [vmem:[%s2013_s6 + $0x30] sm:$0xff] %v398_v17  ;;  %v404_v5 = vpack.c.bf16 %v396_v18, %v396_v18  ;;  %vm637_vm13 = vcmp.eq.s32.totalorder %v636_v55, 1  ;;  %v1537_v17 = vld [vmem:[%s2010_s3 + $0x10] sm:$0xff]  }
 0x1c9   :  { %1370 = vmatmul.mubr.bf16.vlgmr.msra.gmra.mxu1 %v404_v5  ;;  %v1539_v5 = vld [vmem:[%s2010_s3] sm:$0xff]  }
 0x1ca   :  { %1409 = vmatprep.mubr.msk.bf16.mxu1 %vm1587_vm1, %v1586_v1  ;;  %1394 = vmatpush3.bf16.msra.mxu1 %v1516_v23 }
 0x1cb   :  { %1395 = vmatprep.subr.bf16.mxu1 %v1586_v1 }
 0x1ce   :  { %1396 = vmatpush3.bf16.msra.mxu1 %v1517_v24 }
 0x1cf   :  { %1397 = vmatprep.subr.bf16.mxu1 %v1586_v1 }
 0x1d2   :  { %1398 = vmatpush3.bf16.msra.mxu1 %v1518_v25 }
 0x1d3   :  { %1399 = vmatprep.subr.bf16.mxu1 %v1586_v1 }
 0x1d6   :  { %1400 = vmatpush3.bf16.msra.mxu1 %v1519_v33 }
 0x1d7   :  { %1401 = vmatprep.subr.bf16.mxu1 %v1586_v1 }
 0x1da   :  { %1402 = vmatpush3.bf16.msra.mxu1 %v1520_v42 }
 0x1db   :  { %1403 = vmatprep.subr.bf16.mxu1 %v1586_v1 }
 0x1de   :  { %1404 = vmatpush3.bf16.msra.mxu1 %v1521_v43 }
 0x1df   :  { %1405 = vmatprep.subr.bf16.mxu1 %v1586_v1 }
 0x1e2   :  { %1406 = vmatpush3.bf16.msra.mxu1 %v1522_v44  ;;  %v999_v44 = vpop.permute.xlu0 %998 }
 0x1e3   :  { %1407 = vmatprep.subr.bf16.mxu1 %v1586_v1  ;;  %vm1000_vm0 = vcmp.eq.s32.totalorder %v999_v44, 1 }
 0x1e6   :  { %1408 = vmatpush3.bf16.msra.mxu1 %v1523_v46 }
 0x1e7   :  { %1433 = vmatprep.subr.bf16.mxu1 %v1586_v1 }
 0x289   :  { %v503_v27 = vpop.f32.mrf.mxu1 }
 0x28a   :  { %v509_v28 = vadd.f32 %v503_v27, %v137_v26  ;;  %v878_v26 = vpop.permute.xlu1 %877 }
 0x28b   :  { %v1371_v29 = vpop.f32.mrf.mxu1  ;;  %vm879_vm15 = vcmp.eq.s32.totalorder %v878_v26, 1 }
 0x28c   :  { %1552 = vtanh.f32 %v509_v28 }
 0x28d   :  { %v506_v30 = vpop.f32.mrf.mxu1 }
 0x28f   :  { %v1372_v31 = vpop.f32.mrf.mxu1 }
 0x290   :  { %v1543_v31 = vld [vmem:[%s2010_s3 + $0x20] sm:$0xff]  }
 0x299   :  { %v1553_v34 = vpop.eup %1552 }
 0x29a   :  { %v517_v36 = vsel %vm516_vm12, %v1553_v34, %v396_v18  ;;  %v519_v38 = vsel %vm516_vm12, %v1553_v34, 0.0  ;;  %v1538_v18 = vld [vmem:[%s2010_s3 + $0x8] sm:$0xff]  }
 0x29b   :  { %1181 = vst [vmem:[%s2013_s6 + $0x28] sm:$0xff] %v519_v38  ;;  %v525_v40 = vpack.c.bf16 %v517_v36, %v517_v36  ;;  %v1546_v34 = vld [vmem:[%s2010_s3 + $0x8] sm:$0xff]  }
 0x29d   :  { %1390 = vmatmul.mubr.bf16.vlgmr.msra.gmra.mxu0 %v525_v40 }
 0x29e   :  { %1429 = vmatprep.mubr.msk.bf16.mxu0 %vm1587_vm1, %v1586_v1  ;;  %1414 = vmatpush3.bf16.msra.mxu0 %v1524_v47 }
 0x29f   :  { %1415 = vmatprep.subr.bf16.mxu0 %v1586_v1 }
 0x2a2   :  { %1416 = vmatpush3.bf16.msra.mxu0 %v1525_v48 }
 0x2a3   :  { %1417 = vmatprep.subr.bf16.mxu0 %v1586_v1 }
 0x2a6   :  { %1418 = vmatpush3.bf16.msra.mxu0 %v1526_v49 }
 0x2a7   :  { %1419 = vmatprep.subr.bf16.mxu0 %v1586_v1 }
 0x35d   :  { %v624_v50 = vpop.f32.mrf.mxu0 }
 0x35e   :  { %v630_v51 = vadd.f32 %v624_v50, %v1774_v45  ;;  %v1527_v45 = vld [vmem:[%s2010_s3 + $0x20] sm:$0xff]  }
 0x35f   :  { %v1391_v52 = vpop.f32.mrf.mxu0  ;;  %1420 = vmatpush3.bf16.msra.mxu0 %v1527_v45 }
 0x360   :  { %1554 = vtanh.f32 %v630_v51  ;;  %1421 = vmatprep.subr.bf16.mxu0 %v1586_v1 }
 0x361   :  { %v627_v53 = vpop.f32.mrf.mxu0 }
 0x362   :  { %v1119_v53 = vpop.permute.xlu1 %1118 }
 0x363   :  { %v1392_v54 = vpop.f32.mrf.mxu0  ;;  %1422 = vmatpush3.bf16.msra.mxu0 %v1528_v60 }
 0x364   :  { %1423 = vmatprep.subr.bf16.mxu0 %v1586_v1 }
 0x367   :  { %1424 = vmatpush3.bf16.msra.mxu0 %v1529_v61 }
 0x368   :  { %1425 = vmatprep.subr.bf16.mxu0 %v1586_v1 }
 0x36b   :  { %1426 = vmatpush3.bf16.msra.mxu0 %v1530_v62 }
 0x36c   :  { %1427 = vmatprep.subr.bf16.mxu0 %v1586_v1 }
 0x36d   :  { %v1555_v56 = vpop.eup %1554 }
 0x36e   :  { %v640_v57 = vsel %vm637_vm13, %v1555_v56, 0.0  ;;  %v638_v58 = vsel %vm637_vm13, %v1555_v56, %v517_v36  ;;  %v1547_v36 = vld [vmem:[%s2010_s3] sm:$0xff]  }
 0x36f   :  { %1190 = vst [vmem:[%s2013_s6 + $0x20] sm:$0xff] %v640_v57  ;;  %v646_v59 = vpack.c.bf16 %v638_v58, %v638_v58  ;;  %1428 = vmatpush3.bf16.msra.mxu0 %v1531_v63 }
 0x370   :  { %1453 = vmatprep.subr.bf16.mxu0 %v1586_v1 }
 0x371   :  { %1410 = vmatmul.mubr.bf16.vlgmr.msra.gmra.mxu1 %v646_v59 }
 0x372   :  { %1449 = vmatprep.mubr.msk.bf16.mxu1 %vm1587_vm1, %v1586_v1  ;;  %1434 = vmatpush3.bf16.msra.mxu1 %v1532_v0 }
 0x373   :  { %1435 = vmatprep.subr.bf16.mxu1 %v1586_v1 }
 0x376   :  { %1436 = vmatpush3.bf16.msra.mxu1 %v1533_v2 }
 0x377   :  { %1437 = vmatprep.subr.bf16.mxu1 %v1586_v1 }
 0x37a   :  { %1438 = vmatpush3.bf16.msra.mxu1 %v1534_v3 }
 0x37b   :  { %1439 = vmatprep.subr.bf16.mxu1 %v1586_v1 }
 0x431   :  { %v745_v4 = vpop.f32.mrf.mxu1 }
 0x432   :  { %v751_v6 = vadd.f32 %v745_v4, %v1767_v39  ;;  %v1535_v39 = vld [vmem:[%s2010_s3 + $0x20] sm:$0xff]  }
 0x433   :  { %v1411_v7 = vpop.f32.mrf.mxu1  ;;  %1440 = vmatpush3.bf16.msra.mxu1 %v1535_v39 }
 0x434   :  { %1556 = vtanh.f32 %v751_v6  ;;  %1441 = vmatprep.subr.bf16.mxu1 %v1586_v1 }
 0x435   :  { %v748_v8 = vpop.f32.mrf.mxu1 }
 0x437   :  { %v1412_v9 = vpop.f32.mrf.mxu1  ;;  %1442 = vmatpush3.bf16.msra.mxu1 %v1536_v16 }
 0x438   :  { %1443 = vmatprep.subr.bf16.mxu1 %v1586_v1 }
 0x43b   :  { %1444 = vmatpush3.bf16.msra.mxu1 %v1537_v17 }
 0x43c   :  { %1445 = vmatprep.subr.bf16.mxu1 %v1586_v1 }
 0x43f   :  { %1446 = vmatpush3.bf16.msra.mxu1 %v1538_v18 }
 0x440   :  { %1447 = vmatprep.subr.bf16.mxu1 %v1586_v1 }
 0x441   :  { %v1557_v12 = vpop.eup %1556 }
 0x442   :  { %v761_v13 = vsel %vm758_vm14, %v1557_v12, 0.0  ;;  %v759_v14 = vsel %vm758_vm14, %v1557_v12, %v638_v58 }
 0x443   :  { %1199 = vst [vmem:[%s2013_s6 + $0x18] sm:$0xff] %v761_v13  ;;  %v767_v15 = vpack.c.bf16 %v759_v14, %v759_v14  ;;  %1448 = vmatpush3.bf16.msra.mxu1 %v1539_v5 }
 0x445   :  { %1430 = vmatmul.mubr.bf16.vlgmr.msra.gmra.mxu0 %v767_v15 }
 0x446   :  { %1469 = vmatprep.mubr.msk.bf16.mxu0 %vm1587_vm1, %v1586_v1  ;;  %1454 = vmatpush3.bf16.msra.mxu0 %v1540_v11  ;;  %vm1120_vm1 = vcmp.eq.s32.totalorder %v1119_v53, 1 }
 0x447   :  { %1455 = vmatprep.subr.bf16.mxu0 %v1586_v1 }
 0x44a   :  { %1456 = vmatpush3.bf16.msra.mxu0 %v1541_v19 }
 0x44b   :  { %1457 = vmatprep.subr.bf16.mxu0 %v1586_v1 }
 0x44e   :  { %1458 = vmatpush3.bf16.msra.mxu0 %v1542_v20 }
 0x44f   :  { %1459 = vmatprep.subr.bf16.mxu0 %v1586_v1 }
 0x452   :  { %1460 = vmatpush3.bf16.msra.mxu0 %v1543_v31 }
 0x453   :  { %1461 = vmatprep.subr.bf16.mxu0 %v1586_v1 }
 0x505   :  { %v866_v21 = vpop.f32.mrf.mxu0 }
 0x506   :  { %v872_v22 = vadd.f32 %v866_v21, %v1761_v35  ;;  %v1544_v35 = vld [vmem:[%s2010_s3 + $0x18] sm:$0xff]   ;;  %s1589_s3 = smov [#allocation4]  }
 0x507   :  { %v1431_v23 = vpop.f32.mrf.mxu0  ;;  %1462 = vmatpush3.bf16.msra.mxu0 %v1544_v35  ;;  %s1135_s19 = sshll.u32 %s1589_s3, 4  ;;  %s1136_s19 = int_to_ptr.vmem [resolvable:$true] %s1135_s19 }
 0x508   :  { %1558 = vtanh.f32 %v872_v22  ;;  %1463 = vmatprep.subr.bf16.mxu0 %v1586_v1  ;;  %s1564_s0 = scalar_lea.vmem %s1136_s19, 128  ;;  %p1569_p1 = scmp.lt.s32.totalorder %s1136_s19, %s1136_s19 }
 0x509   :  { %v869_v24 = vpop.f32.mrf.mxu0  ;;  %p1565_p0 = scmp.ne.s32.totalorder %s1136_s19, %s1564_s0  ;;  %p1570_p2 = scmp.lt.s32.totalorder %s1564_s0, %s1564_s0 }
 0x50b   :  { %v1432_v25 = vpop.f32.mrf.mxu0  ;;  %1464 = vmatpush3.bf16.msra.mxu0 %v1545_v32  ;;  %p1571_p3 = por %p1570_p2, %p1569_p1 }
 0x50c   :  { %1465 = vmatprep.subr.bf16.mxu0 %v1586_v1 }
 0x50d   :  { %p1572_p4 = pnand %p1571_p3, %p1565_p0 }
 0x50f   :  { %1466 = vmatpush3.bf16.msra.mxu0 %v1546_v34 }
 0x510   :  { %1467 = vmatprep.subr.bf16.mxu0 %v1586_v1 }
 0x513   :  { %1468 = vmatpush3.bf16.msra.mxu0 %v1547_v36 }
 0x515   :  { %v1559_v27 = vpop.eup %1558 }
 0x516   :  { %v882_v28 = vsel %vm879_vm15, %v1559_v27, 0.0  ;;  %v880_v29 = vsel %vm879_vm15, %v1559_v27, %v759_v14 }
 0x517   :  { %1208 = vst [vmem:[%s2013_s6 + $0x10] sm:$0xff] %v882_v28  ;;  %v888_v30 = vpack.c.bf16 %v880_v29, %v880_v29 }
 0x519   :  { %1450 = vmatmul.mubr.bf16.vlgmr.msra.gmra.mxu1 %v888_v30 }
 0x5d9   :  { %v987_v38 = vpop.f32.mrf.mxu1 }
 0x5da   :  { %v993_v40 = vadd.f32 %v987_v38, %v1770_v41 }
 0x5db   :  { %v1451_v33 = vpop.f32.mrf.mxu1 }
 0x5dc   :  { %1560 = vtanh.f32 %v993_v40 }
 0x5dd   :  { %v990_v42 = vpop.f32.mrf.mxu1 }
 0x5df   :  { %v1452_v43 = vpop.f32.mrf.mxu1 }
 0x5e9   :  { %v1561_v46 = vpop.eup %1560 }
 0x5ea   :  { %v1003_v47 = vsel %vm1000_vm0, %v1561_v46, 0.0  ;;  %v1001_v48 = vsel %vm1000_vm0, %v1561_v46, %v880_v29 }
 0x5eb   :  { %1217 = vst [vmem:[%s2013_s6 + $0x8] sm:$0xff] %v1003_v47  ;;  %v1008_v1 = vpack.c.bf16 %v1001_v48, %v1001_v48 }
 0x5ed   :  { %1470 = vmatmul.mubr.bf16.vlgmr.msra.gmra.mxu0 %v1008_v1 }
 0x6ad   :  { %v1107_v49 = vpop.f32.mrf.mxu0 }
 0x6ae   :  { %v1113_v50 = vadd.f32 %v1107_v49, %v1764_v37 }
 0x6af   :  { %v1471_v51 = vpop.f32.mrf.mxu0 }
 0x6b0   :  { %1562 = vtanh.f32 %v1113_v50 }
 0x6b1   :  { %v1110_v41 = vpop.f32.mrf.mxu0 }
 0x6b3   :  { %v1472_v52 = vpop.f32.mrf.mxu0 }
 0x6bd   :  { %v1563_v54 = vpop.eup %1562 }
 0x6be   :  { %v1123_v55 = vsel %vm1120_vm1, %v1563_v54, 0.0  ;;  %v1121_v56 = vsel %vm1120_vm1, %v1563_v54, %v1001_v48 }
 0x6bf   :  { %1124 = vst [vmem:[%s2013_s6] sm:$0xff] %v1123_v55  ;;  %1126 = vst [vmem:[#allocation4] sm:$0xff] %v1121_v56 }
 0x6c0   :  { %1575 = shalt.err (!%p1572_p4)
}
 0x6c1   :  { %1138 = dma.vmem_to_hbm [thread:$0]  %s1136_s19, 128, %s2014_s7, [#allocation5]  }
 0x6c2   :  { %1584 = dma.done.wait [#allocation5], 128  }
 0x6c3   :  { %1585 = vsyncadd [#allocation5], 4294967168 }
 0x6c4   :  { %1144 = vsyncpa [#allocation5], 1 }

</bundles_post_ra>
